<compile_context>
chip_gen: v7x
topology: tpu7x:2x2x1
jax: 0.10.0
libtpu: 0.0.40
codegen_flags: <defaults>
</compile_context>

<pallas_src>
from functools import partial

import jax
import jax.numpy as jnp
import numpy as np
from jax import lax
from jax.experimental import pallas as pl
from jax.experimental.pallas import tpu as pltpu

EPS = 1e-6
HIDDEN = 512    # fixed by the module architecture (Linear(in_chans, 512))
LANE = 128
SUBLANE = 8


def _round_up(x, m):
    return (x + m - 1) // m * m


# ----------------------------------------------------------------------------
# Kernel
# ----------------------------------------------------------------------------
def _att_head_kernel(ts_valid, gem_p_static, p_ref, x_ref, w1_ref, b1_ref,
                     waf_ref, baf_ref, red_ref, fs_ref, att_ref):
    """One batch tile.  x block = (Bt, Tsp, F, C): channels in lanes, freq in
    sublanes -> GeM mean over F is a second-minor reduce and the pooled tile is
    already (batch, time, chan) for the MXU (no in-kernel transpose)."""
    bt, tsp, _, c = x_ref.shape
    ncp = att_ref.shape[-1]

    x = x_ref[...]                                    # (Bt, Tsp, F, C) f32
    xc = jnp.maximum(x, EPS)                          # zero-padded rows -> EPS (log-safe)

    # --- GeMFreq: mean_F(clamp(x, eps)^p) ^ (1/p) ---
    if gem_p_static is not None and float(gem_p_static).is_integer():
        # frozen integer exponent: pure VPU multiplies over the big x block
        xp = xc
        for _ in range(int(gem_p_static) - 1):
            xp = xp * xc
        inv_p = 1.0 / float(gem_p_static)
    elif gem_p_static is not None:
        xp = jnp.exp(float(gem_p_static) * jnp.log(xc))
        inv_p = 1.0 / float(gem_p_static)
    else:
        p = p_ref[0]
        xp = jnp.exp(p * jnp.log(xc))                 # clamp(x)^p on the EUP
        inv_p = 1.0 / p
    mean_p = jnp.mean(xp, axis=2)                     # (Bt, Tsp, C)
    pooled = jnp.exp(jnp.log(mean_p) * inv_p)         # (Bt, Tsp, C)

    # pooled is already time-major: flatten straight into MXU rows (Tsp % 8 == 0
    # so this reshape is sublane-aligned, no relayout copy).
    feat = pooled.reshape(bt * tsp, c)
    wdt = w1_ref.dtype                                # bf16 by default

    # --- dense_layers: Linear(in_chans, 512) + ReLU (eval: dropout = identity) ---
    h = jnp.dot(feat.astype(wdt), w1_ref[...],
                preferred_element_type=jnp.float32) + b1_ref[...]
    h = jnp.maximum(h, 0.0)                           # (Bt*Tsp, 512) f32

    # --- fused attention + fix_scale 1x1 convs: one (Bt*Tsp,512)x(512,2*NCp) ---
    af = jnp.dot(h.astype(wdt), waf_ref[...],
                 preferred_element_type=jnp.float32) + baf_ref[...]
    time_att = jnp.tanh(af[:, :ncp]).reshape(bt, tsp, ncp)   # (Bt, Tsp, NCp)
    fs = af[:, ncp:].reshape(bt, tsp, ncp)                   # (Bt, Tsp, NCp)

    # --- softmax over the valid time rows (padded rows contribute exactly 0) ---
    t_ids = lax.broadcasted_iota(jnp.int32, (1, tsp, 1), 1)
    valid = t_ids < ts_valid
    mx = jnp.max(time_att, axis=1, keepdims=True)     # >= valid max; shift-invariant
    e = jnp.where(valid, jnp.exp(time_att - mx), 0.0)
    inv_den = pl.reciprocal(jnp.sum(e, axis=1, keepdims=True), approx=True)
    att = e * inv_den                                 # VPU multiply, EUP reciprocal

    sig = 0.5 * (jnp.tanh(0.5 * fs) + 1.0)            # sigmoid via one EUP tanh
    logits = jnp.sum(fs * att, axis=1)                # (Bt, NCp)
    clip = jnp.sum(sig * att, axis=1)                 # (Bt, NCp)

    # merged reduction output: row 0 = logits, row 1 = clipwise_pred
    red_ref[...] = jnp.concatenate([logits[:, None, :], clip[:, None, :]], axis=1)
    fs_ref[...] = fs.astype(fs_ref.dtype)             # bf16 writeback by default
    att_ref[...] = time_att.astype(att_ref.dtype)


# ----------------------------------------------------------------------------
# Wrapper helpers
# ----------------------------------------------------------------------------
def _crop_bounds(T, train_period, infer_period, training):
    if training or train_period == infer_period:
        return 0, T
    ratio = infer_period / train_period
    s = T / 2 - T * ratio / 2
    e = s + T * ratio
    return int(s), int(e)


def _vmem_capacity_bytes():
    """Physical VMEM of the current chip; conservative fallback if unavailable."""
    try:
        info = pltpu.get_tpu_info()
        for name in ("vmem_capacity_bytes", "vmem_bytes", "vmem_size_bytes"):
            v = getattr(info, name, None)
            if v:
                return int(v)
    except Exception:
        pass
    return 64 * 1024 * 1024     # v7x per-TC size — the smallest of the family


def _pick_batch_tile(B, Tsp, C, Fq, NCp, H, w_isz, o_isz, *, target_rows,
                     vmem_budget_bytes):
    """Pick Bt so Bt*Tsp fills the MXU M dim, under an (8,128)-tiled VMEM count."""
    r8 = lambda v: _round_up(v, SUBLANE)
    rl = lambda v: _round_up(v, LANE)

    def per_step_bytes(bt):
        x_blk = bt * Tsp * r8(Fq) * rl(C) * 4                 # f32 input block
        red_blk = bt * r8(2) * rl(NCp) * 4
        fa_blk = bt * r8(Tsp) * rl(NCp) * o_isz
        pipelined = 2 * (x_blk + red_blk + 2 * fa_blk)        # double-buffered blocks
        weights = ((r8(C) * rl(H) + r8(H) * rl(2 * NCp)) * w_isz   # single-buffered
                   + r8(1) * rl(H) * 4 + r8(1) * rl(2 * NCp) * 4)
        # in-kernel temporaries: one x-sized f32 slab (pow/log) + h / af rows
        # and softmax intermediates in f32
        scratch = x_blk + bt * r8(Tsp) * (rl(H) + 4 * rl(NCp)) * 4
        return pipelined + weights + scratch

    bt = min(B, max(1, -(-target_rows // max(Tsp, 1))))
    while bt > 1 and per_step_bytes(bt) > vmem_budget_bytes:
        bt -= 1
    # Give the ("parallel",) grid axis >= 2 steps so v7x's two TensorCores both
    # get work (harmless on single-TC v5e/v6e).
    if B >= 2 and bt >= B:
        bt = -(-B // 2)
    return bt


def _weight_spec(shape, single_buffer):
    """Grid-constant weight block; single-buffered when supported."""
    index_map = lambda b: (0,) * len(shape)
    if single_buffer:
        try:
            return pl.BlockSpec(shape, index_map, pipeline_mode=pl.Buffered(1))
        except Exception:
            pass
    return pl.BlockSpec(shape, index_map)


# ----------------------------------------------------------------------------
# Public forward
# ----------------------------------------------------------------------------
def att_head_forward(x_nchw, params, *, train_period=15.0, infer_period=5.0,
                     training=False, weights_dtype=jnp.bfloat16,
                     out_dtype=jnp.bfloat16, gem_p_static=None,
                     target_rows=256):
    """x_nchw: (B, C, F, T) float32, same convention as the PyTorch module.

    Returns (logits, clipwise_pred, fix_scale_feat, time_att); the last two are
    (B, Ts, num_class) — exactly the shapes the PyTorch module returns after
    its .permute(0, 2, 1) calls ((B, NC, T') -> (B, T', NC)).
    """
    B, C, Fq, T = x_nchw.shape
    start, end = _crop_bounds(T, train_period, infer_period, training)
    Ts = end - start
    NC = params["ba"].shape[-1]
    H = params["w1"].shape[-1]
    NCp = _round_up(NC, LANE)
    Tsp = _round_up(Ts, SUBLANE)

    # Crop + transpose fused into one HBM pass: (B, C, F, T) -> (B, Ts, F, C).
    # Channels land in lanes (dense for realistic in_chans >= 128), freq in
    # sublanes; time padded to a multiple of 8 (masked out of the softmax).
    x_c = jnp.transpose(x_nchw[:, :, :, start:end], (0, 3, 2, 1))
    if Tsp != Ts:
        x_c = jnp.pad(x_c, ((0, 0), (0, Tsp - Ts), (0, 0), (0, 0)))

    # Pad class dim to a lane-dense multiple of 128, fuse the two 1x1 convs into
    # one (H, 2*NCp) matrix, and cast weights to the MXU-native dtype (bf16 by
    # default).  Biases stay f32; accumulation is f32.
    pad = NCp - NC
    wa = jnp.pad(params["wa"], ((0, 0), (0, pad)))
    wf = jnp.pad(params["wf"], ((0, 0), (0, pad)))
    ba = jnp.pad(params["ba"], ((0, 0), (0, pad)))
    bf = jnp.pad(params["bf"], ((0, 0), (0, pad)))
    waf = jnp.concatenate([wa, wf], axis=1).astype(weights_dtype)   # (H, 2*NCp)
    baf = jnp.concatenate([ba, bf], axis=1).astype(jnp.float32)     # (1, 2*NCp)
    w1 = params["w1"].astype(weights_dtype)                         # (C, H)
    b1 = params["b1"].astype(jnp.float32)                           # (1, H)

    vmem_cap = _vmem_capacity_bytes()
    vmem_limit = min(int(0.75 * vmem_cap), 100 * 1024 * 1024)
    Bt = _pick_batch_tile(B, Tsp, C, Fq, NCp, H,
                          jnp.dtype(weights_dtype).itemsize,
                          jnp.dtype(out_dtype).itemsize,
                          target_rows=target_rows,
                          vmem_budget_bytes=int(0.8 * vmem_limit))
    Bp = _round_up(B, Bt)
    if Bp != B:
        x_c = jnp.pad(x_c, ((0, Bp - B), (0, 0), (0, 0), (0, 0)))
    nb = Bp // Bt

    out_shape = (
        jax.ShapeDtypeStruct((Bp, 2, NCp), jnp.float32),   # [logits; clipwise]
        jax.ShapeDtypeStruct((Bp, Tsp, NCp), out_dtype),   # fix_scale(feat)
        jax.ShapeDtypeStruct((Bp, Tsp, NCp), out_dtype),   # time_att
    )
    out_specs = (
        pl.BlockSpec((Bt, 2, NCp), lambda b: (b, 0, 0)),
        pl.BlockSpec((Bt, Tsp, NCp), lambda b: (b, 0, 0)),
        pl.BlockSpec((Bt, Tsp, NCp), lambda b: (b, 0, 0)),
    )
    kern = partial(_att_head_kernel, Ts, gem_p_static)

    def _run(single_buffer_weights):
        in_specs = [
            pl.BlockSpec(memory_space=pltpu.SMEM),                   # p (GeM exponent)
            pl.BlockSpec((Bt, Tsp, Fq, C), lambda b: (b, 0, 0, 0)),  # x block
            _weight_spec((C, H), single_buffer_weights),             # w1
            _weight_spec((1, H), single_buffer_weights),             # b1
            _weight_spec((H, 2 * NCp), single_buffer_weights),       # [wa | wf]
            _weight_spec((1, 2 * NCp), single_buffer_weights),       # [ba | bf]
        ]
        fn = pl.pallas_call(
            kern,
            grid=(nb,),
            in_specs=in_specs,
            out_specs=out_specs,
            out_shape=out_shape,
            compiler_params=pltpu.CompilerParams(
                dimension_semantics=("parallel",),
                vmem_limit_bytes=vmem_limit),
        )
        return fn(params["p"].astype(jnp.float32), x_c, w1, b1, waf, baf)

    try:
        # grid-constant weight blocks single-buffered (pl.Buffered(1))
        red, fs_o, att_o = jax.block_until_ready(_run(True))
    except Exception:
        # graceful fallback: default double-buffering of the weight blocks
        red, fs_o, att_o = jax.block_until_ready(_run(False))

    # slice off batch / time / class padding
    logits = red[:B, 0, :NC]
    clip = red[:B, 1, :NC]
    fs_out = fs_o[:B, :Ts, :NC]
    att_out = att_o[:B, :Ts, :NC]
    return logits, clip, fs_out, att_out


# ----------------------------------------------------------------------------
# Pure-JAX reference (mirrors the PyTorch forward, eval mode)
# ----------------------------------------------------------------------------
def ref_forward(x_nchw, params, *, train_period=15.0, infer_period=5.0,
                training=False):
    p = params["p"][0]
    xp = jnp.maximum(x_nchw, EPS) ** p
    pooled = jnp.mean(xp, axis=2) ** (1.0 / p)                   # (B, C, T)
    feat = jnp.transpose(pooled, (0, 2, 1))                      # (B, T, C)
    h = jnp.maximum(feat @ params["w1"] + params["b1"], 0.0)     # (B, T, 512)
    time_att = jnp.tanh(h @ params["wa"] + params["ba"])         # (B, T, NC)
    fs = h @ params["wf"] + params["bf"]                         # (B, T, NC)

    T = x_nchw.shape[-1]
    start, end = _crop_bounds(T, train_period, infer_period, training)
    time_att = time_att[:, start:end, :]
    fs = fs[:, start:end, :]
    att = jax.nn.softmax(time_att, axis=1)
    clip = jnp.sum(jax.nn.sigmoid(fs) * att, axis=1)
    logits = jnp.sum(fs * att, axis=1)
    return logits, clip, fs, time_att


def init_params(key, in_chans, num_class, hidden=HIDDEN):
    k1, k2, k3, k4, k5, k6 = jax.random.split(key, 6)
    scale = 0.05
    return {
        "p":  jnp.array([3.0], dtype=jnp.float32),                   # GeM exponent
        "w1": scale * jax.random.normal(k1, (in_chans, hidden), jnp.float32),
        "b1": scale * jax.random.normal(k2, (1, hidden), jnp.float32),
        "wa": scale * jax.random.normal(k3, (hidden, num_class), jnp.float32),
        "ba": scale * jax.random.normal(k4, (1, num_class), jnp.float32),
        "wf": scale * jax.random.normal(k5, (hidden, num_class), jnp.float32),
        "bf": scale * jax.random.normal(k6, (1, num_class), jnp.float32),
    }


if __name__ == "__main__":
    B, in_chans, Fq, T = 2, 8, 16, 12
    num_class = 397

    key = jax.random.PRNGKey(0)
    kx, kp = jax.random.split(key)
    # spectrogram-like positive input, PyTorch NCHW = (B, C, F, T)
    x = jax.random.uniform(kx, (B, in_chans, Fq, T), jnp.float32, 0.0, 1.0)
    params = init_params(kp, in_chans, num_class)

    refs = ref_forward(x, params)
    names = ["logits", "clipwise_pred", "fix_scale_feat", "time_att"]

    # default fast path: bf16 MXU operands + bf16 fs/att writeback + static p=3
    outs = jax.block_until_ready(att_head_forward(x, params, gem_p_static=3))
    for name, o, r in zip(names, outs, refs):
        assert o.shape == r.shape, (name, o.shape, r.shape)
        np.testing.assert_allclose(np.asarray(o.astype(jnp.float32)),
                                   np.asarray(r), rtol=3e-2, atol=3e-2,
                                   err_msg=name + " (bf16 path)")

    # strict path: f32 weights / outputs, dynamic GeM exponent from params
    outs32 = jax.block_until_ready(att_head_forward(
        x, params, weights_dtype=jnp.float32, out_dtype=jnp.float32))
    for name, o, r in zip(names, outs32, refs):
        assert o.shape == r.shape, (name, o.shape, r.shape)
        np.testing.assert_allclose(np.asarray(o), np.asarray(r),
                                   rtol=2e-2, atol=5e-3,
                                   err_msg=name + " (f32 path)")

    print("KERNEL_OK")
</pallas_src>

<mosaic_0001>
module attributes {stable_mosaic.version = 11 : i64} {
  func.func @_att_head_kernel(%arg0: i32, %arg1: memref<1xf32, #tpu.memory_space<smem>>, %arg2: memref<1x8x16x8xf32, #tpu.memory_space<vmem>>, %arg3: memref<8x512xbf16, #tpu.memory_space<vmem>>, %arg4: memref<1x512xf32, #tpu.memory_space<vmem>>, %arg5: memref<512x1024xbf16, #tpu.memory_space<vmem>>, %arg6: memref<1x1024xf32, #tpu.memory_space<vmem>>, %arg7: memref<1x2x512xf32, #tpu.memory_space<vmem>>, %arg8: memref<1x8x512xbf16, #tpu.memory_space<vmem>>, %arg9: memref<1x8x512xbf16, #tpu.memory_space<vmem>>) attributes {dimension_semantics = [#tpu.dimension_semantics<parallel>], iteration_bounds = array<i64: 2>, scalar_prefetch = 0 : i64, scratch_operands = 0 : i64, tpu.core_type = #tpu.core_type<tc>, window_params = [{transform_indices = @transform_0, window_bounds = array<i64: 1>}, {transform_indices = @transform_1, window_bounds = array<i64: 1, 8, 16, 8>}, {pipeline_mode = #tpu.pipeline_mode<synchronous>, transform_indices = @transform_2, window_bounds = array<i64: 8, 512>}, {pipeline_mode = #tpu.pipeline_mode<synchronous>, transform_indices = @transform_3, window_bounds = array<i64: 1, 512>}, {pipeline_mode = #tpu.pipeline_mode<synchronous>, transform_indices = @transform_4, window_bounds = array<i64: 512, 1024>}, {pipeline_mode = #tpu.pipeline_mode<synchronous>, transform_indices = @transform_5, window_bounds = array<i64: 1, 1024>}, {transform_indices = @transform_6, window_bounds = array<i64: 1, 2, 512>}, {transform_indices = @transform_7, window_bounds = array<i64: 1, 8, 512>}, {transform_indices = @transform_8, window_bounds = array<i64: 1, 8, 512>}]} {
    %c0 = arith.constant 0 : index
    %c0_0 = arith.constant 0 : index
    %c0_1 = arith.constant 0 : index
    %c0_2 = arith.constant 0 : index
    %0 = vector.load %arg2[%c0, %c0_0, %c0_1, %c0_2] : memref<1x8x16x8xf32, #tpu.memory_space<vmem>>, vector<1x8x16x8xf32>
    %cst = arith.constant 9.99999997E-7 : f32
    %1 = vector.broadcast %cst : f32 to vector<1x8x16x8xf32>
    %2 = arith.maximumf %0, %1 : vector<1x8x16x8xf32>
    %3 = arith.mulf %2, %2 : vector<1x8x16x8xf32>
    %4 = arith.mulf %3, %2 : vector<1x8x16x8xf32>
    %cst_3 = arith.constant dense<0.000000e+00> : vector<1x8x8xf32>
    %5 = vector.multi_reduction <add>, %4, %cst_3 [2] : vector<1x8x16x8xf32> to vector<1x8x8xf32>
    %cst_4 = arith.constant 1.600000e+01 : f32
    %6 = vector.broadcast %cst_4 : f32 to vector<1x8x8xf32>
    %7 = arith.divf %5, %6 : vector<1x8x8xf32>
    %8 = math.log %7 : vector<1x8x8xf32>
    %cst_5 = arith.constant 0.333333343 : f32
    %9 = vector.broadcast %cst_5 : f32 to vector<1x8x8xf32>
    %10 = arith.mulf %8, %9 : vector<1x8x8xf32>
    %11 = math.exp %10 : vector<1x8x8xf32>
    %12 = vector.shape_cast %11 : vector<1x8x8xf32> to vector<8x8xf32>
    %13 = arith.truncf %12 : vector<8x8xf32> to vector<8x8xbf16>
    %c0_6 = arith.constant 0 : index
    %c0_7 = arith.constant 0 : index
    %14 = vector.load %arg3[%c0_6, %c0_7] : memref<8x512xbf16, #tpu.memory_space<vmem>>, vector<8x512xbf16>
    %cst_8 = arith.constant dense<0.000000e+00> : vector<8x512xf32>
    %15 = tpu.matmul %13, %14, %cst_8 {dimension_numbers = #tpu.dot_dimension_numbers<[1], [0], [0], [1], [0, 0, 1, 1], [], []>} : vector<8x8xbf16>, vector<8x512xbf16>, vector<8x512xf32> -> vector<8x512xf32>
    %c0_9 = arith.constant 0 : index
    %c0_10 = arith.constant 0 : index
    %16 = vector.load %arg4[%c0_9, %c0_10] : memref<1x512xf32, #tpu.memory_space<vmem>>, vector<1x512xf32>
    %17 = vector.broadcast %16 : vector<1x512xf32> to vector<8x512xf32>
    %18 = arith.addf %15, %17 : vector<8x512xf32>
    %cst_11 = arith.constant 0.000000e+00 : f32
    %19 = vector.broadcast %cst_11 : f32 to vector<8x512xf32>
    %20 = arith.maximumf %18, %19 : vector<8x512xf32>
    %21 = arith.truncf %20 : vector<8x512xf32> to vector<8x512xbf16>
    %c0_12 = arith.constant 0 : index
    %c0_13 = arith.constant 0 : index
    %22 = vector.load %arg5[%c0_12, %c0_13] : memref<512x1024xbf16, #tpu.memory_space<vmem>>, vector<512x1024xbf16>
    %cst_14 = arith.constant dense<0.000000e+00> : vector<8x1024xf32>
    %23 = tpu.matmul %21, %22, %cst_14 {dimension_numbers = #tpu.dot_dimension_numbers<[1], [0], [0], [1], [0, 0, 1, 1], [], []>} : vector<8x512xbf16>, vector<512x1024xbf16>, vector<8x1024xf32> -> vector<8x1024xf32>
    %c0_15 = arith.constant 0 : index
    %c0_16 = arith.constant 0 : index
    %24 = vector.load %arg6[%c0_15, %c0_16] : memref<1x1024xf32, #tpu.memory_space<vmem>>, vector<1x1024xf32>
    %25 = vector.broadcast %24 : vector<1x1024xf32> to vector<8x1024xf32>
    %26 = arith.addf %23, %25 : vector<8x1024xf32>
    %27 = vector.extract_strided_slice %26 {offsets = [0, 0], sizes = [8, 512], strides = [1, 1]} : vector<8x1024xf32> to vector<8x512xf32>
    %28 = math.tanh %27 : vector<8x512xf32>
    %29 = vector.shape_cast %28 : vector<8x512xf32> to vector<1x8x512xf32>
    %30 = vector.extract_strided_slice %26 {offsets = [0, 512], sizes = [8, 512], strides = [1, 1]} : vector<8x1024xf32> to vector<8x512xf32>
    %31 = vector.shape_cast %30 : vector<8x512xf32> to vector<1x8x512xf32>
    %32 = tpu.iota {dimensions = array<i32: 1>} : vector<1x8x1xi32>
    %c4_i32 = arith.constant 4 : i32
    %33 = vector.broadcast %c4_i32 : i32 to vector<1x8x1xi32>
    %34 = arith.cmpi slt, %32, %33 : vector<1x8x1xi32>
    %cst_17 = arith.constant dense<0xFF800000> : vector<1x512xf32>
    %35 = vector.multi_reduction <maximumf>, %29, %cst_17 [1] : vector<1x8x512xf32> to vector<1x512xf32>
    %36 = vector.shape_cast %35 : vector<1x512xf32> to vector<1x1x512xf32>
    %37 = vector.broadcast %36 : vector<1x1x512xf32> to vector<1x8x512xf32>
    %38 = arith.subf %29, %37 : vector<1x8x512xf32>
    %39 = math.exp %38 : vector<1x8x512xf32>
    %cst_18 = arith.constant 0.000000e+00 : f32
    %40 = vector.shape_cast %34 : vector<1x8x1xi1> to vector<1x8x1xi1>
    %41 = vector.broadcast %40 : vector<1x8x1xi1> to vector<1x8x512xi1>
    %42 = vector.broadcast %cst_18 : f32 to vector<1x8x512xf32>
    %43 = arith.select %41, %39, %42 : vector<1x8x512xi1>, vector<1x8x512xf32>
    %cst_19 = arith.constant dense<0.000000e+00> : vector<1x512xf32>
    %44 = vector.multi_reduction <add>, %43, %cst_19 [1] : vector<1x8x512xf32> to vector<1x512xf32>
    %45 = vector.shape_cast %44 : vector<1x512xf32> to vector<1x1x512xf32>
    %46 = tpu.reciprocal %45 {approx = true} : vector<1x1x512xf32> -> vector<1x1x512xf32>
    %47 = vector.broadcast %46 : vector<1x1x512xf32> to vector<1x8x512xf32>
    %48 = arith.mulf %43, %47 : vector<1x8x512xf32>
    %cst_20 = arith.constant 5.000000e-01 : f32
    %49 = vector.broadcast %cst_20 : f32 to vector<1x8x512xf32>
    %50 = arith.mulf %49, %31 : vector<1x8x512xf32>
    %51 = math.tanh %50 : vector<1x8x512xf32>
    %cst_21 = arith.constant 1.000000e+00 : f32
    %52 = vector.broadcast %cst_21 : f32 to vector<1x8x512xf32>
    %53 = arith.addf %51, %52 : vector<1x8x512xf32>
    %cst_22 = arith.constant 5.000000e-01 : f32
    %54 = vector.broadcast %cst_22 : f32 to vector<1x8x512xf32>
    %55 = arith.mulf %54, %53 : vector<1x8x512xf32>
    %56 = arith.mulf %31, %48 : vector<1x8x512xf32>
    %cst_23 = arith.constant dense<0.000000e+00> : vector<1x512xf32>
    %57 = vector.multi_reduction <add>, %56, %cst_23 [1] : vector<1x8x512xf32> to vector<1x512xf32>
    %58 = arith.mulf %55, %48 : vector<1x8x512xf32>
    %cst_24 = arith.constant dense<0.000000e+00> : vector<1x512xf32>
    %59 = vector.multi_reduction <add>, %58, %cst_24 [1] : vector<1x8x512xf32> to vector<1x512xf32>
    %60 = vector.shape_cast %57 : vector<1x512xf32> to vector<1x1x512xf32>
    %61 = vector.shape_cast %59 : vector<1x512xf32> to vector<1x1x512xf32>
    %62 = tpu.concatenate %60, %61 in 1 : vector<1x1x512xf32>, vector<1x1x512xf32> -> vector<1x2x512xf32>
    %c0_25 = arith.constant 0 : index
    %c0_26 = arith.constant 0 : index
    %c0_27 = arith.constant 0 : index
    %63 = vector.load %arg7[%c0_25, %c0_26, %c0_27] : memref<1x2x512xf32, #tpu.memory_space<vmem>>, vector<1x2x512xf32>
    tpu.vector_store %arg7[%c0_25, %c0_26, %c0_27], %62 {strides = array<i32>} : memref<1x2x512xf32, #tpu.memory_space<vmem>>, vector<1x2x512xf32>,
    %64 = arith.truncf %31 : vector<1x8x512xf32> to vector<1x8x512xbf16>
    %c0_28 = arith.constant 0 : index
    %c0_29 = arith.constant 0 : index
    %c0_30 = arith.constant 0 : index
    %65 = vector.load %arg8[%c0_28, %c0_29, %c0_30] : memref<1x8x512xbf16, #tpu.memory_space<vmem>>, vector<1x8x512xbf16>
    tpu.vector_store %arg8[%c0_28, %c0_29, %c0_30], %64 {strides = array<i32>} : memref<1x8x512xbf16, #tpu.memory_space<vmem>>, vector<1x8x512xbf16>,
    %66 = arith.truncf %29 : vector<1x8x512xf32> to vector<1x8x512xbf16>
    %c0_31 = arith.constant 0 : index
    %c0_32 = arith.constant 0 : index
    %c0_33 = arith.constant 0 : index
    %67 = vector.load %arg9[%c0_31, %c0_32, %c0_33] : memref<1x8x512xbf16, #tpu.memory_space<vmem>>, vector<1x8x512xbf16>
    tpu.vector_store %arg9[%c0_31, %c0_32, %c0_33], %66 {strides = array<i32>} : memref<1x8x512xbf16, #tpu.memory_space<vmem>>, vector<1x8x512xbf16>,
    return
  }
  func.func @transform_0(%arg0: i32) -> i32 {
    %c0_i32 = arith.constant 0 : i32
    %c0_i32_0 = arith.constant 0 : i32
    return %c0_i32 : i32
  }
  func.func @transform_1(%arg0: i32) -> (i32, i32, i32, i32) {
    %c0_i32 = arith.constant 0 : i32
    %c0_i32_0 = arith.constant 0 : i32
    %c0_i32_1 = arith.constant 0 : i32
    %c0_i32_2 = arith.constant 0 : i32
    return %arg0, %c0_i32, %c0_i32_0, %c0_i32_1 : i32, i32, i32, i32
  }
  func.func @transform_2(%arg0: i32) -> (i32, i32) {
    %c0_i32 = arith.constant 0 : i32
    %c0_i32_0 = arith.constant 0 : i32
    %c0_i32_1 = arith.constant 0 : i32
    return %c0_i32, %c0_i32_0 : i32, i32
  }
  func.func @transform_3(%arg0: i32) -> (i32, i32) {
    %c0_i32 = arith.constant 0 : i32
    %c0_i32_0 = arith.constant 0 : i32
    %c0_i32_1 = arith.constant 0 : i32
    return %c0_i32, %c0_i32_0 : i32, i32
  }
  func.func @transform_4(%arg0: i32) -> (i32, i32) {
    %c0_i32 = arith.constant 0 : i32
    %c0_i32_0 = arith.constant 0 : i32
    %c0_i32_1 = arith.constant 0 : i32
    return %c0_i32, %c0_i32_0 : i32, i32
  }
  func.func @transform_5(%arg0: i32) -> (i32, i32) {
    %c0_i32 = arith.constant 0 : i32
    %c0_i32_0 = arith.constant 0 : i32
    %c0_i32_1 = arith.constant 0 : i32
    return %c0_i32, %c0_i32_0 : i32, i32
  }
  func.func @transform_6(%arg0: i32) -> (i32, i32, i32) {
    %c0_i32 = arith.constant 0 : i32
    %c0_i32_0 = arith.constant 0 : i32
    %c0_i32_1 = arith.constant 0 : i32
    return %arg0, %c0_i32, %c0_i32_0 : i32, i32, i32
  }
  func.func @transform_7(%arg0: i32) -> (i32, i32, i32) {
    %c0_i32 = arith.constant 0 : i32
    %c0_i32_0 = arith.constant 0 : i32
    %c0_i32_1 = arith.constant 0 : i32
    return %arg0, %c0_i32, %c0_i32_0 : i32, i32, i32
  }
  func.func @transform_8(%arg0: i32) -> (i32, i32, i32) {
    %c0_i32 = arith.constant 0 : i32
    %c0_i32_0 = arith.constant 0 : i32
    %c0_i32_1 = arith.constant 0 : i32
    return %arg0, %c0_i32, %c0_i32_0 : i32, i32, i32
  }
}

module attributes {stable_mosaic.version = 11 : i64} {
  func.func @_att_head_kernel(%arg0: i32, %arg1: memref<1xf32, #tpu.memory_space<smem>>, %arg2: memref<1x8x16x8xf32, #tpu.memory_space<vmem>>, %arg3: memref<8x512xbf16, #tpu.memory_space<vmem>>, %arg4: memref<1x512xf32, #tpu.memory_space<vmem>>, %arg5: memref<512x1024xbf16, #tpu.memory_space<vmem>>, %arg6: memref<1x1024xf32, #tpu.memory_space<vmem>>, %arg7: memref<1x2x512xf32, #tpu.memory_space<vmem>>, %arg8: memref<1x8x512xbf16, #tpu.memory_space<vmem>>, %arg9: memref<1x8x512xbf16, #tpu.memory_space<vmem>>) attributes {dimension_semantics = [#tpu.dimension_semantics<parallel>], iteration_bounds = array<i64: 2>, scalar_prefetch = 0 : i64, scratch_operands = 0 : i64, tpu.core_type = #tpu.core_type<tc>, window_params = [{transform_indices = @transform_0, window_bounds = array<i64: 1>}, {transform_indices = @transform_1, window_bounds = array<i64: 1, 8, 16, 8>}, {pipeline_mode = #tpu.pipeline_mode<synchronous>, transform_indices = @transform_2, window_bounds = array<i64: 8, 512>}, {pipeline_mode = #tpu.pipeline_mode<synchronous>, transform_indices = @transform_3, window_bounds = array<i64: 1, 512>}, {pipeline_mode = #tpu.pipeline_mode<synchronous>, transform_indices = @transform_4, window_bounds = array<i64: 512, 1024>}, {pipeline_mode = #tpu.pipeline_mode<synchronous>, transform_indices = @transform_5, window_bounds = array<i64: 1, 1024>}, {transform_indices = @transform_6, window_bounds = array<i64: 1, 2, 512>}, {transform_indices = @transform_7, window_bounds = array<i64: 1, 8, 512>}, {transform_indices = @transform_8, window_bounds = array<i64: 1, 8, 512>}]} {
    %c0 = arith.constant 0 : index
    %c0_0 = arith.constant 0 : index
    %c0_1 = arith.constant 0 : index
    %c0_2 = arith.constant 0 : index
    %0 = vector.load %arg2[%c0, %c0_0, %c0_1, %c0_2] : memref<1x8x16x8xf32, #tpu.memory_space<vmem>>, vector<1x8x16x8xf32>
    %cst = arith.constant 9.99999997E-7 : f32
    %1 = vector.broadcast %cst : f32 to vector<1x8x16x8xf32>
    %2 = arith.maximumf %0, %1 : vector<1x8x16x8xf32>
    %3 = arith.mulf %2, %2 : vector<1x8x16x8xf32>
    %4 = arith.mulf %3, %2 : vector<1x8x16x8xf32>
    %cst_3 = arith.constant dense<0.000000e+00> : vector<1x8x8xf32>
    %5 = vector.multi_reduction <add>, %4, %cst_3 [2] : vector<1x8x16x8xf32> to vector<1x8x8xf32>
    %cst_4 = arith.constant 1.600000e+01 : f32
    %6 = vector.broadcast %cst_4 : f32 to vector<1x8x8xf32>
    %7 = arith.divf %5, %6 : vector<1x8x8xf32>
    %8 = math.log %7 : vector<1x8x8xf32>
    %cst_5 = arith.constant 0.333333343 : f32
    %9 = vector.broadcast %cst_5 : f32 to vector<1x8x8xf32>
    %10 = arith.mulf %8, %9 : vector<1x8x8xf32>
    %11 = math.exp %10 : vector<1x8x8xf32>
    %12 = vector.shape_cast %11 : vector<1x8x8xf32> to vector<8x8xf32>
    %13 = arith.truncf %12 : vector<8x8xf32> to vector<8x8xbf16>
    %c0_6 = arith.constant 0 : index
    %c0_7 = arith.constant 0 : index
    %14 = vector.load %arg3[%c0_6, %c0_7] : memref<8x512xbf16, #tpu.memory_space<vmem>>, vector<8x512xbf16>
    %cst_8 = arith.constant dense<0.000000e+00> : vector<8x512xf32>
    %15 = tpu.matmul %13, %14, %cst_8 {dimension_numbers = #tpu.dot_dimension_numbers<[1], [0], [0], [1], [0, 0, 1, 1], [], []>} : vector<8x8xbf16>, vector<8x512xbf16>, vector<8x512xf32> -> vector<8x512xf32>
    %c0_9 = arith.constant 0 : index
    %c0_10 = arith.constant 0 : index
    %16 = vector.load %arg4[%c0_9, %c0_10] : memref<1x512xf32, #tpu.memory_space<vmem>>, vector<1x512xf32>
    %17 = vector.broadcast %16 : vector<1x512xf32> to vector<8x512xf32>
    %18 = arith.addf %15, %17 : vector<8x512xf32>
    %cst_11 = arith.constant 0.000000e+00 : f32
    %19 = vector.broadcast %cst_11 : f32 to vector<8x512xf32>
    %20 = arith.maximumf %18, %19 : vector<8x512xf32>
    %21 = arith.truncf %20 : vector<8x512xf32> to vector<8x512xbf16>
    %c0_12 = arith.constant 0 : index
    %c0_13 = arith.constant 0 : index
    %22 = vector.load %arg5[%c0_12, %c0_13] : memref<512x1024xbf16, #tpu.memory_space<vmem>>, vector<512x1024xbf16>
    %cst_14 = arith.constant dense<0.000000e+00> : vector<8x1024xf32>
    %23 = tpu.matmul %21, %22, %cst_14 {dimension_numbers = #tpu.dot_dimension_numbers<[1], [0], [0], [1], [0, 0, 1, 1], [], []>} : vector<8x512xbf16>, vector<512x1024xbf16>, vector<8x1024xf32> -> vector<8x1024xf32>
    %c0_15 = arith.constant 0 : index
    %c0_16 = arith.constant 0 : index
    %24 = vector.load %arg6[%c0_15, %c0_16] : memref<1x1024xf32, #tpu.memory_space<vmem>>, vector<1x1024xf32>
    %25 = vector.broadcast %24 : vector<1x1024xf32> to vector<8x1024xf32>
    %26 = arith.addf %23, %25 : vector<8x1024xf32>
    %27 = vector.extract_strided_slice %26 {offsets = [0, 0], sizes = [8, 512], strides = [1, 1]} : vector<8x1024xf32> to vector<8x512xf32>
    %28 = math.tanh %27 : vector<8x512xf32>
    %29 = vector.shape_cast %28 : vector<8x512xf32> to vector<1x8x512xf32>
    %30 = vector.extract_strided_slice %26 {offsets = [0, 512], sizes = [8, 512], strides = [1, 1]} : vector<8x1024xf32> to vector<8x512xf32>
    %31 = vector.shape_cast %30 : vector<8x512xf32> to vector<1x8x512xf32>
    %32 = tpu.iota {dimensions = array<i32: 1>} : vector<1x8x1xi32>
    %c4_i32 = arith.constant 4 : i32
    %33 = vector.broadcast %c4_i32 : i32 to vector<1x8x1xi32>
    %34 = arith.cmpi slt, %32, %33 : vector<1x8x1xi32>
    %cst_17 = arith.constant dense<0xFF800000> : vector<1x512xf32>
    %35 = vector.multi_reduction <maximumf>, %29, %cst_17 [1] : vector<1x8x512xf32> to vector<1x512xf32>
    %36 = vector.shape_cast %35 : vector<1x512xf32> to vector<1x1x512xf32>
    %37 = vector.broadcast %36 : vector<1x1x512xf32> to vector<1x8x512xf32>
    %38 = arith.subf %29, %37 : vector<1x8x512xf32>
    %39 = math.exp %38 : vector<1x8x512xf32>
    %cst_18 = arith.constant 0.000000e+00 : f32
    %40 = vector.shape_cast %34 : vector<1x8x1xi1> to vector<1x8x1xi1>
    %41 = vector.broadcast %40 : vector<1x8x1xi1> to vector<1x8x512xi1>
    %42 = vector.broadcast %cst_18 : f32 to vector<1x8x512xf32>
    %43 = arith.select %41, %39, %42 : vector<1x8x512xi1>, vector<1x8x512xf32>
    %cst_19 = arith.constant dense<0.000000e+00> : vector<1x512xf32>
    %44 = vector.multi_reduction <add>, %43, %cst_19 [1] : vector<1x8x512xf32> to vector<1x512xf32>
    %45 = vector.shape_cast %44 : vector<1x512xf32> to vector<1x1x512xf32>
    %46 = tpu.reciprocal %45 {approx = true} : vector<1x1x512xf32> -> vector<1x1x512xf32>
    %47 = vector.broadcast %46 : vector<1x1x512xf32> to vector<1x8x512xf32>
    %48 = arith.mulf %43, %47 : vector<1x8x512xf32>
    %cst_20 = arith.constant 5.000000e-01 : f32
    %49 = vector.broadcast %cst_20 : f32 to vector<1x8x512xf32>
    %50 = arith.mulf %49, %31 : vector<1x8x512xf32>
    %51 = math.tanh %50 : vector<1x8x512xf32>
    %cst_21 = arith.constant 1.000000e+00 : f32
    %52 = vector.broadcast %cst_21 : f32 to vector<1x8x512xf32>
    %53 = arith.addf %51, %52 : vector<1x8x512xf32>
    %cst_22 = arith.constant 5.000000e-01 : f32
    %54 = vector.broadcast %cst_22 : f32 to vector<1x8x512xf32>
    %55 = arith.mulf %54, %53 : vector<1x8x512xf32>
    %56 = arith.mulf %31, %48 : vector<1x8x512xf32>
    %cst_23 = arith.constant dense<0.000000e+00> : vector<1x512xf32>
    %57 = vector.multi_reduction <add>, %56, %cst_23 [1] : vector<1x8x512xf32> to vector<1x512xf32>
    %58 = arith.mulf %55, %48 : vector<1x8x512xf32>
    %cst_24 = arith.constant dense<0.000000e+00> : vector<1x512xf32>
    %59 = vector.multi_reduction <add>, %58, %cst_24 [1] : vector<1x8x512xf32> to vector<1x512xf32>
    %60 = vector.shape_cast %57 : vector<1x512xf32> to vector<1x1x512xf32>
    %61 = vector.shape_cast %59 : vector<1x512xf32> to vector<1x1x512xf32>
    %62 = tpu.concatenate %60, %61 in 1 : vector<1x1x512xf32>, vector<1x1x512xf32> -> vector<1x2x512xf32>
    %c0_25 = arith.constant 0 : index
    %c0_26 = arith.constant 0 : index
    %c0_27 = arith.constant 0 : index
    %63 = vector.load %arg7[%c0_25, %c0_26, %c0_27] : memref<1x2x512xf32, #tpu.memory_space<vmem>>, vector<1x2x512xf32>
    tpu.vector_store %arg7[%c0_25, %c0_26, %c0_27], %62 {strides = array<i32>} : memref<1x2x512xf32, #tpu.memory_space<vmem>>, vector<1x2x512xf32>,
    %64 = arith.truncf %31 : vector<1x8x512xf32> to vector<1x8x512xbf16>
    %c0_28 = arith.constant 0 : index
    %c0_29 = arith.constant 0 : index
    %c0_30 = arith.constant 0 : index
    %65 = vector.load %arg8[%c0_28, %c0_29, %c0_30] : memref<1x8x512xbf16, #tpu.memory_space<vmem>>, vector<1x8x512xbf16>
    tpu.vector_store %arg8[%c0_28, %c0_29, %c0_30], %64 {strides = array<i32>} : memref<1x8x512xbf16, #tpu.memory_space<vmem>>, vector<1x8x512xbf16>,
    %66 = arith.truncf %29 : vector<1x8x512xf32> to vector<1x8x512xbf16>
    %c0_31 = arith.constant 0 : index
    %c0_32 = arith.constant 0 : index
    %c0_33 = arith.constant 0 : index
    %67 = vector.load %arg9[%c0_31, %c0_32, %c0_33] : memref<1x8x512xbf16, #tpu.memory_space<vmem>>, vector<1x8x512xbf16>
    tpu.vector_store %arg9[%c0_31, %c0_32, %c0_33], %66 {strides = array<i32>} : memref<1x8x512xbf16, #tpu.memory_space<vmem>>, vector<1x8x512xbf16>,
    return
  }
  func.func @transform_0(%arg0: i32) -> i32 {
    %c0_i32 = arith.constant 0 : i32
    %c0_i32_0 = arith.constant 0 : i32
    return %c0_i32 : i32
  }
  func.func @transform_1(%arg0: i32) -> (i32, i32, i32, i32) {
    %c0_i32 = arith.constant 0 : i32
    %c0_i32_0 = arith.constant 0 : i32
    %c0_i32_1 = arith.constant 0 : i32
    %c0_i32_2 = arith.constant 0 : i32
    return %arg0, %c0_i32, %c0_i32_0, %c0_i32_1 : i32, i32, i32, i32
  }
  func.func @transform_2(%arg0: i32) -> (i32, i32) {
    %c0_i32 = arith.constant 0 : i32
    %c0_i32_0 = arith.constant 0 : i32
    %c0_i32_1 = arith.constant 0 : i32
    return %c0_i32, %c0_i32_0 : i32, i32
  }
  func.func @transform_3(%arg0: i32) -> (i32, i32) {
    %c0_i32 = arith.constant 0 : i32
    %c0_i32_0 = arith.constant 0 : i32
    %c0_i32_1 = arith.constant 0 : i32
    return %c0_i32, %c0_i32_0 : i32, i32
  }
  func.func @transform_4(%arg0: i32) -> (i32, i32) {
    %c0_i32 = arith.constant 0 : i32
    %c0_i32_0 = arith.constant 0 : i32
    %c0_i32_1 = arith.constant 0 : i32
    return %c0_i32, %c0_i32_0 : i32, i32
  }
  func.func @transform_5(%arg0: i32) -> (i32, i32) {
    %c0_i32 = arith.constant 0 : i32
    %c0_i32_0 = arith.constant 0 : i32
    %c0_i32_1 = arith.constant 0 : i32
    return %c0_i32, %c0_i32_0 : i32, i32
  }
  func.func @transform_6(%arg0: i32) -> (i32, i32, i32) {
    %c0_i32 = arith.constant 0 : i32
    %c0_i32_0 = arith.constant 0 : i32
    %c0_i32_1 = arith.constant 0 : i32
    return %arg0, %c0_i32, %c0_i32_0 : i32, i32, i32
  }
  func.func @transform_7(%arg0: i32) -> (i32, i32, i32) {
    %c0_i32 = arith.constant 0 : i32
    %c0_i32_0 = arith.constant 0 : i32
    %c0_i32_1 = arith.constant 0 : i32
    return %arg0, %c0_i32, %c0_i32_0 : i32, i32, i32
  }
  func.func @transform_8(%arg0: i32) -> (i32, i32, i32) {
    %c0_i32 = arith.constant 0 : i32
    %c0_i32_0 = arith.constant 0 : i32
    %c0_i32_1 = arith.constant 0 : i32
    return %arg0, %c0_i32, %c0_i32_0 : i32, i32, i32
  }
}

</mosaic_0001>

<bundles_post_ra>
// kernel: tpu_custom_call.1
= control target key start
LH: loop header
LB: loop body
LE: loop exit
PB: predicated region body
PF: predicated region fallthrough
CT: control target
= control target key end

     0   :  { %s4047_s0 = inlined_call_operand.<no memory space> [shape: f32[1], index: 0, kind: input, shape index: {}]   ;;  %s4048_s1 = inlined_call_operand.vmem [shape: f32[2,8,16,8], index: 1, kind: input, shape index: {}]   ;;  %s4049_s2 = inlined_call_operand.vmem [shape: bf16[8,512], index: 2, kind: input, shape index: {}]   ;;  %s4050_s3 = inlined_call_operand.vmem [shape: f32[1,512], index: 3, kind: input, shape index: {}]   ;;  %s4051_s4 = inlined_call_operand.hbm [shape: bf16[512,1024], index: 4, kind: input, shape index: {}]   ;;  %s4052_s5 = inlined_call_operand.vmem [shape: f32[1,1024], index: 5, kind: input, shape index: {}]   ;;  %s4053_s6 = inlined_call_operand.hbm [shape: f32[2,2,512], index: 6, kind: output, shape index: {0}]   ;;  %s4054_s7 = inlined_call_operand.hbm [shape: bf16[2,8,512], index: 7, kind: output, shape index: {1}]   ;;  %s4055_s8 = inlined_call_operand.hbm [shape: bf16[2,8,512], index: 8, kind: output, shape index: {2}]  }
   0x1   :  { %4060 = sst [smem:[#allocation13_spill]] %s4048_s1 }
   0x2   :  { %15 = vsyncpa [#allocation4], 0 }
   0x3   :  { %16 = vsyncpa [#allocation5], 0 }
   0x4   :  { %18 = vsyncpa [#allocation5 + $0x1], 0 }
   0x5   :  { %19 = vsyncpa [#allocation8], 0 }
   0x6   :  { %21 = vsyncpa [#allocation8 + $0x1], 0  ;;  %s3675_s26 = smov 0   ;;  %s3677_s27 = smov 0  }
   0x7   :  { %s3679_s28 = smov 0   ;;  %s3681_s29 = smov 0  }
   0x8 LB: > { %s3696_s30 = sadd.s32 4294967295, %s3620_s29   ;;  %s4059_s9 = sadd.s32 4294967294, %s3620_s29   ;;  %s3620_s29 = sphi %s3681_s29, %s4075_s29   ;;  %s3616_s28 = sphi %s3679_s28, %s4074_s28   ;;  %s3612_s27 = sphi %s3677_s27, %s4073_s27   ;;  %s3608_s26 = sphi %s3675_s26, %s4072_s26  }
   0x9   : > { %s3700_s10 = sadd.s32 1, %s3620_s29   ;;  %s165_s11 = sadd.s32 1, %s3616_s28 }
   0xa   : > { %s162_s12 = ssub.s32 %s3620_s29, %s3700_s10  ;;  %p175_p0 = scmp.ne.s32.totalorder %s3616_s28, %s3612_s27 }
   0xb   : > { %p163_p1 = scmp.eq.s32.totalorder %s162_s12, 0  ;;  %p176_p2 = scmp.eq.s32.totalorder %s3696_s30, 1 }
   0xc   : > { %p181_p3 = scmp.ne.s32.totalorder %s3612_s27, %s3608_s26  ;;  %p182_p4 = scmp.eq.s32.totalorder %s4059_s9, 1 }
   0xd   : > { %s3713_s13 = scalar_select %p163_p1, %s3616_s28, %s165_s11  }
   0xe   : > { %p3715_p5 = por %p176_p2, %p175_p0  ;;  %p3719_p6 = por %p182_p4, %p181_p3 }
   0xf   : > { %p3013_p7 = scmp.ge.s32.totalorder %s3620_s29, 1  ;;  %p241_p8 = scmp.lt.s32.totalorder %s3620_s29, 3 }
  0x10   : > { %s4061_s14 = scalar_select %p3715_p5, 1, 0 }
  0x11   : > { %s4062_s15 = scalar_select %p3719_p6, 1, 0 }
  0x12   : > { %p4056_p9 = scmp.eq.s32.totalorder %s3696_s30, 0  ;;  %p3726_p10 = pnand %p3013_p7, %p241_p8 }
  0x13   : > { %s3622_s17 = smov [#allocation3]   ;;  %s3466_s22 = scalar_lea.hbm %s4051_s4, 32768 }
  0x14   : > { %s4063_s16 = scalar_select %p3726_p10, 1, 0 }
  0x15   : > { %s262_s18 = sshll.u32 %s3622_s17, 4  ;;  %p3344_p11 = pneg %p3726_p10  ;;  %s263_s18 = int_to_ptr.vmem [resolvable:$true] %s262_s18 }
  0x16   : > { %p3467_p13 = scmp.ne.s32.totalorder %s4051_s4, %s3466_s22  ;;  %p3473_p3 = scmp.lt.u32.totalorder %s3466_s22, %s4051_s4 }
  0x17   : > { %p3734_p12 = pnand %p4056_p9, %p3344_p11 }
  0x19   : > { %p3468_p0 = pneg %p3734_p12 }
  0x1b   : > { %p3469_p1 = pnand %p3468_p0, %p3467_p13 }
  0x1d   : > { %p3470_p2 = pneg %p3469_p1 }
  0x1f   : > { %p3475_p4 = pnand %p3473_p3, %p3470_p2 }
  0x21   : > { %3478 = shalt.err (!%p3475_p4)
}
  0x22   : > { %s3479_s11 = scalar_lea.vmem %s263_s18, 32768  ;;  %p3487_p9 = scmp.lt.s32.totalorder %s263_s18, %s263_s18 }
  0x23   : > { %p3480_p7 = scmp.ne.s32.totalorder %s263_s18, %s3479_s11  ;;  %p3488_p6 = scmp.lt.s32.totalorder %s3479_s11, %s3479_s11 }
  0x25   : > { %p3482_p8 = pnand %p3480_p7, %p3468_p0  ;;  %p3489_p5 = por %p3488_p6, %p3487_p9 }
  0x27   : > { %p3483_p11 = pneg %p3482_p8 }
  0x29   : > { %p3490_p10 = pnand %p3489_p5, %p3483_p11 }
  0x2b   : > { %3493 = shalt.err (!%p3490_p10)
}
  0x2c   : > { %s3623_s12 = smov 512   ;;  %s3624_s17 = smov 32  }
  0x2d   : > { %3347 = dma.hbm_to_vmem [thread:$0]  (!%p3734_p12), %s4051_s4, 32768, %s263_s18, [#allocation4], %s3623_s12, %s3623_s12, %s3624_s17  }
  0x2e   : > { %p4065_p13 = scmp.ne.s32.totalorder %s4063_s16, 0 }
  0x2f   : > { %p4066_p1 = scmp.eq.s32.totalorder (!%p4065_p13), %s3696_s30, 0 }
  0x30   : > { %289 = sbr.rel (%p4065_p13) target bundleno = 850 (0x352), region = 44 }
  0x37   : > { %3595 = dma.done.wait (%p4066_p1), [#allocation4], 32768   ;;  %p4067_p0 = pmov %p4066_p1 }
  0x38   : > { %p333_p5 = scmp.lt.s32.totalorder %s3696_s30, 1  ;;  %v3625_v0 = vmov 0   ;;  %s4068_s1 = sld [smem:[#allocation13_spill]]  ;;  %v533_v1 = vld [vmem:[%s4049_s2] sm:$0xff]  ;;  %vm601_vm0 = vcmask 1043456   ;;  %vm403_vm1 = vcmask 64512  }
  0x39   : > { %3597 = vsyncadd (%p4067_p0), [#allocation4], 4294934528  ;;  %646 = vmatprep.mubr.bf16.mxu0 %v3625_v0  ;;  %687 = vmatprep.mubr.bf16.mxu1 %v3625_v0  ;;  %v3024_v4 = vcombine.high %v533_v1, %v533_v1  ;;  %v3023_v5 = vcombine.low %v533_v1, %v533_v1  ;;  %vm573_vm2 = vcmask 1041409   ;;  %vm575_vm3 = vcmask 1042434   ;;  %s2832_s0 = sand.u32 1, %s3696_s30   ;;  %p4069_p9 = scmp.ne.s32.totalorder %s4061_s14, 0 }
  0x3a   : > { %s334_s19 = scalar_select %p333_p5, %s3696_s30, 1  ;;  %vm577_vm4 = vcmask 1043459   ;;  %vm579_vm5 = vcmask 1044484   ;;  %vm581_vm6 = vcmask 1045509   ;;  %vm583_vm7 = vcmask 1046534  }
  0x3b   : > { %3027 = vmatprep.subr.msk.bf16.mxu0 %vm601_vm0, %v3024_v4  ;;  %v603_v14 = vsel %vm601_vm0, %v3023_v5, 0  ;;  %vm585_vm8 = vcmask 1047559   ;;  %s3626_s11 = smov [#allocation7]  }
  0x3c   : > { %s3302_s22 = sshll.u32 %s334_s19, 7  ;;  %615 = vmatpush1.bf16.msra.mxu0 %v603_v14  ;;  %s3877_s19 = sand.u32 1, %s3612_s27  }
  0x3d   : > { %s3498_s12 = sshll.u32 %s3626_s11, 4  ;;  %s3499_s12 = int_to_ptr.vmem [resolvable:$false] %s3498_s12 }
  0x3e   : > { %s337_s18 = scalar_lea.vmem %s4068_s1, %s3302_s22  ;;  %s3019_s22 = sshll.u32 %s3877_s19, 4 }
  0x3f   : > { %v339_v2 = vld [vmem:[%s337_s18] sm:$0xff]  ;;  %v340_v3 = vld [vmem:[%s337_s18 + $0x8] sm:$0xff]  ;;  %v341_v6 = vld [vmem:[%s337_s18 + $0x10] sm:$0xff]  ;;  %s3882_s23 = scalar_lea.vmem [#allocation9], %s3019_s22  ;;  %s325_s16 = scalar_lea.vmem [#allocation7], %s3019_s22 }
  0x40   : > { %v342_v7 = vld [vmem:[%s337_s18 + $0x18] sm:$0xff]  ;;  %v343_v8 = vld [vmem:[%s337_s18 + $0x20] sm:$0xff]  ;;  %v355_v9 = vmax.f32 %v339_v2, 1e-06  ;;  %v344_v10 = vld [vmem:[%s337_s18 + $0x28] sm:$0xff]  ;;  %s2866_s24 = sshll.u32 %s325_s16, 4  ;;  %s3925_s24 = int_to_ptr.vmem [resolvable:$true] %s2866_s24 }
  0x41   : > { %v345_v11 = vld [vmem:[%s337_s18 + $0x30] sm:$0xff]  ;;  %v346_v12 = vld [vmem:[%s337_s18 + $0x38] sm:$0xff]  ;;  %v356_v13 = vmax.f32 %v340_v3, 1e-06  ;;  %v347_v15 = vld [vmem:[%s337_s18 + $0x40] sm:$0xff]  ;;  %s2880_s25 = sshll.u32 %s3882_s23, 4  ;;  %p3501_p2 = scmp.lt.s32.totalorder %s3925_s24, %s3499_s12  ;;  %s3932_s25 = int_to_ptr.vmem [resolvable:$true] %s2880_s25 }
  0x42   : > { %v348_v16 = vld [vmem:[%s337_s18 + $0x48] sm:$0xff]  ;;  %v349_v17 = vld [vmem:[%s337_s18 + $0x50] sm:$0xff]  ;;  %v357_v18 = vmax.f32 %v341_v6, 1e-06  ;;  %v371_v19 = vmul.f32 %v355_v9, %v355_v9  ;;  %v350_v20 = vld [vmem:[%s337_s18 + $0x58] sm:$0xff]  ;;  %s3494_s9 = scalar_lea.vmem %s3925_s24, 256 }
  0x43   : > { %v351_v21 = vld [vmem:[%s337_s18 + $0x60] sm:$0xff]  ;;  %v352_v22 = vld [vmem:[%s337_s18 + $0x68] sm:$0xff]  ;;  %v358_v23 = vmax.f32 %v342_v7, 1e-06  ;;  %v372_v24 = vmul.f32 %v356_v13, %v356_v13  ;;  %v353_v25 = vld [vmem:[%s337_s18 + $0x70] sm:$0xff]  ;;  %p3495_p6 = scmp.ne.s32.totalorder %s3925_s24, %s3494_s9  ;;  %s3500_s1 = scalar_lea.vmem %s3499_s12, 512 }
  0x44   : > { %v354_v26 = vld [vmem:[%s337_s18 + $0x78] sm:$0xff]  ;;  %v359_v27 = vmax.f32 %v343_v8, 1e-06  ;;  %v360_v28 = vmax.f32 %v344_v10, 1e-06  ;;  %v373_v29 = vmul.f32 %v357_v18, %v357_v18  ;;  %v387_v30 = vmul.f32 %v371_v19, %v355_v9  ;;  %s3308_s18 = sshll.u32 %s3696_s30, 8  ;;  %p3502_p3 = scmp.lt.s32.totalorder %s3500_s1, %s3494_s9 }
  0x45   : > { %v361_v31 = vmax.f32 %v345_v11, 1e-06  ;;  %v362_v32 = vmax.f32 %v346_v12, 1e-06  ;;  %v363_v33 = vmax.f32 %v347_v15, 1e-06  ;;  %v374_v34 = vmul.f32 %v358_v23, %v358_v23  ;;  %s3923_s17 = scalar_lea.hbm %s4054_s7, %s3308_s18  ;;  %s3930_s22 = scalar_lea.hbm %s4055_s8, %s3308_s18 }
  0x46   : > { %v364_v35 = vmax.f32 %v348_v16, 1e-06  ;;  %v365_v36 = vmax.f32 %v349_v17, 1e-06  ;;  %v366_v37 = vmax.f32 %v350_v20, 1e-06  ;;  %v375_v38 = vmul.f32 %v359_v27, %v359_v27  ;;  %p3496_p10 = pnand %p3495_p6, %p4069_p9  ;;  %p3503_p4 = por %p3502_p3, %p3501_p2 }
  0x47   : > { %v367_v39 = vmax.f32 %v351_v21, 1e-06  ;;  %v368_v40 = vmax.f32 %v352_v22, 1e-06  ;;  %v369_v41 = vmax.f32 %v353_v25, 1e-06  ;;  %v376_v42 = vmul.f32 %v360_v28, %v360_v28 }
  0x48   : > { %v370_v43 = vmax.f32 %v354_v26, 1e-06  ;;  %v377_v44 = vmul.f32 %v361_v31, %v361_v31  ;;  %v378_v45 = vmul.f32 %v362_v32, %v362_v32  ;;  %v379_v46 = vmul.f32 %v363_v33, %v363_v33  ;;  %p3497_p12 = pneg %p3496_p10 }
  0x49   : > { %v380_v47 = vmul.f32 %v364_v35, %v364_v35  ;;  %v381_v48 = vmul.f32 %v365_v36, %v365_v36  ;;  %v382_v49 = vmul.f32 %v366_v37, %v366_v37  ;;  %v383_v50 = vmul.f32 %v367_v39, %v367_v39 }
  0x4a   : > { %v384_v51 = vmul.f32 %v368_v40, %v368_v40  ;;  %v385_v52 = vmul.f32 %v369_v41, %v369_v41  ;;  %v386_v53 = vmul.f32 %v370_v43, %v370_v43  ;;  %v388_v54 = vmul.f32 %v372_v24, %v356_v13  ;;  %p3504_p7 = pnand %p3503_p4, %p3497_p12 }
  0x4b   : > { %v389_v55 = vmul.f32 %v373_v29, %v357_v18  ;;  %v390_v56 = vmul.f32 %v374_v34, %v358_v23  ;;  %v391_v57 = vmul.f32 %v375_v38, %v359_v27  ;;  %v392_v58 = vmul.f32 %v376_v42, %v360_v28 }
  0x4c   : > { %v393_v59 = vmul.f32 %v377_v44, %v361_v31  ;;  %v394_v60 = vmul.f32 %v378_v45, %v362_v32  ;;  %v395_v61 = vmul.f32 %v379_v46, %v363_v33  ;;  %v396_v62 = vmul.f32 %v380_v47, %v364_v35 }
  0x4d   : > { %v397_v63 = vmul.f32 %v381_v48, %v365_v36  ;;  %v398_v0 = vmul.f32 %v382_v49, %v366_v37  ;;  %v399_v1 = vmul.f32 %v383_v50, %v367_v39  ;;  %v400_v2 = vmul.f32 %v384_v51, %v368_v40 }
  0x4e   : > { %v401_v3 = vmul.f32 %v385_v52, %v369_v41  ;;  %v402_v4 = vmul.f32 %v386_v53, %v370_v43  ;;  %v404_v5 = vsel %vm403_vm1, %v387_v30, 0.0  ;;  %v405_v6 = vsel %vm403_vm1, %v388_v54, 0.0 }
  0x4f   : > { %v406_v7 = vadd.f32 %v405_v6, %v404_v5  ;;  %v413_v8 = vsel %vm403_vm1, %v389_v55, 0.0  ;;  %v414_v9 = vsel %vm403_vm1, %v390_v56, 0.0  ;;  %v422_v10 = vsel %vm403_vm1, %v391_v57, 0.0 }
  0x50   : > { %v415_v11 = vadd.f32 %v414_v9, %v413_v8  ;;  %v423_v12 = vsel %vm403_vm1, %v392_v58, 0.0  ;;  %v431_v13 = vsel %vm403_vm1, %v393_v59, 0.0  ;;  %v432_v14 = vsel %vm403_vm1, %v394_v60, 0.0 }
  0x51   : > { %v407_v15 = vrot.slane %v406_v7, 4  ;;  %v424_v16 = vadd.f32 %v423_v12, %v422_v10  ;;  %v433_v17 = vadd.f32 %v432_v14, %v431_v13  ;;  %v440_v18 = vsel %vm403_vm1, %v395_v61, 0.0  ;;  %v3789_v14 = vld [vmem:[#allocation3] sm:$0xff] }
  0x52   : > { %v416_v19 = vrot.slane %v415_v11, 4  ;;  %v441_v20 = vsel %vm403_vm1, %v396_v62, 0.0  ;;  %v449_v21 = vsel %vm403_vm1, %v397_v63, 0.0  ;;  %v450_v22 = vsel %vm403_vm1, %v398_v0, 0.0 }
  0x53   : > { %v408_v23 = vadd.f32 %v407_v15, %v406_v7  ;;  %v425_v24 = vrot.slane %v424_v16, 4  ;;  %v434_v25 = vrot.slane %v433_v17, 4  ;;  %v442_v26 = vadd.f32 %v441_v20, %v440_v18  ;;  %v534_v7 = vld [vmem:[%s4049_s2 + $0x8] sm:$0xff]  ;;  %v3791_v15 = vld [vmem:[#allocation3 + $0x20] sm:$0xff] }
  0x54   : > { %v417_v27 = vadd.f32 %v416_v19, %v415_v11  ;;  %v451_v28 = vadd.f32 %v450_v22, %v449_v21  ;;  %v458_v29 = vsel %vm403_vm1, %v399_v1, 0.0  ;;  %v459_v30 = vsel %vm403_vm1, %v400_v2, 0.0  ;;  %v3793_v22 = vld [vmem:[#allocation3 + $0x8] sm:$0xff] }
  0x55   : > { %v409_v31 = vrot.slane %v408_v23, 2  ;;  %v426_v32 = vadd.f32 %v425_v24, %v424_v16  ;;  %v435_v33 = vadd.f32 %v434_v25, %v433_v17  ;;  %v443_v34 = vrot.slane %v442_v26, 4 }
  0x56   : > { %v418_v35 = vrot.slane %v417_v27, 2  ;;  %v452_v36 = vrot.slane %v451_v28, 4  ;;  %v460_v37 = vadd.f32 %v459_v30, %v458_v29  ;;  %v467_v38 = vsel %vm403_vm1, %v401_v3, 0.0 }
  0x57   : > { %v410_v39 = vadd.f32 %v409_v31, %v408_v23  ;;  %v427_v40 = vrot.slane %v426_v32, 2  ;;  %v436_v41 = vrot.slane %v435_v33, 2  ;;  %v444_v42 = vadd.f32 %v443_v34, %v442_v26  ;;  %v3795_v23 = vld [vmem:[#allocation3 + $0x28] sm:$0xff] }
  0x58   : > { %v419_v43 = vadd.f32 %v418_v35, %v417_v27  ;;  %v453_v44 = vadd.f32 %v452_v36, %v451_v28  ;;  %v461_v45 = vrot.slane %v460_v37, 4  ;;  %v468_v46 = vsel %vm403_vm1, %v402_v4, 0.0 }
  0x59   : > { %v411_v47 = vrot.slane %v410_v39, 1  ;;  %v428_v48 = vadd.f32 %v427_v40, %v426_v32  ;;  %v437_v49 = vadd.f32 %v436_v41, %v435_v33  ;;  %v445_v50 = vrot.slane %v444_v42, 2 }
  0x5a   : > { %v420_v51 = vrot.slane %v419_v43, 1  ;;  %v454_v52 = vrot.slane %v453_v44, 2  ;;  %v462_v53 = vadd.f32 %v461_v45, %v460_v37  ;;  %v469_v54 = vadd.f32 %v468_v46, %v467_v38 }
  0x5b   : > { %v412_v55 = vadd.f32 %v411_v47, %v410_v39  ;;  %v429_v56 = vrot.slane %v428_v48, 1  ;;  %v438_v57 = vrot.slane %v437_v49, 1  ;;  %v446_v58 = vadd.f32 %v445_v50, %v444_v42 }
  0x5c   : > { %v421_v59 = vadd.f32 %v420_v51, %v419_v43  ;;  %v455_v60 = vadd.f32 %v454_v52, %v453_v44  ;;  %v463_v61 = vrot.slane %v462_v53, 2  ;;  %v470_v62 = vrot.slane %v469_v54, 4 }
  0x5d   : > { %v430_v63 = vadd.f32 %v429_v56, %v428_v48  ;;  %v439_v0 = vadd.f32 %v438_v57, %v437_v49  ;;  %v447_v1 = vrot.slane %v446_v58, 1  ;;  %v477_v2 = vmul.f32 0.0625, %v412_v55 }
  0x5e   : > { %v456_v3 = vrot.slane %v455_v60, 1  ;;  %v464_v4 = vadd.f32 %v463_v61, %v462_v53  ;;  %v471_v5 = vadd.f32 %v470_v62, %v469_v54  ;;  %v478_v6 = vmul.f32 0.0625, %v421_v59 }
  0x5f   : > { %v448_v8 = vadd.f32 %v447_v1, %v446_v58  ;;  %v479_v9 = vmul.f32 0.0625, %v430_v63  ;;  %v480_v10 = vmul.f32 0.0625, %v439_v0  ;;  %3402 = vlog2.f32 %v477_v2 }
  0x60   : > { %v457_v11 = vadd.f32 %v456_v3, %v455_v60  ;;  %v465_v12 = vrot.slane %v464_v4, 1  ;;  %v472_v13 = vrot.slane %v471_v5, 2  ;;  %3404 = vlog2.f32 %v478_v6 }
  0x61   : > { %v481_v16 = vmul.f32 0.0625, %v448_v8  ;;  %3406 = vlog2.f32 %v479_v9  ;;  %v3026_v17 = vcombine.high %v534_v7, %v534_v7  ;;  %v3025_v18 = vcombine.low %v534_v7, %v534_v7 }
  0x62   : > { %v466_v19 = vadd.f32 %v465_v12, %v464_v4  ;;  %v473_v20 = vadd.f32 %v472_v13, %v471_v5  ;;  %v482_v21 = vmul.f32 0.0625, %v457_v11  ;;  %3408 = vlog2.f32 %v480_v10 }
  0x63   : > { %3410 = vlog2.f32 %v481_v16  ;;  %3029 = vmatprep.subr.msk.bf16.mxu1 %vm601_vm0, %v3026_v17  ;;  %v609_v24 = vsel %vm601_vm0, %v3025_v18, 0  ;;  %v3032_v25 = vcombine.high %v3789_v14, %v3791_v15  ;;  %v3034_v28 = vcombine.high %v3793_v22, %v3795_v23 }
  0x64   : > { %v474_v26 = vrot.slane %v473_v20, 1  ;;  %v483_v27 = vmul.f32 0.0625, %v466_v19  ;;  %3412 = vlog2.f32 %v482_v21  ;;  %656 = vmatpush1.bf16.msra.mxu1 %v609_v24 }
  0x65   : > { %2282 = vmatprep.subr.bf16.mxu0 %v3032_v25  ;;  %2364 = vmatprep.subr.bf16.mxu1 %v3034_v28 }
  0x66   : > { %v475_v29 = vadd.f32 %v474_v26, %v473_v20  ;;  %3414 = vlog2.f32 %v483_v27 }
  0x68   : > { %v484_v30 = vmul.f32 0.0625, %v475_v29 }
  0x69   : > { %v3403_v31 = vpop.eup %3402 }
  0x6a   : > { %v3405_v32 = vpop.eup %3404  ;;  %v486_v33 = vmul.f32 0.6931472, %v3403_v31  ;;  %3416 = vlog2.f32 %v484_v30 }
  0x6b   : > { %v3407_v34 = vpop.eup %3406  ;;  %v488_v35 = vmul.f32 0.6931472, %v3405_v32  ;;  %v712_v32 = vld [vmem:[#allocation3 + $0x40] sm:$0xff] }
  0x6c   : > { %v3409_v36 = vpop.eup %3408  ;;  %v490_v37 = vmul.f32 0.6931472, %v3407_v34  ;;  %v501_v38 = vmul.f32 0.33333334, %v486_v33  ;;  %v716_v34 = vld [vmem:[#allocation3 + $0x60] sm:$0xff] }
  0x6d   : > { %v3411_v39 = vpop.eup %3410  ;;  %v492_v40 = vmul.f32 0.6931472, %v3409_v36  ;;  %v502_v41 = vmul.f32 0.33333334, %v488_v35  ;;  %v713_v35 = vld [vmem:[#allocation3 + $0x48] sm:$0xff] }
  0x6e   : > { %v3413_v42 = vpop.eup %3412  ;;  %v494_v43 = vmul.f32 0.6931472, %v3411_v39  ;;  %v503_v44 = vmul.f32 0.33333334, %v490_v37  ;;  %v509_v45 = vmul.f32 1.442695, %v501_v38  ;;  %v3031_v38 = vcombine.low %v3789_v14, %v3791_v15 }
  0x6f   : > { %v496_v46 = vmul.f32 0.6931472, %v3413_v42  ;;  %v504_v47 = vmul.f32 0.33333334, %v492_v40  ;;  %v511_v48 = vmul.f32 1.442695, %v502_v41  ;;  %v3033_v39 = vcombine.low %v3793_v22, %v3795_v23 }
  0x70   : > { %v3415_v49 = vpop.eup %3414  ;;  %v505_v50 = vmul.f32 0.33333334, %v494_v43  ;;  %3418 = vpow2.f32 %v509_v45  ;;  %v513_v51 = vmul.f32 1.442695, %v503_v44  ;;  %v717_v36 = vld [vmem:[#allocation3 + $0x68] sm:$0xff]  ;;  %v3040_v41 = vcombine.high %v712_v32, %v716_v34  ;;  %v720_v43 = vld [vmem:[#allocation3 + $0x80] sm:$0xff] }
  0x71   : > { %v498_v52 = vmul.f32 0.6931472, %v3415_v49  ;;  %v506_v53 = vmul.f32 0.33333334, %v496_v46  ;;  %3420 = vpow2.f32 %v511_v48  ;;  %v515_v54 = vmul.f32 1.442695, %v504_v47 }
  0x72   : > { %3422 = vpow2.f32 %v513_v51  ;;  %v517_v55 = vmul.f32 1.442695, %v505_v50  ;;  %v3042_v42 = vcombine.high %v713_v35, %v717_v36  ;;  %v724_v44 = vld [vmem:[#allocation3 + $0xa0] sm:$0xff]  ;;  %v721_v45 = vld [vmem:[#allocation3 + $0x88] sm:$0xff]  ;;  %v3039_v47 = vcombine.low %v712_v32, %v716_v34 }
  0x73   : > { %v507_v56 = vmul.f32 0.33333334, %v498_v52  ;;  %3424 = vpow2.f32 %v515_v54  ;;  %v519_v57 = vmul.f32 1.442695, %v506_v53  ;;  %v725_v46 = vld [vmem:[#allocation3 + $0xa8] sm:$0xff]  ;;  %v3041_v48 = vcombine.low %v713_v35, %v717_v36  ;;  %v728_v22 = vld [vmem:[#allocation3 + $0xc0] sm:$0xff] }
  0x74   : > { %v3417_v58 = vpop.eup %3416  ;;  %3426 = vpow2.f32 %v517_v55  ;;  %v3048_v14 = vcombine.high %v720_v43, %v724_v44  ;;  %v3050_v15 = vcombine.high %v721_v45, %v725_v46  ;;  %v732_v23 = vld [vmem:[#allocation3 + $0xe0] sm:$0xff]  ;;  %v729_v49 = vld [vmem:[#allocation3 + $0xc8] sm:$0xff]  ;;  %v3047_v51 = vcombine.low %v720_v43, %v724_v44 }
  0x75   : > { %v500_v59 = vmul.f32 0.6931472, %v3417_v58  ;;  %3428 = vpow2.f32 %v519_v57  ;;  %v521_v60 = vmul.f32 1.442695, %v507_v56  ;;  %v733_v50 = vld [vmem:[#allocation3 + $0xe8] sm:$0xff]  ;;  %v3049_v52 = vcombine.low %v721_v45, %v725_v46  ;;  %v736_v55 = vld [vmem:[#allocation3 + $0x100] sm:$0xff] }
  0x76   : > { %v3056_v53 = vcombine.high %v728_v22, %v732_v23  ;;  %v3058_v54 = vcombine.high %v729_v49, %v733_v50  ;;  %v740_v56 = vld [vmem:[#allocation3 + $0x120] sm:$0xff]  ;;  %v737_v57 = vld [vmem:[#allocation3 + $0x108] sm:$0xff] }
  0x77   : > { %v508_v61 = vmul.f32 0.33333334, %v500_v59  ;;  %3430 = vpow2.f32 %v521_v60  ;;  %v741_v58 = vld [vmem:[#allocation3 + $0x128] sm:$0xff]  ;;  %v3055_v59 = vcombine.low %v728_v22, %v732_v23  ;;  %v3057_v60 = vcombine.low %v729_v49, %v733_v50  ;;  %v776_v35 = vld [vmem:[#allocation3 + $0x240] sm:$0xff] }
  0x78   : > { %v780_v36 = vld [vmem:[#allocation3 + $0x260] sm:$0xff]  ;;  %v785_v45 = vld [vmem:[#allocation3 + $0x288] sm:$0xff] }
  0x79   : > { %v523_v62 = vmul.f32 1.442695, %v508_v61  ;;  %v3064_v61 = vcombine.high %v736_v55, %v740_v56  ;;  %v784_v43 = vld [vmem:[#allocation3 + $0x280] sm:$0xff]  ;;  %v789_v46 = vld [vmem:[#allocation3 + $0x2a8] sm:$0xff] }
  0x7a   : > { %v3419_v63 = vpop.eup %3418  ;;  %v788_v44 = vld [vmem:[#allocation3 + $0x2a0] sm:$0xff]  ;;  %v793_v49 = vld [vmem:[#allocation3 + $0x2c8] sm:$0xff] }
  0x7b   : > { %v3421_v0 = vpop.eup %3420  ;;  %3432 = vpow2.f32 %v523_v62  ;;  %v525_v1 = vpack.c.bf16 %v3419_v63, %v3419_v63  ;;  %v3066_v62 = vcombine.high %v737_v57, %v741_v58  ;;  %v744_v63 = vld [vmem:[#allocation3 + $0x140] sm:$0xff]  ;;  %v797_v50 = vld [vmem:[#allocation3 + $0x2e8] sm:$0xff] }
  0x7c   : > { %v3423_v2 = vpop.eup %3422  ;;  %v526_v3 = vpack.c.bf16 %v3421_v0, %v3421_v0  ;;  %v748_v0 = vld [vmem:[#allocation3 + $0x160] sm:$0xff] }
  0x7d   : > { %v3425_v4 = vpop.eup %3424  ;;  %v527_v5 = vpack.c.bf16 %v3423_v2, %v3423_v2  ;;  %v565_v6 = vunpack.c.l.b16 %v525_v1  ;;  %v745_v1 = vld [vmem:[#allocation3 + $0x148] sm:$0xff]  ;;  %v792_v22 = vld [vmem:[#allocation3 + $0x2c0] sm:$0xff] }
  0x7e   : > { %v3427_v7 = vpop.eup %3426  ;;  %v528_v8 = vpack.c.bf16 %v3425_v4, %v3425_v4  ;;  %v566_v9 = vunpack.c.l.b16 %v526_v3  ;;  %v749_v2 = vld [vmem:[#allocation3 + $0x168] sm:$0xff]  ;;  %v3063_v3 = vcombine.low %v736_v55, %v740_v56  ;;  %v3065_v4 = vcombine.low %v737_v57, %v741_v58  ;;  %v796_v23 = vld [vmem:[#allocation3 + $0x2e0] sm:$0xff] }
  0x7f   : > { %v3429_v10 = vpop.eup %3428  ;;  %v529_v11 = vpack.c.bf16 %v3427_v7, %v3427_v7  ;;  %v567_v12 = vunpack.c.l.b16 %v527_v5  ;;  %v3072_v5 = vcombine.high %v744_v63, %v748_v0  ;;  %v752_v7 = vld [vmem:[#allocation3 + $0x180] sm:$0xff]  ;;  %v801_v57 = vld [vmem:[#allocation3 + $0x308] sm:$0xff] }
  0x80   : > { %v530_v13 = vpack.c.bf16 %v3429_v10, %v3429_v10  ;;  %v568_v16 = vunpack.c.l.b16 %v528_v8  ;;  %v574_v17 = vsel %vm573_vm2, %v566_v9, %v565_v6  ;;  %v3074_v6 = vcombine.high %v745_v1, %v749_v2  ;;  %v756_v8 = vld [vmem:[#allocation3 + $0x1a0] sm:$0xff]  ;;  %v753_v9 = vld [vmem:[#allocation3 + $0x188] sm:$0xff] }
  0x81   : > { %v3431_v18 = vpop.eup %3430  ;;  %v569_v19 = vunpack.c.l.b16 %v529_v11  ;;  %v576_v20 = vsel %vm575_vm3, %v567_v12, %v574_v17  ;;  %v757_v10 = vld [vmem:[#allocation3 + $0x1a8] sm:$0xff]  ;;  %v3071_v11 = vcombine.low %v744_v63, %v748_v0  ;;  %v3073_v12 = vcombine.low %v745_v1, %v749_v2  ;;  %v760_v17 = vld [vmem:[#allocation3 + $0x1c0] sm:$0xff] }
  0x82   : > { %v531_v21 = vpack.c.bf16 %v3431_v18, %v3431_v18  ;;  %v570_v24 = vunpack.c.l.b16 %v530_v13  ;;  %v578_v25 = vsel %vm577_vm4, %v568_v16, %v576_v20  ;;  %v3080_v13 = vcombine.high %v752_v7, %v756_v8  ;;  %v764_v18 = vld [vmem:[#allocation3 + $0x1e0] sm:$0xff]  ;;  %v765_v20 = vld [vmem:[#allocation3 + $0x1e8] sm:$0xff] }
  0x83   : > { %v580_v26 = vsel %vm579_vm5, %v569_v19, %v578_v25  ;;  %v3082_v16 = vcombine.high %v753_v9, %v757_v10  ;;  %v761_v19 = vld [vmem:[#allocation3 + $0x1c8] sm:$0xff]  ;;  %v3088_v25 = vcombine.high %v760_v17, %v764_v18  ;;  %v800_v55 = vld [vmem:[#allocation3 + $0x300] sm:$0xff] }
  0x84   : > { %v571_v27 = vunpack.c.l.b16 %v531_v21  ;;  %v582_v28 = vsel %vm581_vm6, %v570_v24, %v580_v26  ;;  %v3079_v21 = vcombine.low %v752_v7, %v756_v8  ;;  %v3081_v24 = vcombine.low %v753_v9, %v757_v10  ;;  %v804_v56 = vld [vmem:[#allocation3 + $0x320] sm:$0xff]  ;;  %v805_v58 = vld [vmem:[#allocation3 + $0x328] sm:$0xff] }
  0x85   : > { %v3433_v29 = vpop.eup %3432  ;;  %v3090_v26 = vcombine.high %v761_v19, %v765_v20  ;;  %v3089_v32 = vcombine.low %v761_v19, %v765_v20  ;;  %v808_v63 = vld [vmem:[#allocation3 + $0x340] sm:$0xff]  ;;  %v809_v1 = vld [vmem:[#allocation3 + $0x348] sm:$0xff] }
  0x86   : > { %v532_v30 = vpack.c.bf16 %v3433_v29, %v3433_v29  ;;  %v584_v31 = vsel %vm583_vm7, %v571_v27, %v582_v28  ;;  %v768_v27 = vld [vmem:[#allocation3 + $0x200] sm:$0xff]  ;;  %v769_v29 = vld [vmem:[#allocation3 + $0x208] sm:$0xff] }
  0x87   : > { %v772_v28 = vld [vmem:[#allocation3 + $0x220] sm:$0xff]  ;;  %v813_v2 = vld [vmem:[#allocation3 + $0x368] sm:$0xff] }
  0x88   : > { %v572_v33 = vunpack.c.l.b16 %v532_v30  ;;  %v773_v30 = vld [vmem:[#allocation3 + $0x228] sm:$0xff]  ;;  %v812_v0 = vld [vmem:[#allocation3 + $0x360] sm:$0xff]  ;;  %v3137_v8 = vcombine.low %v809_v1, %v813_v2 }
  0x89   : > { %v3098_v34 = vcombine.high %v769_v29, %v773_v30  ;;  %v3135_v7 = vcombine.low %v808_v63, %v812_v0  ;;  %v816_v9 = vld [vmem:[#allocation3 + $0x380] sm:$0xff] }
  0x8a   : > { %v586_v37 = vsel %vm585_vm8, %v572_v33, %v584_v31  ;;  %v3087_v31 = vcombine.low %v760_v17, %v764_v18  ;;  %v3096_v33 = vcombine.high %v768_v27, %v772_v28  ;;  %v820_v10 = vld [vmem:[#allocation3 + $0x3a0] sm:$0xff] }
  0x8b   : > { %v587_v40 = vpack.c.b16 %v586_v37, %v586_v37  ;;  %v777_v37 = vld [vmem:[#allocation3 + $0x248] sm:$0xff]  ;;  %v824_v19 = vld [vmem:[#allocation3 + $0x3c0] sm:$0xff] }
  0x8c   : > { %v828_v20 = vld [vmem:[#allocation3 + $0x3e0] sm:$0xff] }
  0x8d   : > { %3028 = vmatmul.mubr.msk.bf16.vlgmr.msra.gmra.mrb[0].mxu0 %vm403_vm1, %v587_v40  ;;  %3030 = vmatmul.mubr.msk.bf16.vlgmr.msra.gmra.mrb[0].mxu1 %vm403_vm1, %v587_v40  ;;  %v3097_v40 = vcombine.low %v769_v29, %v773_v30  ;;  %v832_v29 = vld [vmem:[#allocation3 + $0x400] sm:$0xff] }
  0x8e   : > { %2283 = vmatpush1.bf16.msra.mxu0 %v3031_v38  ;;  %2365 = vmatpush1.bf16.msra.mxu1 %v3033_v39  ;;  %v781_v38 = vld [vmem:[#allocation3 + $0x268] sm:$0xff]  ;;  %v3095_v39 = vcombine.low %v768_v27, %v772_v28  ;;  %v836_v30 = vld [vmem:[#allocation3 + $0x420] sm:$0xff] }
  0x8f   : > { %2284 = vmatprep.subr.bf16.mxu0 %v3040_v41  ;;  %2366 = vmatprep.subr.bf16.mxu1 %v3042_v42  ;;  %v3104_v41 = vcombine.high %v776_v35, %v780_v36  ;;  %v3106_v42 = vcombine.high %v777_v37, %v781_v38 }
  0x92   : > { %2285 = vmatpush1.bf16.msra.mxu0 %v3039_v47  ;;  %2367 = vmatpush1.bf16.msra.mxu1 %v3041_v48  ;;  %v3103_v47 = vcombine.low %v776_v35, %v780_v36  ;;  %v3105_v48 = vcombine.low %v777_v37, %v781_v38  ;;  %v537_v37 = vlaneseq }
  0x93   : > { %2286 = vmatprep.subr.bf16.mxu0 %v3048_v14  ;;  %2368 = vmatprep.subr.bf16.mxu1 %v3050_v15  ;;  %v3112_v14 = vcombine.high %v784_v43, %v788_v44  ;;  %v3114_v15 = vcombine.high %v785_v45, %v789_v46 }
  0x94   : > { %v3809_v38 = vshrl.u32 %v537_v37, 7  ;;  %v880_v37 = vld [vmem:[#allocation3 + $0x580] sm:$0xff] }
  0x96   : > { %2287 = vmatpush1.bf16.msra.mxu0 %v3047_v51  ;;  %2369 = vmatpush1.bf16.msra.mxu1 %v3049_v52  ;;  %v3111_v51 = vcombine.low %v784_v43, %v788_v44  ;;  %v3113_v52 = vcombine.low %v785_v45, %v789_v46  ;;  %vm2616_vm9 = vcmp.lt.s32.totalorder %v3809_v38, 4 }
  0x97   : > { %2288 = vmatprep.subr.bf16.mxu0 %v3056_v53  ;;  %2370 = vmatprep.subr.bf16.mxu1 %v3058_v54  ;;  %v3120_v53 = vcombine.high %v792_v22, %v796_v23  ;;  %v3122_v54 = vcombine.high %v793_v49, %v797_v50 }
  0x9a   : > { %2289 = vmatpush1.bf16.msra.mxu0 %v3055_v59  ;;  %2371 = vmatpush1.bf16.msra.mxu1 %v3057_v60  ;;  %v3119_v59 = vcombine.low %v792_v22, %v796_v23  ;;  %v3121_v60 = vcombine.low %v793_v49, %v797_v50 }
  0x9b   : > { %2290 = vmatprep.subr.bf16.mxu0 %v3064_v61  ;;  %2372 = vmatprep.subr.bf16.mxu1 %v3066_v62  ;;  %v3128_v61 = vcombine.high %v800_v55, %v804_v56  ;;  %v3130_v62 = vcombine.high %v801_v57, %v805_v58 }
  0x9e   : > { %2291 = vmatpush1.bf16.msra.mxu0 %v3063_v3  ;;  %2373 = vmatpush1.bf16.msra.mxu1 %v3065_v4  ;;  %v3127_v3 = vcombine.low %v800_v55, %v804_v56  ;;  %v3129_v4 = vcombine.low %v801_v57, %v805_v58  ;;  %v844_v56 = vld [vmem:[#allocation3 + $0x460] sm:$0xff]  ;;  %v841_v57 = vld [vmem:[#allocation3 + $0x448] sm:$0xff] }
  0x9f   : > { %2292 = vmatprep.subr.bf16.mxu0 %v3072_v5  ;;  %2374 = vmatprep.subr.bf16.mxu1 %v3074_v6  ;;  %v3136_v5 = vcombine.high %v808_v63, %v812_v0  ;;  %v3138_v6 = vcombine.high %v809_v1, %v813_v2  ;;  %v845_v58 = vld [vmem:[#allocation3 + $0x468] sm:$0xff]  ;;  %v848_v0 = vld [vmem:[#allocation3 + $0x480] sm:$0xff] }
  0xa0   : > { %v3170_v63 = vcombine.high %v841_v57, %v845_v58  ;;  %v852_v1 = vld [vmem:[#allocation3 + $0x4a0] sm:$0xff]  ;;  %v849_v2 = vld [vmem:[#allocation3 + $0x488] sm:$0xff] }
  0xa2   : > { %2293 = vmatpush1.bf16.msra.mxu0 %v3071_v11  ;;  %2375 = vmatpush1.bf16.msra.mxu1 %v3073_v12  ;;  %v817_v11 = vld [vmem:[#allocation3 + $0x388] sm:$0xff]  ;;  %v3144_v12 = vcombine.high %v816_v9, %v820_v10 }
  0xa3   : > { %2294 = vmatprep.subr.bf16.mxu0 %v3080_v13  ;;  %2376 = vmatprep.subr.bf16.mxu1 %v3082_v16  ;;  %v821_v13 = vld [vmem:[#allocation3 + $0x3a8] sm:$0xff]  ;;  %v3143_v16 = vcombine.low %v816_v9, %v820_v10  ;;  %v856_v9 = vld [vmem:[#allocation3 + $0x4c0] sm:$0xff] }
  0xa4   : > { %v3145_v17 = vcombine.low %v817_v11, %v821_v13  ;;  %v3146_v18 = vcombine.high %v817_v11, %v821_v13  ;;  %v860_v10 = vld [vmem:[#allocation3 + $0x4e0] sm:$0xff]  ;;  %v857_v11 = vld [vmem:[#allocation3 + $0x4c8] sm:$0xff]  ;;  %v3175_v13 = vcombine.low %v848_v0, %v852_v1 }
  0xa6   : > { %2295 = vmatpush1.bf16.msra.mxu0 %v3079_v21  ;;  %2377 = vmatpush1.bf16.msra.mxu1 %v3081_v24  ;;  %v825_v21 = vld [vmem:[#allocation3 + $0x3c8] sm:$0xff]  ;;  %v3152_v24 = vcombine.high %v824_v19, %v828_v20 }
  0xa7   : > { %2296 = vmatprep.subr.bf16.mxu0 %v3088_v25  ;;  %2378 = vmatprep.subr.bf16.mxu1 %v3090_v26  ;;  %v829_v25 = vld [vmem:[#allocation3 + $0x3e8] sm:$0xff]  ;;  %v3151_v26 = vcombine.low %v824_v19, %v828_v20  ;;  %v864_v19 = vld [vmem:[#allocation3 + $0x500] sm:$0xff] }
  0xa8   : > { %v3153_v27 = vcombine.low %v825_v21, %v829_v25  ;;  %v3154_v28 = vcombine.high %v825_v21, %v829_v25  ;;  %v868_v20 = vld [vmem:[#allocation3 + $0x520] sm:$0xff]  ;;  %v865_v21 = vld [vmem:[#allocation3 + $0x508] sm:$0xff]  ;;  %v3183_v25 = vcombine.low %v856_v9, %v860_v10 }
  0xaa   : > { %2297 = vmatpush1.bf16.msra.mxu0 %v3087_v31  ;;  %2379 = vmatpush1.bf16.msra.mxu1 %v3089_v32  ;;  %v833_v31 = vld [vmem:[#allocation3 + $0x408] sm:$0xff]  ;;  %v3160_v32 = vcombine.high %v832_v29, %v836_v30 }
  0xab   : > { %2298 = vmatprep.subr.bf16.mxu0 %v3096_v33  ;;  %2380 = vmatprep.subr.bf16.mxu1 %v3098_v34  ;;  %v837_v33 = vld [vmem:[#allocation3 + $0x428] sm:$0xff]  ;;  %v3159_v34 = vcombine.low %v832_v29, %v836_v30  ;;  %v872_v29 = vld [vmem:[#allocation3 + $0x540] sm:$0xff] }
  0xac   : > { %v3161_v35 = vcombine.low %v833_v31, %v837_v33  ;;  %v3162_v36 = vcombine.high %v833_v31, %v837_v33  ;;  %v876_v30 = vld [vmem:[#allocation3 + $0x560] sm:$0xff]  ;;  %v873_v31 = vld [vmem:[#allocation3 + $0x548] sm:$0xff]  ;;  %v3191_v33 = vcombine.low %v864_v19, %v868_v20 }
  0xae   : > { %2299 = vmatpush1.bf16.msra.mxu0 %v3095_v39  ;;  %2381 = vmatpush1.bf16.msra.mxu1 %v3097_v40  ;;  %v539_v39 = vsub.s32 0, %v3809_v38  ;;  %v3815_v40 = vld [vmem:[%s4050_s3] sm:$0xf] }
  0xaf   : > { %2300 = vmatprep.subr.bf16.mxu0 %v3104_v41  ;;  %2382 = vmatprep.subr.bf16.mxu1 %v3106_v42  ;;  %v543_v41 = vsub.s32 1, %v3809_v38  ;;  %v551_v42 = vsub.s32 3, %v3809_v38 }
  0xb0   : > { %v540_v43 = vrot.slane %v3815_v40, %v539_v39 }
  0xb1   : > { %v544_v44 = vrot.slane %v3815_v40, %v543_v41  ;;  %v552_v45 = vrot.slane %v3815_v40, %v551_v42 }
  0xb2   : > { %2301 = vmatpush1.bf16.msra.mxu0 %v3103_v47  ;;  %2383 = vmatpush1.bf16.msra.mxu1 %v3105_v48 }
  0xb3   : > { %2302 = vmatprep.subr.bf16.mxu0 %v3112_v14  ;;  %2384 = vmatprep.subr.bf16.mxu1 %v3114_v15 }
  0xb6   : > { %2303 = vmatpush1.bf16.msra.mxu0 %v3111_v51  ;;  %2385 = vmatpush1.bf16.msra.mxu1 %v3113_v52 }
  0xb7   : > { %2304 = vmatprep.subr.bf16.mxu0 %v3120_v53  ;;  %2386 = vmatprep.subr.bf16.mxu1 %v3122_v54  ;;  %v840_v53 = vld [vmem:[#allocation3 + $0x440] sm:$0xff] }
  0xba   : > { %2305 = vmatpush1.bf16.msra.mxu0 %v3119_v59  ;;  %2387 = vmatpush1.bf16.msra.mxu1 %v3121_v60 }
  0xbb   : > { %2306 = vmatprep.subr.bf16.mxu0 %v3128_v61  ;;  %2388 = vmatprep.subr.bf16.mxu1 %v3130_v62  ;;  %v3168_v62 = vcombine.high %v840_v53, %v844_v56 }
  0xbe   : > { %2307 = vmatpush1.bf16.msra.mxu0 %v3127_v3  ;;  %2389 = vmatpush1.bf16.msra.mxu1 %v3129_v4  ;;  %v853_v3 = vld [vmem:[#allocation3 + $0x4a8] sm:$0xff] }
  0xbf   : > { %2308 = vmatprep.subr.bf16.mxu0 %v3136_v5  ;;  %2390 = vmatprep.subr.bf16.mxu1 %v3138_v6  ;;  %v3167_v5 = vcombine.low %v840_v53, %v844_v56  ;;  %v3169_v6 = vcombine.low %v841_v57, %v845_v58  ;;  %v900_v56 = vld [vmem:[#allocation3 + $0x620] sm:$0xff]  ;;  %v897_v57 = vld [vmem:[#allocation3 + $0x608] sm:$0xff] }
  0xc0   : > { %v901_v58 = vld [vmem:[#allocation3 + $0x628] sm:$0xff] }
  0xc2   : > { %2309 = vmatpush1.bf16.msra.mxu0 %v3135_v7  ;;  %2391 = vmatpush1.bf16.msra.mxu1 %v3137_v8  ;;  %v3176_v7 = vcombine.high %v848_v0, %v852_v1  ;;  %v3178_v8 = vcombine.high %v849_v2, %v853_v3  ;;  %v3226_v0 = vcombine.high %v897_v57, %v901_v58  ;;  %v904_v1 = vld [vmem:[#allocation3 + $0x640] sm:$0xff] }
  0xc3   : > { %2310 = vmatprep.subr.bf16.mxu0 %v3144_v12  ;;  %2392 = vmatprep.subr.bf16.mxu1 %v3146_v18  ;;  %v861_v12 = vld [vmem:[#allocation3 + $0x4e8] sm:$0xff] }
  0xc4   : > { %v3186_v18 = vcombine.high %v857_v11, %v861_v12 }
  0xc6   : > { %2311 = vmatpush1.bf16.msra.mxu0 %v3143_v16  ;;  %2393 = vmatpush1.bf16.msra.mxu1 %v3145_v17  ;;  %v3177_v16 = vcombine.low %v849_v2, %v853_v3  ;;  %v3184_v17 = vcombine.high %v856_v9, %v860_v10  ;;  %v908_v2 = vld [vmem:[#allocation3 + $0x660] sm:$0xff]  ;;  %v905_v3 = vld [vmem:[#allocation3 + $0x648] sm:$0xff] }
  0xc7   : > { %2312 = vmatprep.subr.bf16.mxu0 %v3152_v24  ;;  %2394 = vmatprep.subr.bf16.mxu1 %v3154_v28  ;;  %v869_v24 = vld [vmem:[#allocation3 + $0x528] sm:$0xff]  ;;  %v912_v10 = vld [vmem:[#allocation3 + $0x680] sm:$0xff] }
  0xc8   : > { %v3194_v28 = vcombine.high %v865_v21, %v869_v24 }
  0xca   : > { %2313 = vmatpush1.bf16.msra.mxu0 %v3151_v26  ;;  %2395 = vmatpush1.bf16.msra.mxu1 %v3153_v27  ;;  %v3185_v26 = vcombine.low %v857_v11, %v861_v12  ;;  %v3192_v27 = vcombine.high %v864_v19, %v868_v20  ;;  %v916_v11 = vld [vmem:[#allocation3 + $0x6a0] sm:$0xff]  ;;  %v913_v12 = vld [vmem:[#allocation3 + $0x688] sm:$0xff] }
  0xcb   : > { %2323 = vmatprep.subr.bf16.mxu0 %v3160_v32  ;;  %2405 = vmatprep.subr.bf16.mxu1 %v3162_v36  ;;  %v877_v32 = vld [vmem:[#allocation3 + $0x568] sm:$0xff]  ;;  %v920_v20 = vld [vmem:[#allocation3 + $0x6c0] sm:$0xff] }
  0xcc   : > { %v3202_v36 = vcombine.high %v873_v31, %v877_v32 }
 0x160   : > { %v648_v46 = vpop.f32.mrb[0].mxu0  ;;  %v3828_v47 = vpop.f32.mrb[0].mxu1 }
 0x161   : > { %v649_v48 = vadd.f32 %v648_v46, %v540_v43  ;;  %v650_v14 = vpop.f32.mrb[1].mxu0  ;;  %v691_v15 = vpop.f32.mrb[1].mxu1  ;;  %v884_v43 = vld [vmem:[#allocation3 + $0x5a0] sm:$0xff]  ;;  %v3199_v46 = vcombine.low %v872_v29, %v876_v30 }
 0x162   : > { %v651_v22 = vadd.f32 %v650_v14, %v544_v44  ;;  %v652_v23 = vpop.f32.mrb[2].mxu0  ;;  %v692_v49 = vadd.f32 %v691_v15, %v552_v45  ;;  %v693_v50 = vpop.f32.mrb[2].mxu1  ;;  %v881_v44 = vld [vmem:[#allocation3 + $0x588] sm:$0xff]  ;;  %v3208_v14 = vcombine.high %v880_v37, %v884_v43 }
 0x163   : > { %v696_v51 = vmax.f32 %v649_v48, 0.0  ;;  %v653_v52 = vpop.f32.mrb[3].mxu0  ;;  %v694_v54 = vpop.f32.mrb[3].mxu1  ;;  %v885_v45 = vld [vmem:[#allocation3 + $0x5a8] sm:$0xff]  ;;  %v3201_v48 = vcombine.low %v873_v31, %v877_v32  ;;  %v892_v23 = vld [vmem:[#allocation3 + $0x5e0] sm:$0xff] }
 0x164   : > { %v697_v55 = vmax.f32 %v651_v22, 0.0  ;;  %v699_v59 = vmax.f32 %v692_v49, 0.0  ;;  %v3210_v15 = vcombine.high %v881_v44, %v885_v45  ;;  %v888_v22 = vld [vmem:[#allocation3 + $0x5c0] sm:$0xff]  ;;  %v889_v49 = vld [vmem:[#allocation3 + $0x5c8] sm:$0xff]  ;;  %v3209_v52 = vcombine.low %v881_v44, %v885_v45 }
 0x165   : > { %v3832_v61 = vpack.c.bf16 %v696_v51, %v696_v51  ;;  %v893_v50 = vld [vmem:[#allocation3 + $0x5e8] sm:$0xff]  ;;  %v3207_v51 = vcombine.low %v880_v37, %v884_v43  ;;  %v3216_v53 = vcombine.high %v888_v22, %v892_v23  ;;  %v932_v31 = vld [vmem:[#allocation3 + $0x720] sm:$0xff] }
 0x166   : > { %v3830_v60 = vpack.c.bf16 %v697_v55, %v697_v55  ;;  %v3836_v4 = vpack.c.bf16 %v699_v59, %v699_v59  ;;  %v3218_v54 = vcombine.high %v889_v49, %v893_v50  ;;  %v896_v55 = vld [vmem:[#allocation3 + $0x600] sm:$0xff]  ;;  %v3215_v59 = vcombine.low %v888_v22, %v892_v23  ;;  %v929_v32 = vld [vmem:[#allocation3 + $0x708] sm:$0xff] }
 0x167   : > { %v936_v43 = vld [vmem:[#allocation3 + $0x740] sm:$0xff]  ;;  %v937_v45 = vld [vmem:[#allocation3 + $0x748] sm:$0xff] }
 0x168   : > { %2314 = vmatprep.mubr.bf16.mxu0 %v3830_v60  ;;  %2396 = vmatprep.mubr.bf16.mxu1 %v3830_v60  ;;  %v940_v44 = vld [vmem:[#allocation3 + $0x760] sm:$0xff] }
 0x169   : > { %2315 = vmatmul.mubr.bf16.vlgmr.msra.gmra.mrb[4].mxu0 %v3832_v61  ;;  %2397 = vmatmul.mubr.bf16.vlgmr.msra.gmra.mrb[4].mxu1 %v3832_v61  ;;  %v3264_v22 = vcombine.high %v936_v43, %v940_v44 }
 0x16a   : > { %2324 = vmatpush1.bf16.msra.mxu0 %v3159_v34  ;;  %2406 = vmatpush1.bf16.msra.mxu1 %v3161_v35  ;;  %v3193_v34 = vcombine.low %v865_v21, %v869_v24  ;;  %v3200_v35 = vcombine.high %v872_v29, %v876_v30  ;;  %v924_v21 = vld [vmem:[#allocation3 + $0x6e0] sm:$0xff]  ;;  %v921_v24 = vld [vmem:[#allocation3 + $0x6c8] sm:$0xff] }
 0x16b   : > { %2325 = vmatprep.subr.bf16.mxu0 %v3168_v62  ;;  %2407 = vmatprep.subr.bf16.mxu1 %v3170_v63  ;;  %v3217_v62 = vcombine.low %v889_v49, %v893_v50  ;;  %v3224_v63 = vcombine.high %v896_v55, %v900_v56  ;;  %v928_v30 = vld [vmem:[#allocation3 + $0x700] sm:$0xff] }
 0x16c   : > { %2355 = vmatprep.mubr.bf16.mxu0 %v3836_v4  ;;  %2437 = vmatprep.mubr.bf16.mxu1 %v3836_v4  ;;  %v944_v49 = vld [vmem:[#allocation3 + $0x780] sm:$0xff] }
 0x16d   : > { %v948_v50 = vld [vmem:[#allocation3 + $0x7a0] sm:$0xff] }
 0x16e   : > { %2326 = vmatpush1.bf16.msra.mxu0 %v3167_v5  ;;  %2408 = vmatpush1.bf16.msra.mxu1 %v3169_v6  ;;  %v909_v5 = vld [vmem:[#allocation3 + $0x668] sm:$0xff]  ;;  %v3223_v6 = vcombine.low %v896_v55, %v900_v56  ;;  %v3272_v56 = vcombine.high %v944_v49, %v948_v50 }
 0x16f   : > { %2327 = vmatprep.subr.bf16.mxu0 %v3176_v7  ;;  %2409 = vmatprep.subr.bf16.mxu1 %v3178_v8  ;;  %v3225_v7 = vcombine.low %v897_v57, %v901_v58  ;;  %v3232_v8 = vcombine.high %v904_v1, %v908_v2  ;;  %v3234_v9 = vcombine.high %v905_v3, %v909_v5  ;;  %v952_v58 = vld [vmem:[#allocation3 + $0x7c0] sm:$0xff] }
 0x172   : > { %2328 = vmatpush1.bf16.msra.mxu0 %v3175_v13  ;;  %2410 = vmatpush1.bf16.msra.mxu1 %v3177_v16  ;;  %v917_v13 = vld [vmem:[#allocation3 + $0x6a8] sm:$0xff]  ;;  %v3231_v16 = vcombine.low %v904_v1, %v908_v2  ;;  %v3271_v1 = vcombine.low %v944_v49, %v948_v50 }
 0x173   : > { %2329 = vmatprep.subr.bf16.mxu0 %v3184_v17  ;;  %2411 = vmatprep.subr.bf16.mxu1 %v3186_v18  ;;  %v3233_v17 = vcombine.low %v905_v3, %v909_v5  ;;  %v3240_v18 = vcombine.high %v912_v10, %v916_v11  ;;  %v3242_v19 = vcombine.high %v913_v12, %v917_v13  ;;  %v706_v5 = vld [vmem:[#allocation3 + $0x10] sm:$0xff] }
 0x176   : > { %2330 = vmatpush1.bf16.msra.mxu0 %v3183_v25  ;;  %2412 = vmatpush1.bf16.msra.mxu1 %v3185_v26  ;;  %v925_v25 = vld [vmem:[#allocation3 + $0x6e8] sm:$0xff]  ;;  %v3239_v26 = vcombine.low %v912_v10, %v916_v11 }
 0x177   : > { %2331 = vmatprep.subr.bf16.mxu0 %v3192_v27  ;;  %2413 = vmatprep.subr.bf16.mxu1 %v3194_v28  ;;  %v3241_v27 = vcombine.low %v913_v12, %v917_v13  ;;  %v3248_v28 = vcombine.high %v920_v20, %v924_v21  ;;  %v3250_v29 = vcombine.high %v921_v24, %v925_v25  ;;  %v714_v13 = vld [vmem:[#allocation3 + $0x50] sm:$0xff] }
 0x17a   : > { %2332 = vmatpush1.bf16.msra.mxu0 %v3191_v33  ;;  %2414 = vmatpush1.bf16.msra.mxu1 %v3193_v34  ;;  %v933_v33 = vld [vmem:[#allocation3 + $0x728] sm:$0xff]  ;;  %v3247_v34 = vcombine.low %v920_v20, %v924_v21 }
 0x17b   : > { %2333 = vmatprep.subr.bf16.mxu0 %v3200_v35  ;;  %2415 = vmatprep.subr.bf16.mxu1 %v3202_v36  ;;  %v3249_v35 = vcombine.low %v921_v24, %v925_v25  ;;  %v3256_v36 = vcombine.high %v928_v30, %v932_v31  ;;  %v3258_v37 = vcombine.high %v929_v32, %v933_v33 }
 0x17e   : > { %2334 = vmatpush1.bf16.msra.mxu0 %v3199_v46  ;;  %2416 = vmatpush1.bf16.msra.mxu1 %v3201_v48  ;;  %v941_v46 = vld [vmem:[#allocation3 + $0x768] sm:$0xff]  ;;  %v547_v48 = vsub.s32 2, %v3809_v38 }
 0x17f   : > { %2335 = vmatprep.subr.bf16.mxu0 %v3208_v14  ;;  %2417 = vmatprep.subr.bf16.mxu1 %v3210_v15  ;;  %v3255_v14 = vcombine.low %v928_v30, %v932_v31  ;;  %v3257_v15 = vcombine.low %v929_v32, %v933_v33  ;;  %v3266_v23 = vcombine.high %v937_v45, %v941_v46 }
 0x180   : > { %v3265_v55 = vcombine.low %v937_v45, %v941_v46 }
 0x182   : > { %2336 = vmatpush1.bf16.msra.mxu0 %v3207_v51  ;;  %2418 = vmatpush1.bf16.msra.mxu1 %v3209_v52  ;;  %v945_v51 = vld [vmem:[#allocation3 + $0x788] sm:$0xff] }
 0x183   : > { %2337 = vmatprep.subr.bf16.mxu0 %v3216_v53  ;;  %2419 = vmatprep.subr.bf16.mxu1 %v3218_v54  ;;  %v949_v52 = vld [vmem:[#allocation3 + $0x7a8] sm:$0xff]  ;;  %v548_v53 = vrot.slane %v3815_v40, %v547_v48  ;;  %v3263_v54 = vcombine.low %v936_v43, %v940_v44 }
 0x184   : > { %v3274_v57 = vcombine.high %v945_v51, %v949_v52  ;;  %v3273_v2 = vcombine.low %v945_v51, %v949_v52  ;;  %v746_v52 = vld [vmem:[#allocation3 + $0x150] sm:$0xff] }
 0x186   : > { %2338 = vmatpush1.bf16.msra.mxu0 %v3215_v59  ;;  %2420 = vmatpush1.bf16.msra.mxu1 %v3217_v62  ;;  %v956_v59 = vld [vmem:[#allocation3 + $0x7e0] sm:$0xff]  ;;  %v953_v62 = vld [vmem:[#allocation3 + $0x7c8] sm:$0xff] }
 0x187   : > { %2339 = vmatprep.subr.bf16.mxu0 %v3224_v63  ;;  %2421 = vmatprep.subr.bf16.mxu1 %v3226_v0  ;;  %v957_v63 = vld [vmem:[#allocation3 + $0x7e8] sm:$0xff]  ;;  %v690_v0 = vadd.f32 %v3828_v47, %v548_v53  ;;  %v3280_v40 = vcombine.high %v952_v58, %v956_v59  ;;  %v3279_v10 = vcombine.low %v952_v58, %v956_v59  ;;  %v750_v53 = vld [vmem:[#allocation3 + $0x170] sm:$0xff] }
 0x188   : > { %v3282_v3 = vcombine.high %v953_v62, %v957_v63  ;;  %v3281_v11 = vcombine.low %v953_v62, %v957_v63  ;;  %v3076_v58 = vcombine.high %v746_v52, %v750_v53  ;;  %v754_v62 = vld [vmem:[#allocation3 + $0x190] sm:$0xff] }
 0x189   : > { %v758_v63 = vld [vmem:[#allocation3 + $0x1b0] sm:$0xff] }
 0x18a   : > { %2340 = vmatpush1.bf16.msra.mxu0 %v3223_v6  ;;  %2422 = vmatpush1.bf16.msra.mxu1 %v3225_v7  ;;  %v710_v6 = vld [vmem:[#allocation3 + $0x30] sm:$0xff]  ;;  %v707_v7 = vld [vmem:[#allocation3 + $0x18] sm:$0xff] }
 0x18b   : > { %2341 = vmatprep.subr.bf16.mxu0 %v3232_v8  ;;  %2423 = vmatprep.subr.bf16.mxu1 %v3234_v9  ;;  %v711_v8 = vld [vmem:[#allocation3 + $0x38] sm:$0xff]  ;;  %v698_v9 = vmax.f32 %v690_v0, 0.0  ;;  %v3036_v47 = vcombine.high %v706_v5, %v710_v6  ;;  %v3035_v20 = vcombine.low %v706_v5, %v710_v6  ;;  %v762_v6 = vld [vmem:[#allocation3 + $0x1d0] sm:$0xff] }
 0x18c   : > { %v3038_v12 = vcombine.high %v707_v7, %v711_v8  ;;  %v3037_v21 = vcombine.low %v707_v7, %v711_v8  ;;  %v755_v0 = vld [vmem:[#allocation3 + $0x198] sm:$0xff]  ;;  %v766_v7 = vld [vmem:[#allocation3 + $0x1f0] sm:$0xff] }
 0x18d   : > { %v763_v8 = vld [vmem:[#allocation3 + $0x1d8] sm:$0xff] }
 0x18e   : > { %2342 = vmatpush1.bf16.msra.mxu0 %v3231_v16  ;;  %2424 = vmatpush1.bf16.msra.mxu1 %v3233_v17  ;;  %v3847_v16 = vpack.c.bf16 %v698_v9, %v698_v9  ;;  %v718_v17 = vld [vmem:[#allocation3 + $0x70] sm:$0xff]  ;;  %v767_v9 = vld [vmem:[#allocation3 + $0x1f8] sm:$0xff] }
 0x18f   : > { %2343 = vmatprep.subr.bf16.mxu0 %v3240_v18  ;;  %2425 = vmatprep.subr.bf16.mxu1 %v3242_v19  ;;  %v715_v18 = vld [vmem:[#allocation3 + $0x58] sm:$0xff]  ;;  %v3044_v24 = vcombine.high %v714_v13, %v718_v17  ;;  %v3043_v30 = vcombine.low %v714_v13, %v718_v17  ;;  %v770_v13 = vld [vmem:[#allocation3 + $0x210] sm:$0xff] }
 0x190   : > { %v719_v19 = vld [vmem:[#allocation3 + $0x78] sm:$0xff]  ;;  %v774_v17 = vld [vmem:[#allocation3 + $0x230] sm:$0xff] }
 0x191   : > { %v3046_v25 = vcombine.high %v715_v18, %v719_v19  ;;  %v3045_v31 = vcombine.low %v715_v18, %v719_v19  ;;  %v771_v18 = vld [vmem:[#allocation3 + $0x218] sm:$0xff] }
 0x192   : > { %2344 = vmatpush1.bf16.msra.mxu0 %v3239_v26  ;;  %2426 = vmatpush1.bf16.msra.mxu1 %v3241_v27  ;;  %v722_v26 = vld [vmem:[#allocation3 + $0x90] sm:$0xff]  ;;  %v775_v19 = vld [vmem:[#allocation3 + $0x238] sm:$0xff] }
 0x193   : > { %2345 = vmatprep.subr.bf16.mxu0 %v3248_v28  ;;  %2427 = vmatprep.subr.bf16.mxu1 %v3250_v29  ;;  %v726_v27 = vld [vmem:[#allocation3 + $0xb0] sm:$0xff]  ;;  %v723_v28 = vld [vmem:[#allocation3 + $0x98] sm:$0xff] }
 0x194   : > { %v727_v29 = vld [vmem:[#allocation3 + $0xb8] sm:$0xff]  ;;  %v3052_v32 = vcombine.high %v722_v26, %v726_v27  ;;  %v3051_v43 = vcombine.low %v722_v26, %v726_v27  ;;  %v778_v26 = vld [vmem:[#allocation3 + $0x250] sm:$0xff] }
 0x195   : > { %v3054_v33 = vcombine.high %v723_v28, %v727_v29  ;;  %v3053_v44 = vcombine.low %v723_v28, %v727_v29  ;;  %v782_v27 = vld [vmem:[#allocation3 + $0x270] sm:$0xff]  ;;  %v779_v28 = vld [vmem:[#allocation3 + $0x258] sm:$0xff] }
 0x196   : > { %2346 = vmatpush1.bf16.msra.mxu0 %v3247_v34  ;;  %2428 = vmatpush1.bf16.msra.mxu1 %v3249_v35  ;;  %v730_v34 = vld [vmem:[#allocation3 + $0xd0] sm:$0xff]  ;;  %v783_v29 = vld [vmem:[#allocation3 + $0x278] sm:$0xff] }
 0x197   : > { %2347 = vmatprep.subr.bf16.mxu0 %v3256_v36  ;;  %2429 = vmatprep.subr.bf16.mxu1 %v3258_v37  ;;  %v734_v35 = vld [vmem:[#allocation3 + $0xf0] sm:$0xff]  ;;  %v731_v36 = vld [vmem:[#allocation3 + $0xd8] sm:$0xff] }
 0x198   : > { %v735_v37 = vld [vmem:[#allocation3 + $0xf8] sm:$0xff]  ;;  %v3060_v45 = vcombine.high %v730_v34, %v734_v35 }
 0x199   : > { %v3062_v46 = vcombine.high %v731_v36, %v735_v37  ;;  %v3061_v49 = vcombine.low %v731_v36, %v735_v37  ;;  %v787_v36 = vld [vmem:[#allocation3 + $0x298] sm:$0xff] }
 0x19a   : > { %2348 = vmatpush1.bf16.msra.mxu0 %v3255_v14  ;;  %2430 = vmatpush1.bf16.msra.mxu1 %v3257_v15  ;;  %v738_v14 = vld [vmem:[#allocation3 + $0x110] sm:$0xff]  ;;  %v791_v37 = vld [vmem:[#allocation3 + $0x2b8] sm:$0xff] }
 0x19b   : > { %2349 = vmatprep.subr.bf16.mxu0 %v3264_v22  ;;  %2431 = vmatprep.subr.bf16.mxu1 %v3266_v23  ;;  %v742_v15 = vld [vmem:[#allocation3 + $0x130] sm:$0xff]  ;;  %v743_v22 = vld [vmem:[#allocation3 + $0x138] sm:$0xff]  ;;  %v3059_v23 = vcombine.low %v730_v34, %v734_v35 }
 0x19c   : > { %v3068_v50 = vcombine.high %v738_v14, %v742_v15  ;;  %v786_v34 = vld [vmem:[#allocation3 + $0x290] sm:$0xff] }
 0x19d   : > { %v790_v35 = vld [vmem:[#allocation3 + $0x2b0] sm:$0xff] }
 0x19e   : > { %2350 = vmatpush1.bf16.msra.mxu0 %v3263_v54  ;;  %2432 = vmatpush1.bf16.msra.mxu1 %v3265_v55  ;;  %v747_v54 = vld [vmem:[#allocation3 + $0x158] sm:$0xff] }
 0x19f   : > { %2351 = vmatprep.subr.bf16.mxu0 %v3272_v56  ;;  %2433 = vmatprep.subr.bf16.mxu1 %v3274_v57  ;;  %v751_v55 = vld [vmem:[#allocation3 + $0x178] sm:$0xff]  ;;  %v3067_v56 = vcombine.low %v738_v14, %v742_v15  ;;  %v794_v14 = vld [vmem:[#allocation3 + $0x2d0] sm:$0xff] }
 0x1a0   : > { %v3078_v59 = vcombine.high %v747_v54, %v751_v55  ;;  %v798_v15 = vld [vmem:[#allocation3 + $0x2f0] sm:$0xff] }
 0x1a2   : > { %2352 = vmatpush1.bf16.msra.mxu0 %v3271_v1  ;;  %2434 = vmatpush1.bf16.msra.mxu1 %v3273_v2  ;;  %v759_v1 = vld [vmem:[#allocation3 + $0x1b8] sm:$0xff]  ;;  %v3075_v2 = vcombine.low %v746_v52, %v750_v53  ;;  %v802_v52 = vld [vmem:[#allocation3 + $0x310] sm:$0xff] }
 0x1a3   : > { %2353 = vmatprep.subr.bf16.mxu0 %v3280_v40  ;;  %2435 = vmatprep.subr.bf16.mxu1 %v3282_v3  ;;  %v3077_v40 = vcombine.low %v747_v54, %v751_v55  ;;  %v3084_v3 = vcombine.high %v754_v62, %v758_v63  ;;  %v3086_v5 = vcombine.high %v755_v0, %v759_v1  ;;  %v806_v53 = vld [vmem:[#allocation3 + $0x330] sm:$0xff]  ;;  %v803_v54 = vld [vmem:[#allocation3 + $0x318] sm:$0xff] }
 0x1a4   : > { %v807_v55 = vld [vmem:[#allocation3 + $0x338] sm:$0xff] }
 0x1a6   : > { %2354 = vmatpush1.bf16.msra.mxu0 %v3279_v10  ;;  %2436 = vmatpush1.bf16.msra.mxu1 %v3281_v11  ;;  %v3083_v10 = vcombine.low %v754_v62, %v758_v63  ;;  %v3085_v11 = vcombine.low %v755_v0, %v759_v1  ;;  %v810_v62 = vld [vmem:[#allocation3 + $0x350] sm:$0xff]  ;;  %v811_v0 = vld [vmem:[#allocation3 + $0x358] sm:$0xff] }
 0x1a7   : > { %2446 = vmatprep.subr.bf16.mxu0 %v3036_v47  ;;  %2528 = vmatprep.subr.bf16.mxu1 %v3038_v12  ;;  %v3092_v47 = vcombine.high %v762_v6, %v766_v7  ;;  %v3094_v12 = vcombine.high %v763_v8, %v767_v9  ;;  %v814_v63 = vld [vmem:[#allocation3 + $0x370] sm:$0xff]  ;;  %v815_v1 = vld [vmem:[#allocation3 + $0x378] sm:$0xff] }
 0x1a9   : > { %2356 = vmatmul.mubr.bf16.vlgmr.msra.gmra.mrb[4].mxu0 %v3847_v16  ;;  %2438 = vmatmul.mubr.bf16.vlgmr.msra.gmra.mrb[4].mxu1 %v3847_v16 }
 0x1aa   : > { %2447 = vmatpush1.bf16.msra.mxu0 %v3035_v20  ;;  %2478 = vmatprep.mubr.bf16.mxu0 %v3830_v60  ;;  %v3091_v20 = vcombine.low %v762_v6, %v766_v7  ;;  %v818_v6 = vld [vmem:[#allocation3 + $0x390] sm:$0xff] }
 0x1ab   : > { %2529 = vmatpush1.bf16.msra.mxu1 %v3037_v21  ;;  %2560 = vmatprep.mubr.bf16.mxu1 %v3830_v60  ;;  %v739_v60 = vld [vmem:[#allocation3 + $0x118] sm:$0xff]  ;;  %v3093_v21 = vcombine.low %v763_v8, %v767_v9  ;;  %v822_v7 = vld [vmem:[#allocation3 + $0x3b0] sm:$0xff] }
 0x1ac   : > { %2448 = vmatprep.subr.bf16.mxu0 %v3044_v24  ;;  %2530 = vmatprep.subr.bf16.mxu1 %v3046_v25  ;;  %v3070_v51 = vcombine.high %v739_v60, %v743_v22  ;;  %v3069_v57 = vcombine.low %v739_v60, %v743_v22  ;;  %v3100_v24 = vcombine.high %v770_v13, %v774_v17  ;;  %v795_v60 = vld [vmem:[#allocation3 + $0x2d8] sm:$0xff] }
 0x1ad   : > { %v3102_v25 = vcombine.high %v771_v18, %v775_v19  ;;  %v799_v22 = vld [vmem:[#allocation3 + $0x2f8] sm:$0xff] }
 0x1ae   : > { %2449 = vmatpush1.bf16.msra.mxu0 %v3043_v30  ;;  %v3099_v30 = vcombine.low %v770_v13, %v774_v17  ;;  %v819_v8 = vld [vmem:[#allocation3 + $0x398] sm:$0xff]  ;;  %v826_v13 = vld [vmem:[#allocation3 + $0x3d0] sm:$0xff] }
 0x1af   : > { %2531 = vmatpush1.bf16.msra.mxu1 %v3045_v31  ;;  %2450 = vmatprep.subr.bf16.mxu0 %v3052_v32  ;;  %v3101_v31 = vcombine.low %v771_v18, %v775_v19  ;;  %v3108_v32 = vcombine.high %v778_v26, %v782_v27  ;;  %v823_v9 = vld [vmem:[#allocation3 + $0x3b8] sm:$0xff]  ;;  %v830_v17 = vld [vmem:[#allocation3 + $0x3f0] sm:$0xff] }
 0x1b0   : > { %2532 = vmatprep.subr.bf16.mxu1 %v3054_v33  ;;  %v3110_v33 = vcombine.high %v779_v28, %v783_v29  ;;  %v827_v18 = vld [vmem:[#allocation3 + $0x3d8] sm:$0xff] }
 0x1b1   : > { %v831_v19 = vld [vmem:[#allocation3 + $0x3f8] sm:$0xff] }
 0x1b2   : > { %2451 = vmatpush1.bf16.msra.mxu0 %v3051_v43  ;;  %v3107_v43 = vcombine.low %v778_v26, %v782_v27  ;;  %v834_v26 = vld [vmem:[#allocation3 + $0x410] sm:$0xff] }
 0x1b3   : > { %2533 = vmatpush1.bf16.msra.mxu1 %v3053_v44  ;;  %2452 = vmatprep.subr.bf16.mxu0 %v3060_v45  ;;  %v3109_v44 = vcombine.low %v779_v28, %v783_v29  ;;  %v3116_v45 = vcombine.high %v786_v34, %v790_v35  ;;  %v838_v27 = vld [vmem:[#allocation3 + $0x430] sm:$0xff]  ;;  %v835_v28 = vld [vmem:[#allocation3 + $0x418] sm:$0xff] }
 0x1b4   : > { %2534 = vmatprep.subr.bf16.mxu1 %v3062_v46  ;;  %v3118_v46 = vcombine.high %v787_v36, %v791_v37  ;;  %v839_v29 = vld [vmem:[#allocation3 + $0x438] sm:$0xff] }
 0x1b6   : > { %2453 = vmatpush1.bf16.msra.mxu0 %v3059_v23  ;;  %v3115_v23 = vcombine.low %v786_v34, %v790_v35  ;;  %v842_v34 = vld [vmem:[#allocation3 + $0x450] sm:$0xff] }
 0x1b7   : > { %2535 = vmatpush1.bf16.msra.mxu1 %v3061_v49  ;;  %2454 = vmatprep.subr.bf16.mxu0 %v3068_v50  ;;  %v3117_v49 = vcombine.low %v787_v36, %v791_v37  ;;  %v3124_v50 = vcombine.high %v794_v14, %v798_v15  ;;  %v846_v35 = vld [vmem:[#allocation3 + $0x470] sm:$0xff]  ;;  %v3163_v36 = vcombine.low %v834_v26, %v838_v27  ;;  %v843_v37 = vld [vmem:[#allocation3 + $0x458] sm:$0xff] }
 0x1b8   : > { %2536 = vmatprep.subr.bf16.mxu1 %v3070_v51  ;;  %v3126_v51 = vcombine.high %v795_v60, %v799_v22 }
 0x1ba   : > { %2455 = vmatpush1.bf16.msra.mxu0 %v3067_v56  ;;  %v3123_v56 = vcombine.low %v794_v14, %v798_v15  ;;  %v854_v14 = vld [vmem:[#allocation3 + $0x4b0] sm:$0xff] }
 0x1bb   : > { %2537 = vmatpush1.bf16.msra.mxu1 %v3069_v57  ;;  %2456 = vmatprep.subr.bf16.mxu0 %v3076_v58  ;;  %v3125_v57 = vcombine.low %v795_v60, %v799_v22  ;;  %v3132_v58 = vcombine.high %v802_v52, %v806_v53  ;;  %v851_v60 = vld [vmem:[#allocation3 + $0x498] sm:$0xff] }
 0x1bc   : > { %2538 = vmatprep.subr.bf16.mxu1 %v3078_v59  ;;  %v3134_v59 = vcombine.high %v803_v54, %v807_v55  ;;  %v855_v22 = vld [vmem:[#allocation3 + $0x4b8] sm:$0xff] }
 0x1be   : > { %2457 = vmatpush1.bf16.msra.mxu0 %v3075_v2  ;;  %v3131_v2 = vcombine.low %v802_v52, %v806_v53  ;;  %v858_v52 = vld [vmem:[#allocation3 + $0x4d0] sm:$0xff] }
 0x1bf   : > { %2539 = vmatpush1.bf16.msra.mxu1 %v3077_v40  ;;  %2458 = vmatprep.subr.bf16.mxu0 %v3084_v3  ;;  %v3133_v40 = vcombine.low %v803_v54, %v807_v55  ;;  %v3140_v3 = vcombine.high %v810_v62, %v814_v63  ;;  %v862_v53 = vld [vmem:[#allocation3 + $0x4f0] sm:$0xff]  ;;  %v859_v54 = vld [vmem:[#allocation3 + $0x4d8] sm:$0xff] }
 0x1c0   : > { %2540 = vmatprep.subr.bf16.mxu1 %v3086_v5  ;;  %v3142_v5 = vcombine.high %v811_v0, %v815_v1  ;;  %v863_v55 = vld [vmem:[#allocation3 + $0x4f8] sm:$0xff] }
 0x1c2   : > { %2459 = vmatpush1.bf16.msra.mxu0 %v3083_v10  ;;  %v3139_v10 = vcombine.low %v810_v62, %v814_v63  ;;  %v870_v62 = vld [vmem:[#allocation3 + $0x530] sm:$0xff]  ;;  %v867_v63 = vld [vmem:[#allocation3 + $0x518] sm:$0xff] }
 0x1c3   : > { %2541 = vmatpush1.bf16.msra.mxu1 %v3085_v11  ;;  %2460 = vmatprep.subr.bf16.mxu0 %v3092_v47  ;;  %v3141_v11 = vcombine.low %v811_v0, %v815_v1  ;;  %v3148_v47 = vcombine.high %v818_v6, %v822_v7  ;;  %v871_v0 = vld [vmem:[#allocation3 + $0x538] sm:$0xff]  ;;  %v3189_v1 = vcombine.low %v859_v54, %v863_v55 }
 0x1c4   : > { %2542 = vmatprep.subr.bf16.mxu1 %v3094_v12  ;;  %v3150_v12 = vcombine.high %v819_v8, %v823_v9 }
 0x1c6   : > { %2461 = vmatpush1.bf16.msra.mxu0 %v3091_v20  ;;  %v3147_v20 = vcombine.low %v818_v6, %v822_v7  ;;  %v875_v6 = vld [vmem:[#allocation3 + $0x558] sm:$0xff] }
 0x1c7   : > { %2543 = vmatpush1.bf16.msra.mxu1 %v3093_v21  ;;  %2462 = vmatprep.subr.bf16.mxu0 %v3100_v24  ;;  %v3149_v21 = vcombine.low %v819_v8, %v823_v9  ;;  %v3156_v24 = vcombine.high %v826_v13, %v830_v17  ;;  %v879_v7 = vld [vmem:[#allocation3 + $0x578] sm:$0xff]  ;;  %v3197_v9 = vcombine.low %v867_v63, %v871_v0 }
 0x1c8   : > { %2544 = vmatprep.subr.bf16.mxu1 %v3102_v25  ;;  %v3158_v25 = vcombine.high %v827_v18, %v831_v19 }
 0x1ca   : > { %2463 = vmatpush1.bf16.msra.mxu0 %v3099_v30  ;;  %v3155_v30 = vcombine.low %v826_v13, %v830_v17  ;;  %v883_v13 = vld [vmem:[#allocation3 + $0x598] sm:$0xff] }
 0x1cb   : > { %2545 = vmatpush1.bf16.msra.mxu1 %v3101_v31  ;;  %2464 = vmatprep.subr.bf16.mxu0 %v3108_v32  ;;  %v3157_v31 = vcombine.low %v827_v18, %v831_v19  ;;  %v3164_v32 = vcombine.high %v834_v26, %v838_v27  ;;  %v887_v17 = vld [vmem:[#allocation3 + $0x5b8] sm:$0xff]  ;;  %v3205_v19 = vcombine.low %v875_v6, %v879_v7 }
 0x1cc   : > { %2546 = vmatprep.subr.bf16.mxu1 %v3110_v33  ;;  %v3166_v33 = vcombine.high %v835_v28, %v839_v29  ;;  %v891_v26 = vld [vmem:[#allocation3 + $0x5d8] sm:$0xff] }
 0x1cd   : > { %v895_v27 = vld [vmem:[#allocation3 + $0x5f8] sm:$0xff] }
 0x1ce   : > { %2465 = vmatpush1.bf16.msra.mxu0 %v3107_v43  ;;  %v847_v43 = vld [vmem:[#allocation3 + $0x478] sm:$0xff] }
 0x1cf   : > { %2547 = vmatpush1.bf16.msra.mxu1 %v3109_v44  ;;  %2466 = vmatprep.subr.bf16.mxu0 %v3116_v45  ;;  %v3165_v44 = vcombine.low %v835_v28, %v839_v29  ;;  %v3172_v45 = vcombine.high %v842_v34, %v846_v35  ;;  %v3174_v15 = vcombine.high %v843_v37, %v847_v43 }
 0x1d0   : > { %2548 = vmatprep.subr.bf16.mxu1 %v3118_v46  ;;  %v850_v46 = vld [vmem:[#allocation3 + $0x490] sm:$0xff]  ;;  %v3213_v29 = vcombine.low %v883_v13, %v887_v17 }
 0x1d2   : > { %2467 = vmatpush1.bf16.msra.mxu0 %v3115_v23  ;;  %v3171_v23 = vcombine.low %v842_v34, %v846_v35  ;;  %v899_v34 = vld [vmem:[#allocation3 + $0x618] sm:$0xff] }
 0x1d3   : > { %2549 = vmatpush1.bf16.msra.mxu1 %v3117_v49  ;;  %2468 = vmatprep.subr.bf16.mxu0 %v3124_v50  ;;  %v3173_v49 = vcombine.low %v843_v37, %v847_v43  ;;  %v3180_v50 = vcombine.high %v850_v46, %v854_v14  ;;  %v903_v35 = vld [vmem:[#allocation3 + $0x638] sm:$0xff]  ;;  %v3221_v37 = vcombine.low %v891_v26, %v895_v27 }
 0x1d4   : > { %2550 = vmatprep.subr.bf16.mxu1 %v3126_v51  ;;  %v3182_v51 = vcombine.high %v851_v60, %v855_v22 }
 0x1d6   : > { %2469 = vmatpush1.bf16.msra.mxu0 %v3123_v56  ;;  %v3179_v56 = vcombine.low %v850_v46, %v854_v14  ;;  %v910_v46 = vld [vmem:[#allocation3 + $0x670] sm:$0xff]  ;;  %v907_v14 = vld [vmem:[#allocation3 + $0x658] sm:$0xff] }
 0x1d7   : > { %2551 = vmatpush1.bf16.msra.mxu1 %v3125_v57  ;;  %2470 = vmatprep.subr.bf16.mxu0 %v3132_v58  ;;  %v3188_v57 = vcombine.high %v858_v52, %v862_v53  ;;  %v3190_v58 = vcombine.high %v859_v54, %v863_v55 }
 0x1d8   : > { %2552 = vmatprep.subr.bf16.mxu1 %v3134_v59  ;;  %v866_v59 = vld [vmem:[#allocation3 + $0x510] sm:$0xff] }
 0x1d9   : > { %v3195_v8 = vcombine.low %v866_v59, %v870_v62 }
 0x1da   : > { %2471 = vmatpush1.bf16.msra.mxu0 %v3131_v2  ;;  %v3196_v2 = vcombine.high %v866_v59, %v870_v62  ;;  %v923_v59 = vld [vmem:[#allocation3 + $0x6d8] sm:$0xff] }
 0x1db   : > { %2553 = vmatpush1.bf16.msra.mxu1 %v3133_v40  ;;  %2472 = vmatprep.subr.bf16.mxu0 %v3140_v3  ;;  %v3198_v40 = vcombine.high %v867_v63, %v871_v0  ;;  %v874_v3 = vld [vmem:[#allocation3 + $0x550] sm:$0xff]  ;;  %v927_v62 = vld [vmem:[#allocation3 + $0x6f8] sm:$0xff] }
 0x1dc   : > { %2554 = vmatprep.subr.bf16.mxu1 %v3142_v5  ;;  %v878_v5 = vld [vmem:[#allocation3 + $0x570] sm:$0xff] }
 0x1dd   : > { %v3203_v18 = vcombine.low %v874_v3, %v878_v5 }
 0x1de   : > { %2473 = vmatpush1.bf16.msra.mxu0 %v3139_v10  ;;  %v3204_v10 = vcombine.high %v874_v3, %v878_v5  ;;  %v931_v3 = vld [vmem:[#allocation3 + $0x718] sm:$0xff] }
 0x1df   : > { %2555 = vmatpush1.bf16.msra.mxu1 %v3141_v11  ;;  %2474 = vmatprep.subr.bf16.mxu0 %v3148_v47  ;;  %v3206_v11 = vcombine.high %v875_v6, %v879_v7  ;;  %v882_v47 = vld [vmem:[#allocation3 + $0x590] sm:$0xff]  ;;  %v935_v5 = vld [vmem:[#allocation3 + $0x738] sm:$0xff]  ;;  %v3253_v7 = vcombine.low %v923_v59, %v927_v62 }
 0x1e0   : > { %2556 = vmatprep.subr.bf16.mxu1 %v3150_v12  ;;  %v886_v12 = vld [vmem:[#allocation3 + $0x5b0] sm:$0xff] }
 0x1e1   : > { %v3211_v28 = vcombine.low %v882_v47, %v886_v12 }
 0x1e2   : > { %2475 = vmatpush1.bf16.msra.mxu0 %v3147_v20  ;;  %v3212_v20 = vcombine.high %v882_v47, %v886_v12  ;;  %v939_v47 = vld [vmem:[#allocation3 + $0x758] sm:$0xff] }
 0x1e3   : > { %2557 = vmatpush1.bf16.msra.mxu1 %v3149_v21  ;;  %2476 = vmatprep.subr.bf16.mxu0 %v3156_v24  ;;  %v3214_v21 = vcombine.high %v883_v13, %v887_v17  ;;  %v890_v24 = vld [vmem:[#allocation3 + $0x5d0] sm:$0xff]  ;;  %v943_v12 = vld [vmem:[#allocation3 + $0x778] sm:$0xff]  ;;  %v3261_v17 = vcombine.low %v931_v3, %v935_v5 }
 0x1e4   : > { %2558 = vmatprep.subr.bf16.mxu1 %v3158_v25  ;;  %v894_v25 = vld [vmem:[#allocation3 + $0x5f0] sm:$0xff] }
 0x1e6   : > { %2477 = vmatpush1.bf16.msra.mxu0 %v3155_v30  ;;  %v3220_v30 = vcombine.high %v890_v24, %v894_v25 }
 0x1e7   : > { %2559 = vmatpush1.bf16.msra.mxu1 %v3157_v31  ;;  %2487 = vmatprep.subr.bf16.mxu0 %v3164_v32  ;;  %v3222_v31 = vcombine.high %v891_v26, %v895_v27  ;;  %v898_v32 = vld [vmem:[#allocation3 + $0x610] sm:$0xff]  ;;  %v3269_v27 = vcombine.low %v939_v47, %v943_v12 }
 0x1e8   : > { %2569 = vmatprep.subr.bf16.mxu1 %v3166_v33  ;;  %v902_v33 = vld [vmem:[#allocation3 + $0x630] sm:$0xff] }
 0x1e9   : > { %2479 = vmatmul.mubr.bf16.vlgmr.msra.gmra.mrb[8].mxu0 %v3832_v61  ;;  %v3228_v43 = vcombine.high %v898_v32, %v902_v33 }
 0x1ea   : > { %2561 = vmatmul.mubr.bf16.vlgmr.msra.gmra.mrb[8].mxu1 %v3832_v61  ;;  %2488 = vmatpush1.bf16.msra.mxu0 %v3163_v36  ;;  %v3181_v61 = vcombine.low %v851_v60, %v855_v22  ;;  %v3219_v36 = vcombine.low %v890_v24, %v894_v25  ;;  %v3227_v60 = vcombine.low %v898_v32, %v902_v33  ;;  %v947_v24 = vld [vmem:[#allocation3 + $0x798] sm:$0xff] }
 0x1eb   : > { %2519 = vmatprep.mubr.bf16.mxu0 %v3836_v4  ;;  %2570 = vmatpush1.bf16.msra.mxu1 %v3165_v44  ;;  %v3230_v44 = vcombine.high %v899_v34, %v903_v35  ;;  %v3229_v22 = vcombine.low %v899_v34, %v903_v35  ;;  %v951_v25 = vld [vmem:[#allocation3 + $0x7b8] sm:$0xff] }
 0x1ec   : > { %2601 = vmatprep.mubr.bf16.mxu1 %v3836_v4  ;;  %2489 = vmatprep.subr.bf16.mxu0 %v3172_v45  ;;  %v3187_v4 = vcombine.low %v858_v52, %v862_v53  ;;  %v906_v45 = vld [vmem:[#allocation3 + $0x650] sm:$0xff]  ;;  %v915_v52 = vld [vmem:[#allocation3 + $0x698] sm:$0xff]  ;;  %v3277_v35 = vcombine.low %v947_v24, %v951_v25 }
 0x1ed   : > { %2571 = vmatprep.subr.bf16.mxu1 %v3174_v15  ;;  %v911_v15 = vld [vmem:[#allocation3 + $0x678] sm:$0xff]  ;;  %v3235_v54 = vcombine.low %v906_v45, %v910_v46 }
 0x1ee   : > { %2490 = vmatpush1.bf16.msra.mxu0 %v3171_v23  ;;  %v3236_v23 = vcombine.high %v906_v45, %v910_v46  ;;  %v919_v53 = vld [vmem:[#allocation3 + $0x6b8] sm:$0xff]  ;;  %v3237_v55 = vcombine.low %v907_v14, %v911_v15  ;;  %v3862_v45 = vld [vmem:[%s4052_s5] sm:$0xff] }
 0x1ef   : > { %2572 = vmatpush1.bf16.msra.mxu1 %v3173_v49  ;;  %2491 = vmatprep.subr.bf16.mxu0 %v3180_v50  ;;  %v3238_v49 = vcombine.high %v907_v14, %v911_v15  ;;  %v914_v50 = vld [vmem:[#allocation3 + $0x690] sm:$0xff]  ;;  %v3245_v0 = vcombine.low %v915_v52, %v919_v53  ;;  %v955_v32 = vld [vmem:[#allocation3 + $0x7d8] sm:$0xff]  ;;  %v965_v46 = vrot.slane %v3862_v45, %v539_v39 }
 0x1f0   : > { %2573 = vmatprep.subr.bf16.mxu1 %v3182_v51  ;;  %v918_v51 = vld [vmem:[#allocation3 + $0x6b0] sm:$0xff]  ;;  %v959_v33 = vld [vmem:[#allocation3 + $0x7f8] sm:$0xff]  ;;  %v973_v14 = vrot.slane %v3862_v45, %v547_v48  ;;  %v969_v15 = vrot.slane %v3862_v45, %v543_v41 }
 0x1f1   : > { %v3243_v63 = vcombine.low %v914_v50, %v918_v51 }
 0x1f2   : > { %2492 = vmatpush1.bf16.msra.mxu0 %v3179_v56  ;;  %v3244_v56 = vcombine.high %v914_v50, %v918_v51 }
 0x1f3   : > { %2574 = vmatpush1.bf16.msra.mxu1 %v3181_v61  ;;  %2493 = vmatprep.subr.bf16.mxu0 %v3188_v57  ;;  %v3246_v61 = vcombine.high %v915_v52, %v919_v53  ;;  %v922_v57 = vld [vmem:[#allocation3 + $0x6d0] sm:$0xff] }
 0x1f4   : > { %2575 = vmatprep.subr.bf16.mxu1 %v3190_v58  ;;  %v926_v58 = vld [vmem:[#allocation3 + $0x6f0] sm:$0xff] }
 0x1f5   : > { %v3251_v6 = vcombine.low %v922_v57, %v926_v58 }
 0x1f6   : > { %2494 = vmatpush1.bf16.msra.mxu0 %v3187_v4  ;;  %v3252_v4 = vcombine.high %v922_v57, %v926_v58 }
 0x1f7   : > { %2576 = vmatpush1.bf16.msra.mxu1 %v3189_v1  ;;  %2495 = vmatprep.subr.bf16.mxu0 %v3196_v2  ;;  %v3254_v1 = vcombine.high %v923_v59, %v927_v62  ;;  %v930_v2 = vld [vmem:[#allocation3 + $0x710] sm:$0xff] }
 0x1f8   : > { %2577 = vmatprep.subr.bf16.mxu1 %v3198_v40  ;;  %v934_v40 = vld [vmem:[#allocation3 + $0x730] sm:$0xff] }
 0x1f9   : > { %v3259_v13 = vcombine.low %v930_v2, %v934_v40 }
 0x1fa   : > { %2496 = vmatpush1.bf16.msra.mxu0 %v3195_v8  ;;  %v3260_v8 = vcombine.high %v930_v2, %v934_v40 }
 0x1fb   : > { %2578 = vmatpush1.bf16.msra.mxu1 %v3197_v9  ;;  %2497 = vmatprep.subr.bf16.mxu0 %v3204_v10  ;;  %v3262_v9 = vcombine.high %v931_v3, %v935_v5  ;;  %v938_v10 = vld [vmem:[#allocation3 + $0x750] sm:$0xff] }
 0x1fc   : > { %2579 = vmatprep.subr.bf16.mxu1 %v3206_v11  ;;  %v942_v11 = vld [vmem:[#allocation3 + $0x770] sm:$0xff] }
 0x1fd   : > { %v3267_v26 = vcombine.low %v938_v10, %v942_v11 }
 0x1fe   : > { %2498 = vmatpush1.bf16.msra.mxu0 %v3203_v18  ;;  %v3268_v18 = vcombine.high %v938_v10, %v942_v11 }
 0x1ff   : > { %2580 = vmatpush1.bf16.msra.mxu1 %v3205_v19  ;;  %2499 = vmatprep.subr.bf16.mxu0 %v3212_v20  ;;  %v3270_v19 = vcombine.high %v939_v47, %v943_v12  ;;  %v946_v20 = vld [vmem:[#allocation3 + $0x790] sm:$0xff] }
 0x200   : > { %2581 = vmatprep.subr.bf16.mxu1 %v3214_v21  ;;  %v950_v21 = vld [vmem:[#allocation3 + $0x7b0] sm:$0xff] }
 0x201   : > { %v3275_v34 = vcombine.low %v946_v20, %v950_v21 }
 0x202   : > { %2500 = vmatpush1.bf16.msra.mxu0 %v3211_v28  ;;  %v3276_v28 = vcombine.high %v946_v20, %v950_v21 }
 0x203   : > { %2582 = vmatpush1.bf16.msra.mxu1 %v3213_v29  ;;  %2501 = vmatprep.subr.bf16.mxu0 %v3220_v30  ;;  %v3278_v29 = vcombine.high %v947_v24, %v951_v25  ;;  %v954_v30 = vld [vmem:[#allocation3 + $0x7d0] sm:$0xff] }
 0x204   : > { %2583 = vmatprep.subr.bf16.mxu1 %v3222_v31  ;;  %v958_v31 = vld [vmem:[#allocation3 + $0x7f0] sm:$0xff] }
 0x206   : > { %2502 = vmatpush1.bf16.msra.mxu0 %v3219_v36  ;;  %v3284_v36 = vcombine.high %v954_v30, %v958_v31 }
 0x207   : > { %2584 = vmatpush1.bf16.msra.mxu1 %v3221_v37  ;;  %2503 = vmatprep.subr.bf16.mxu0 %v3228_v43  ;;  %v3286_v37 = vcombine.high %v955_v32, %v959_v33  ;;  %v3283_v43 = vcombine.low %v954_v30, %v958_v31 }
 0x208   : > { %2585 = vmatprep.subr.bf16.mxu1 %v3230_v44  ;;  %v3285_v44 = vcombine.low %v955_v32, %v959_v33 }
 0x20a   : > { %2504 = vmatpush1.bf16.msra.mxu0 %v3227_v60 }
 0x20b   : > { %2586 = vmatpush1.bf16.msra.mxu1 %v3229_v22  ;;  %2505 = vmatprep.subr.bf16.mxu0 %v3236_v23 }
 0x20c   : > { %2587 = vmatprep.subr.bf16.mxu1 %v3238_v49 }
 0x20e   : > { %2506 = vmatpush1.bf16.msra.mxu0 %v3235_v54 }
 0x20f   : > { %2588 = vmatpush1.bf16.msra.mxu1 %v3237_v55  ;;  %2507 = vmatprep.subr.bf16.mxu0 %v3244_v56 }
 0x210   : > { %2589 = vmatprep.subr.bf16.mxu1 %v3246_v61 }
 0x212   : > { %2508 = vmatpush1.bf16.msra.mxu0 %v3243_v63 }
 0x213   : > { %2590 = vmatpush1.bf16.msra.mxu1 %v3245_v0  ;;  %2509 = vmatprep.subr.bf16.mxu0 %v3252_v4 }
 0x214   : > { %2591 = vmatprep.subr.bf16.mxu1 %v3254_v1 }
 0x216   : > { %2510 = vmatpush1.bf16.msra.mxu0 %v3251_v6 }
 0x217   : > { %2592 = vmatpush1.bf16.msra.mxu1 %v3253_v7  ;;  %2511 = vmatprep.subr.bf16.mxu0 %v3260_v8 }
 0x218   : > { %2593 = vmatprep.subr.bf16.mxu1 %v3262_v9 }
 0x21a   : > { %2512 = vmatpush1.bf16.msra.mxu0 %v3259_v13 }
 0x21b   : > { %2594 = vmatpush1.bf16.msra.mxu1 %v3261_v17  ;;  %2513 = vmatprep.subr.bf16.mxu0 %v3268_v18 }
 0x21c   : > { %2595 = vmatprep.subr.bf16.mxu1 %v3270_v19 }
 0x21e   : > { %2514 = vmatpush1.bf16.msra.mxu0 %v3267_v26 }
 0x21f   : > { %2596 = vmatpush1.bf16.msra.mxu1 %v3269_v27  ;;  %2515 = vmatprep.subr.bf16.mxu0 %v3276_v28 }
 0x220   : > { %2597 = vmatprep.subr.bf16.mxu1 %v3278_v29 }
 0x222   : > { %2516 = vmatpush1.bf16.msra.mxu0 %v3275_v34 }
 0x223   : > { %2598 = vmatpush1.bf16.msra.mxu1 %v3277_v35  ;;  %2517 = vmatprep.subr.bf16.mxu0 %v3284_v36 }
 0x224   : > { %2599 = vmatprep.subr.bf16.mxu1 %v3286_v37 }
 0x226   : > { %2518 = vmatpush1.bf16.msra.mxu0 %v3283_v43 }
 0x227   : > { %2600 = vmatpush1.bf16.msra.mxu1 %v3285_v44 }
 0x229   : > { %2520 = vmatmul.mubr.bf16.vlgmr.msra.gmra.mrb[8].mxu0 %v3847_v16 }
 0x22a   : > { %2602 = vmatmul.mubr.bf16.vlgmr.msra.gmra.mrb[8].mxu1 %v3847_v16  ;;  %v977_v16 = vrot.slane %v3862_v45, %v551_v42 }
 0x27c   : > { %v2357_v60 = vpop.f32.mrb[4].mxu0  ;;  %v2439_v22 = vpop.f32.mrb[4].mxu1 }
 0x27d   : > { %v3310_v23 = vadd.f32 %v2357_v60, %v965_v46  ;;  %v3312_v49 = vadd.f32 %v2439_v22, %v973_v14  ;;  %v2359_v50 = vpop.f32.mrb[5].mxu0  ;;  %v2441_v51 = vpop.f32.mrb[5].mxu1 }
 0x27e   : > { %v3311_v39 = vadd.f32 %v2359_v50, %v969_v15  ;;  %v3313_v52 = vadd.f32 %v2441_v51, %v977_v16  ;;  %v2361_v53 = vpop.f32.mrb[6].mxu0  ;;  %v2443_v54 = vpop.f32.mrb[6].mxu1 }
 0x27f   : > { %3434 = vtanh.f32 %v3310_v23  ;;  %v2362_v48 = vpop.f32.mrb[7].mxu0  ;;  %v2444_v55 = vpop.f32.mrb[7].mxu1 }
 0x280   : > { %3436 = vtanh.f32 %v3312_v49 }
 0x281   : > { %3438 = vtanh.f32 %v3311_v39 }
 0x282   : > { %3440 = vtanh.f32 %v3313_v52 }
 0x289   : > { %v3435_v41 = vpop.eup %3434 }
 0x28a   : > { %v3437_v42 = vpop.eup %3436  ;;  %v2617_v59 = vrot.slane %v3435_v41, 4 }
 0x28b   : > { %v3439_v56 = vpop.eup %3438  ;;  %v2629_v62 = vrot.slane %v3437_v42, 4 }
 0x28c   : > { %v3441_v61 = vpop.eup %3440  ;;  %v3305_v57 = vpack.c.bf16 %v3439_v56, %v3435_v41  ;;  %v2623_v63 = vrot.slane %v3439_v56, 4  ;;  %v2618_v4 = vmax.f32 %v3435_v41, %v2617_v59 }
 0x28d   : > { %v3306_v58 = vpack.c.bf16 %v3441_v61, %v3437_v42  ;;  %v2635_v0 = vrot.slane %v3441_v61, 4  ;;  %v2630_v1 = vmax.f32 %v3437_v42, %v2629_v62 }
 0x28e   : > { %2825 = vst [vmem:[%s3882_s23] sm:$0xff] %v3305_v57  ;;  %v2624_v2 = vmax.f32 %v3439_v56, %v2623_v63  ;;  %v2619_v3 = vrot.slane %v2618_v4, 2  ;;  %v980_v63 = vsub.s32 4, %v3809_v38 }
 0x28f   : > { %2826 = vst [vmem:[%s3882_s23 + $0x8] sm:$0xff] %v3306_v58  ;;  %v2636_v40 = vmax.f32 %v3441_v61, %v2635_v0  ;;  %v2631_v5 = vrot.slane %v2630_v1, 2  ;;  %v988_v0 = vsub.s32 6, %v3809_v38  ;;  %s3934_s23 = scalar_lea.sflag [#allocation8], %s2832_s0 }
 0x290   : > { %v2625_v6 = vrot.slane %v2624_v2, 2  ;;  %v2620_v8 = vmax.f32 %v2618_v4, %v2619_v3  ;;  %v984_v4 = vsub.s32 5, %v3809_v38 }
 0x291   : > { %v2637_v7 = vrot.slane %v2636_v40, 2  ;;  %v2632_v9 = vmax.f32 %v2630_v1, %v2631_v5  ;;  %v992_v1 = vsub.s32 7, %v3809_v38  ;;  %v989_v5 = vrot.slane %v3862_v45, %v988_v0 }
 0x292   : > { %v2626_v10 = vmax.f32 %v2624_v2, %v2625_v6  ;;  %v2621_v47 = vrot.slane %v2620_v8, 1  ;;  %v985_v6 = vrot.slane %v3862_v45, %v984_v4 }
 0x293   : > { %v2638_v11 = vmax.f32 %v2636_v40, %v2637_v7  ;;  %v2633_v12 = vrot.slane %v2632_v9, 1  ;;  %v981_v40 = vrot.slane %v3862_v45, %v980_v63 }
 0x294   : > { %v2627_v13 = vrot.slane %v2626_v10, 1  ;;  %v2622_v18 = vmax.f32 %v2620_v8, %v2621_v47  ;;  %v993_v8 = vrot.slane %v3862_v45, %v992_v1 }
 0x295   : > { %v2639_v17 = vrot.slane %v2638_v11, 1  ;;  %v2634_v19 = vmax.f32 %v2632_v9, %v2633_v12 }
 0x296   : > { %v2628_v20 = vmax.f32 %v2626_v10, %v2627_v13  ;;  %v2641_v24 = vsub.f32 %v3435_v41, %v2622_v18 }
 0x297   : > { %v2640_v21 = vmax.f32 %v2638_v11, %v2639_v17  ;;  %v2643_v25 = vsub.f32 %v3437_v42, %v2634_v19 }
 0x298   : > { %v2642_v26 = vsub.f32 %v3439_v56, %v2628_v20  ;;  %v2645_v28 = vmul.f32 1.442695, %v2641_v24 }
 0x299   : > { %v2644_v27 = vsub.f32 %v3441_v61, %v2640_v21  ;;  %v2649_v29 = vmul.f32 1.442695, %v2643_v25 }
 0x29a   : > { %v2647_v30 = vmul.f32 1.442695, %v2642_v26  ;;  %3442 = vpow2.f32 %v2645_v28 }
 0x29b   : > { %v2651_v31 = vmul.f32 1.442695, %v2644_v27  ;;  %3444 = vpow2.f32 %v2649_v29 }
 0x29c   : > { %3446 = vpow2.f32 %v2647_v30 }
 0x29d   : > { %3448 = vpow2.f32 %v2651_v31 }
 0x2a4   : > { %v3443_v32 = vpop.eup %3442 }
 0x2a5   : > { %v3445_v33 = vpop.eup %3444  ;;  %v2655_v36 = vsel %vm2616_vm9, %v3443_v32, 0.0 }
 0x2a6   : > { %v3447_v34 = vpop.eup %3446  ;;  %v2657_v37 = vsel %vm2616_vm9, %v3445_v33, 0.0  ;;  %v2659_v44 = vrot.slane %v2655_v36, 4 }
 0x2a7   : > { %v3449_v35 = vpop.eup %3448  ;;  %v2656_v43 = vsel %vm2616_vm9, %v3447_v34, 0.0  ;;  %v2671_v14 = vrot.slane %v2657_v37, 4 }
 0x2a8   : > { %v2658_v46 = vsel %vm2616_vm9, %v3449_v35, 0.0  ;;  %v2665_v15 = vrot.slane %v2656_v43, 4  ;;  %v2660_v60 = vadd.f32 %v2659_v44, %v2655_v36 }
 0x2a9   : > { %v2677_v16 = vrot.slane %v2658_v46, 4  ;;  %v2672_v22 = vadd.f32 %v2671_v14, %v2657_v37 }
 0x2aa   : > { %v2666_v23 = vadd.f32 %v2665_v15, %v2656_v43  ;;  %v2661_v50 = vrot.slane %v2660_v60, 2 }
 0x2ab   : > { %v2678_v49 = vadd.f32 %v2677_v16, %v2658_v46  ;;  %v2673_v51 = vrot.slane %v2672_v22, 2 }
 0x2ac   : > { %v2667_v39 = vrot.slane %v2666_v23, 2  ;;  %v2662_v53 = vadd.f32 %v2661_v50, %v2660_v60 }
 0x2ad   : > { %v2679_v52 = vrot.slane %v2678_v49, 2  ;;  %v2674_v54 = vadd.f32 %v2673_v51, %v2672_v22 }
 0x2ae   : > { %v2668_v48 = vadd.f32 %v2667_v39, %v2666_v23  ;;  %v2663_v41 = vrot.slane %v2662_v53, 1 }
 0x2af   : > { %v2680_v55 = vadd.f32 %v2679_v52, %v2678_v49  ;;  %v2675_v42 = vrot.slane %v2674_v54, 1 }
 0x2b0   : > { %v2669_v56 = vrot.slane %v2668_v48, 1  ;;  %v2664_v57 = vadd.f32 %v2663_v41, %v2662_v53 }
 0x2b1   : > { %v2681_v61 = vrot.slane %v2680_v55, 1  ;;  %v2676_v58 = vadd.f32 %v2675_v42, %v2674_v54 }
 0x2b2   : > { %v2670_v59 = vadd.f32 %v2669_v56, %v2668_v48  ;;  %3450 = vrcp.f32 %v2664_v57 }
 0x2b3   : > { %v2682_v62 = vadd.f32 %v2681_v61, %v2680_v55  ;;  %3452 = vrcp.f32 %v2676_v58 }
 0x2b4   : > { %3454 = vrcp.f32 %v2670_v59 }
 0x2b5   : > { %3456 = vrcp.f32 %v2682_v62 }
 0x2bc   : > { %v3451_v2 = vpop.eup %3450 }
 0x2bd   : > { %v3453_v3 = vpop.eup %3452  ;;  %v3895_v47 = vmul.f32 %v3451_v2, %v2655_v36 }
 0x2be   : > { %v3455_v7 = vpop.eup %3454  ;;  %v3897_v18 = vmul.f32 %v3453_v3, %v2657_v37 }
 0x2bf   : > { %v3457_v9 = vpop.eup %3456  ;;  %v3899_v20 = vmul.f32 %v3455_v7, %v2656_v43 }
 0x2c0   : > { %v3904_v27 = vmul.f32 %v3457_v9, %v2658_v46 }
 0x2fc   : > { %v2521_v10 = vpop.f32.mrb[8].mxu0 }
 0x2fd   : > { %v3314_v11 = vadd.f32 %v2521_v10, %v981_v40  ;;  %v2603_v12 = vpop.f32.mrb[8].mxu1  ;;  %v2523_v13 = vpop.f32.mrb[9].mxu0 }
 0x2fe   : > { %v3316_v17 = vadd.f32 %v2603_v12, %v989_v5  ;;  %v3315_v19 = vadd.f32 %v2523_v13, %v985_v6  ;;  %v2605_v21 = vpop.f32.mrb[9].mxu1  ;;  %v2525_v24 = vpop.f32.mrb[10].mxu0 }
 0x2ff   : > { %v2691_v25 = vmul.f32 0.5, %v3314_v11  ;;  %v3902_v45 = vmul.f32 %v3314_v11, %v3895_v47  ;;  %v3317_v26 = vadd.f32 %v2605_v21, %v993_v8  ;;  %v2607_v28 = vpop.f32.mrb[10].mxu1  ;;  %v2526_v29 = vpop.f32.mrb[11].mxu0 }
 0x300   : > { %v2693_v30 = vmul.f32 0.5, %v3316_v17  ;;  %v3908_v31 = vmul.f32 %v3316_v17, %v3897_v18  ;;  %v2692_v32 = vmul.f32 0.5, %v3315_v19  ;;  %v3911_v33 = vmul.f32 %v3315_v19, %v3899_v20  ;;  %v2608_v34 = vpop.f32.mrb[11].mxu1 }
 0x301   : > { %3458 = vtanh.f32 %v2691_v25  ;;  %v3303_v35 = vpack.c.bf16 %v3315_v19, %v3314_v11  ;;  %v2694_v36 = vmul.f32 0.5, %v3317_v26  ;;  %v3918_v37 = vmul.f32 %v3317_v26, %v3904_v27 }
 0x302   : > { %3460 = vtanh.f32 %v2693_v30  ;;  %v3304_v43 = vpack.c.bf16 %v3317_v26, %v3316_v17 }
 0x303   : > { %3462 = vtanh.f32 %v2692_v32  ;;  %2807 = vst [vmem:[%s325_s16] sm:$0xff] %v3303_v35 }
 0x304   : > { %3464 = vtanh.f32 %v2694_v36  ;;  %2808 = vst [vmem:[%s325_s16 + $0x8] sm:$0xff] %v3304_v43 }
 0x305   : > { %3507 = shalt.err (!%p3504_p7)
}
 0x306   : > { %s3508_s0 = scalar_lea.hbm %s3923_s17, 256  ;;  %s3512_s20 = scalar_lea.hbm %s4054_s7, 512 }
 0x307   : > { %p3509_p8 = scmp.ne.s32.totalorder %s3923_s17, %s3508_s0  ;;  %p3513_p1 = scmp.lt.u32.totalorder %s3923_s17, %s4054_s7 }
 0x308   : > { %p3514_p0 = scmp.lt.u32.totalorder %s3512_s20, %s3508_s0  ;;  %p3516_p6 = scmp.lt.u32.totalorder %s3508_s0, %s3923_s17 }
 0x309   : > { %p3510_p11 = pnand %p3509_p8, %p4069_p9 }
 0x30a   : > { %p3515_p5 = por %p3514_p0, %p3513_p1 }
 0x30b   : > { %p3511_p13 = pneg %p3510_p11 }
 0x30c   : > { %p3517_p10 = por %p3516_p6, %p3515_p5 }
 0x30e   : > { %p3518_p12 = pnand %p3517_p10, %p3511_p13 }
 0x310   : > { %3521 = shalt.err (!%p3518_p12)
}
 0x311   : > { %3339 = dma.vmem_to_hbm [thread:$0]  (%p4069_p9), %s3925_s24, 256, %s3923_s17, %s3934_s23  }
 0x312   : > { %s3522_s1 = scalar_lea.vmem %s3932_s25, 256  ;;  %s3627_s9 = smov [#allocation9]  }
 0x313   : > { %p3523_p2 = scmp.ne.s32.totalorder %s3932_s25, %s3522_s1  ;;  %s3526_s12 = sshll.u32 %s3627_s9, 4  ;;  %s3527_s12 = int_to_ptr.vmem [resolvable:$false] %s3526_s12 }
 0x314   : > { %s3528_s0 = scalar_lea.vmem %s3527_s12, 512  ;;  %p3529_p7 = scmp.lt.s32.totalorder %s3932_s25, %s3527_s12 }
 0x315   : > { %p3524_p3 = pnand %p3523_p2, %p4069_p9  ;;  %p3530_p8 = scmp.lt.s32.totalorder %s3528_s0, %s3522_s1 }
 0x317   : > { %p3525_p4 = pneg %p3524_p3  ;;  %p3531_p11 = por %p3530_p8, %p3529_p7 }
 0x319   : > { %p3532_p13 = pnand %p3531_p11, %p3525_p4 }
 0x31b   : > { %3535 = shalt.err (!%p3532_p13)
}
 0x31c   : > { %s3536_s24 = scalar_lea.hbm %s3930_s22, 256  ;;  %s3540_s16 = scalar_lea.hbm %s4055_s8, 512 }
 0x31d   : > { %p3537_p1 = scmp.ne.s32.totalorder %s3930_s22, %s3536_s24  ;;  %p3541_p6 = scmp.lt.u32.totalorder %s3930_s22, %s4055_s8 }
 0x31e   : > { %p3542_p10 = scmp.lt.u32.totalorder %s3540_s16, %s3536_s24  ;;  %p3544_p2 = scmp.lt.u32.totalorder %s3536_s24, %s3930_s22 }
 0x31f   : > { %p3538_p0 = pnand %p3537_p1, %p4069_p9 }
 0x320   : > { %p3543_p12 = por %p3542_p10, %p3541_p6 }
 0x321   : > { %p3539_p5 = pneg %p3538_p0 }
 0x322   : > { %p3545_p3 = por %p3544_p2, %p3543_p12 }
 0x324   : > { %p3546_p4 = pnand %p3545_p3, %p3539_p5 }
 0x326   : > { %3549 = shalt.err (!%p3546_p4)
}
 0x327   : > { %3340 = dma.vmem_to_hbm [thread:$0]  (%p4069_p9), %s3932_s25, 256, %s3930_s22, %s3934_s23   ;;  %v2711_v44 = vrot.slane %v3902_v45, 4  ;;  %v2723_v46 = vrot.slane %v3908_v31, 4  ;;  %v2717_v14 = vrot.slane %v3911_v33, 4  ;;  %v3459_v15 = vpop.eup %3458  ;;  %v2729_v16 = vrot.slane %v3918_v37, 4 }
 0x328   : > { %v3461_v60 = vpop.eup %3460  ;;  %v2699_v22 = vadd.f32 1.0, %v3459_v15  ;;  %v3628_v17 = vmov 1983009808   ;;  %vm2763_vm10 = vcmask 1040384   ;;  %s3018_s25 = sshll.u32 %s3877_s19, 3  ;;  %s3307_s22 = sshll.u32 %s3696_s30, 7 }
 0x329   : > { %v2712_v23 = vadd.f32 %v2711_v44, %v3902_v45  ;;  %v3463_v49 = vpop.eup %3462  ;;  %v2701_v50 = vadd.f32 1.0, %v3461_v60  ;;  %v2724_v51 = vadd.f32 %v2723_v46, %v3908_v31  ;;  %v2718_v54 = vadd.f32 %v2717_v14, %v3911_v33  ;;  %s318_s23 = scalar_lea.vmem [#allocation6], %s3018_s25  ;;  %s4002_s12 = scalar_lea.hbm %s4053_s6, %s3307_s22 }
 0x32a   : > { %v3465_v39 = vpop.eup %3464  ;;  %v2703_v52 = vmul.f32 0.5, %v2699_v22  ;;  %v2700_v53 = vadd.f32 1.0, %v3463_v49  ;;  %v2730_v41 = vadd.f32 %v2729_v16, %v3918_v37  ;;  %s2852_s11 = sshll.u32 %s318_s23, 4  ;;  %s2828_s0 = scalar_lea.sflag [#allocation5], %s3877_s19  ;;  %s4004_s11 = int_to_ptr.vmem [resolvable:$true] %s2852_s11 }
 0x32b   : > { %v2705_v48 = vmul.f32 0.5, %v2701_v50  ;;  %v2702_v55 = vadd.f32 1.0, %v3465_v39  ;;  %v2713_v42 = vrot.slane %v2712_v23, 2  ;;  %v2725_v57 = vrot.slane %v2724_v51, 2  ;;  %s3550_s24 = scalar_lea.vmem %s4004_s11, 128  ;;  %s3629_s30 = smov [#allocation6]  }
 0x32c   : > { %v2735_v56 = vmul.f32 %v2703_v52, %v3895_v47  ;;  %v2704_v61 = vmul.f32 0.5, %v2700_v53  ;;  %v2719_v63 = vrot.slane %v2718_v54, 2  ;;  %v2731_v1 = vrot.slane %v2730_v41, 2  ;;  %p3551_p7 = scmp.ne.s32.totalorder %s4004_s11, %s3550_s24  ;;  %s3554_s17 = sshll.u32 %s3629_s30, 4  ;;  %s3555_s17 = int_to_ptr.vmem [resolvable:$false] %s3554_s17 }
 0x32d   : > { %v2737_v58 = vmul.f32 %v2705_v48, %v3897_v18  ;;  %v2706_v59 = vmul.f32 0.5, %v2702_v55  ;;  %v2714_v40 = vadd.f32 %v2713_v42, %v2712_v23  ;;  %v2726_v6 = vadd.f32 %v2725_v57, %v2724_v51  ;;  %s3556_s18 = scalar_lea.vmem %s3555_s17, 256  ;;  %p3557_p13 = scmp.lt.s32.totalorder %s4004_s11, %s3555_s17 }
 0x32e   : > { %v2739_v62 = vrot.slane %v2735_v56, 4  ;;  %v2736_v0 = vmul.f32 %v2704_v61, %v3899_v20  ;;  %v2720_v10 = vadd.f32 %v2719_v63, %v2718_v54  ;;  %v2732_v12 = vadd.f32 %v2731_v1, %v2730_v41  ;;  %p3552_p8 = pnand %p3551_p7, %p4069_p9  ;;  %p3558_p1 = scmp.lt.s32.totalorder %s3556_s18, %s3550_s24 }
 0x32f   : > { %v2751_v4 = vrot.slane %v2737_v58, 4  ;;  %v2738_v2 = vmul.f32 %v2706_v59, %v3904_v27  ;;  %v2775_v18 = vunpack.c.l.s4 %v3628_v17  ;;  %v2715_v19 = vrot.slane %v2714_v40, 1 }
 0x330   : > { %v2740_v3 = vadd.f32 %v2739_v62, %v2735_v56  ;;  %v2745_v5 = vrot.slane %v2736_v0, 4  ;;  %v2727_v24 = vrot.slane %v2726_v6, 1  ;;  %v2721_v27 = vrot.slane %v2720_v10, 1  ;;  %p3553_p11 = pneg %p3552_p8  ;;  %p3559_p0 = por %p3558_p1, %p3557_p13 }
 0x331   : > { %v2752_v7 = vadd.f32 %v2751_v4, %v2737_v58  ;;  %v2757_v8 = vrot.slane %v2738_v2, 4  ;;  %v2733_v30 = vrot.slane %v2732_v12, 1  ;;  %v2776_v32 = vunpack.c.0.s8 %v2775_v18 }
 0x332   : > { %v2741_v9 = vrot.slane %v2740_v3, 2  ;;  %v2746_v11 = vadd.f32 %v2745_v5, %v2736_v0  ;;  %v2716_v33 = vadd.f32 %v2715_v19, %v2714_v40  ;;  %v2728_v36 = vadd.f32 %v2727_v24, %v2726_v6  ;;  %p3560_p5 = pnand %p3559_p0, %p3553_p11 }
 0x333   : > { %v2753_v47 = vrot.slane %v2752_v7, 2  ;;  %v2758_v13 = vadd.f32 %v2757_v8, %v2738_v2  ;;  %v2722_v44 = vadd.f32 %v2721_v27, %v2720_v10  ;;  %v2734_v15 = vadd.f32 %v2733_v30, %v2732_v12 }
 0x334   : > { %v2742_v20 = vadd.f32 %v2741_v9, %v2740_v3  ;;  %v2747_v21 = vrot.slane %v2746_v11, 2  ;;  %v2779_v22 = vsub.s32 %v2776_v32, %v3809_v38 }
 0x335   : > { %v2754_v25 = vadd.f32 %v2753_v47, %v2752_v7  ;;  %v2759_v45 = vrot.slane %v2758_v13, 2 }
 0x336   : > { %v2743_v26 = vrot.slane %v2742_v20, 1  ;;  %v2748_v28 = vadd.f32 %v2747_v21, %v2746_v11 }
 0x337   : > { %v2755_v29 = vrot.slane %v2754_v25, 1  ;;  %v2760_v31 = vadd.f32 %v2759_v45, %v2758_v13 }
 0x338   : > { %v2744_v34 = vadd.f32 %v2743_v26, %v2742_v20  ;;  %v2749_v35 = vrot.slane %v2748_v28, 1 }
 0x339   : > { %v2756_v37 = vadd.f32 %v2755_v29, %v2754_v25  ;;  %v2761_v43 = vrot.slane %v2760_v31, 1 }
 0x33a   : > { %v2750_v46 = vadd.f32 %v2749_v35, %v2748_v28  ;;  %v2764_v14 = vsel %vm2763_vm10, %v2716_v33, %v2744_v34 }
 0x33b   : > { %v2762_v16 = vadd.f32 %v2761_v43, %v2760_v31  ;;  %v2766_v60 = vsel %vm2763_vm10, %v2728_v36, %v2756_v37 }
 0x33c   : > { %v2765_v23 = vsel %vm2763_vm10, %v2722_v44, %v2750_v46 }
 0x33d   : > { %v2767_v49 = vsel %vm2763_vm10, %v2734_v15, %v2762_v16  ;;  %v2772_v50 = vcombine.low %v2764_v14, %v2765_v23 }
 0x33e   : > { %v2773_v51 = vcombine.low %v2766_v60, %v2767_v49 }
 0x33f   : > { %v2780_v39 = vrot.slane %v2772_v50, %v2779_v22 }
 0x340   : > { %v2787_v52 = vrot.slane %v2773_v51, %v2779_v22 }
 0x342   : > { %v2788_v53 = vcombine.low %v2780_v39, %v2787_v52 }
 0x344   : > { %2790 = vst [vmem:[%s318_s23] sm:$0xff] %v2788_v53 }
 0x345   : > { %3563 = shalt.err (!%p3560_p5)
}
 0x346   : > { %s3564_s19 = scalar_lea.hbm %s4002_s12, 128  ;;  %s3568_s21 = scalar_lea.hbm %s4053_s6, 256 }
 0x347   : > { %p3565_p6 = scmp.ne.s32.totalorder %s4002_s12, %s3564_s19  ;;  %p3569_p2 = scmp.lt.u32.totalorder %s4002_s12, %s4053_s6 }
 0x348   : > { %p3570_p3 = scmp.lt.u32.totalorder %s3568_s21, %s3564_s19  ;;  %p3572_p7 = scmp.lt.u32.totalorder %s3564_s19, %s4002_s12 }
 0x349   : > { %p3566_p10 = pnand %p3565_p6, %p4069_p9 }
 0x34a   : > { %p3571_p4 = por %p3570_p3, %p3569_p2 }
 0x34b   : > { %p3567_p12 = pneg %p3566_p10 }
 0x34c   : > { %p3573_p8 = por %p3572_p7, %p3571_p4 }
 0x34e   : > { %p3574_p11 = pnand %p3573_p8, %p3567_p12 }
 0x350   : > { %3577 = shalt.err (!%p3574_p11)
}
 0x351   : > { %3338 = dma.vmem_to_hbm [thread:$0]  (%p4069_p9), %s4004_s11, 128, %s4002_s12, %s2828_s0  }
 0x352 PF: > { %p3360_p13 = scmp.ge.s32.totalorder %s3620_s29, 2  ;;  %s2892_s23 = sand.u32 1, %s3608_s26  }
 0x353   : > { %p4070_p1 = scmp.ne.s32.totalorder %s4062_s15, 0  ;;  %s2893_s1 = scalar_lea.sflag [#allocation5], %s2892_s23 }
 0x355   : > { %p3349_p0 = pnand %p3360_p13, %p4070_p1 }
 0x357   : > { %3599 = dma.done.wait (!%p3349_p0), %s2893_s1, 128  }
 0x358   : > { %3601 = vsyncadd (!%p3349_p0), %s2893_s1, 4294967168  ;;  %s4071_s9 = sadd.s32 4294967294, %s3620_s29  }
 0x359   : > { %s2901_s24 = sand.u32 1, %s4071_s9  }
 0x35a   : > { %s2902_s30 = scalar_lea.sflag [#allocation8], %s2901_s24 }
 0x35b   : > { %3603 = dma.done.wait (!%p3349_p0), %s2902_s30, 512  }
 0x35c   : > { %3605 = vsyncadd (!%p3349_p0), %s2902_s30, 4294966784  ;;  %p24_p9 = scmp.ge.s32.totalorder %s3700_s10, 4   ;;  %s4072_s26 = smov %s3612_s27 }
 0x35d   : > { %s4073_s27 = smov %s3616_s28  ;;  %s4074_s28 = smov %s3713_s13 }
 0x35e   : > { %s4075_s29 = smov %s3700_s10  ;;  %26 = sbr.rel (!%p24_p9) target bundleno = 8 (0x8), region = 116 }
 0x365   :  { %2916 = vsyncpa [#allocation4], 1 }
 0x366   :  { %2918 = vsyncpa [#allocation4 + $0x1], 1 }
 0x367   :  { %2919 = vsyncpa [#allocation5], 1 }
 0x368   :  { %2921 = vsyncpa [#allocation5 + $0x1], 1 }
 0x369   :  { %2922 = vsyncpa [#allocation8], 1 }
 0x36a   :  { %2924 = vsyncpa [#allocation8 + $0x1], 1 }

// kernel: tpu_custom_call.1
= control target key start
LH: loop header
LB: loop body
LE: loop exit
PB: predicated region body
PF: predicated region fallthrough
CT: control target
= control target key end

     0   :  { %s4047_s0 = inlined_call_operand.<no memory space> [shape: f32[1], index: 0, kind: input, shape index: {}]   ;;  %s4048_s1 = inlined_call_operand.vmem [shape: f32[2,8,16,8], index: 1, kind: input, shape index: {}]   ;;  %s4049_s2 = inlined_call_operand.vmem [shape: bf16[8,512], index: 2, kind: input, shape index: {}]   ;;  %s4050_s3 = inlined_call_operand.vmem [shape: f32[1,512], index: 3, kind: input, shape index: {}]   ;;  %s4051_s4 = inlined_call_operand.hbm [shape: bf16[512,1024], index: 4, kind: input, shape index: {}]   ;;  %s4052_s5 = inlined_call_operand.vmem [shape: f32[1,1024], index: 5, kind: input, shape index: {}]   ;;  %s4053_s6 = inlined_call_operand.hbm [shape: f32[2,2,512], index: 6, kind: output, shape index: {0}]   ;;  %s4054_s7 = inlined_call_operand.hbm [shape: bf16[2,8,512], index: 7, kind: output, shape index: {1}]   ;;  %s4055_s8 = inlined_call_operand.hbm [shape: bf16[2,8,512], index: 8, kind: output, shape index: {2}]  }
   0x1   :  { %4060 = sst [smem:[#allocation13_spill]] %s4048_s1 }
   0x2   :  { %15 = vsyncpa [#allocation4], 0 }
   0x3   :  { %16 = vsyncpa [#allocation5], 0 }
   0x4   :  { %18 = vsyncpa [#allocation5 + $0x1], 0 }
   0x5   :  { %19 = vsyncpa [#allocation8], 0 }
   0x6   :  { %21 = vsyncpa [#allocation8 + $0x1], 0  ;;  %s3675_s26 = smov 0   ;;  %s3677_s27 = smov 0  }
   0x7   :  { %s3679_s28 = smov 0   ;;  %s3681_s29 = smov 0  }
   0x8 LB: > { %s3696_s30 = sadd.s32 4294967295, %s3620_s29   ;;  %s4059_s9 = sadd.s32 4294967294, %s3620_s29   ;;  %s3620_s29 = sphi %s3681_s29, %s4075_s29   ;;  %s3616_s28 = sphi %s3679_s28, %s4074_s28   ;;  %s3612_s27 = sphi %s3677_s27, %s4073_s27   ;;  %s3608_s26 = sphi %s3675_s26, %s4072_s26  }
   0x9   : > { %s3700_s10 = sadd.s32 1, %s3620_s29   ;;  %s165_s11 = sadd.s32 1, %s3616_s28 }
   0xa   : > { %s162_s12 = ssub.s32 %s3620_s29, %s3700_s10  ;;  %p175_p0 = scmp.ne.s32.totalorder %s3616_s28, %s3612_s27 }
   0xb   : > { %p163_p1 = scmp.eq.s32.totalorder %s162_s12, 0  ;;  %p176_p2 = scmp.eq.s32.totalorder %s3696_s30, 1 }
   0xc   : > { %p181_p3 = scmp.ne.s32.totalorder %s3612_s27, %s3608_s26  ;;  %p182_p4 = scmp.eq.s32.totalorder %s4059_s9, 1 }
   0xd   : > { %s3713_s13 = scalar_select %p163_p1, %s3616_s28, %s165_s11  }
   0xe   : > { %p3715_p5 = por %p176_p2, %p175_p0  ;;  %p3719_p6 = por %p182_p4, %p181_p3 }
   0xf   : > { %p3013_p7 = scmp.ge.s32.totalorder %s3620_s29, 1  ;;  %p241_p8 = scmp.lt.s32.totalorder %s3620_s29, 3 }
  0x10   : > { %s4061_s14 = scalar_select %p3715_p5, 1, 0 }
  0x11   : > { %s4062_s15 = scalar_select %p3719_p6, 1, 0 }
  0x12   : > { %p4056_p9 = scmp.eq.s32.totalorder %s3696_s30, 0  ;;  %p3726_p10 = pnand %p3013_p7, %p241_p8 }
  0x13   : > { %s3622_s17 = smov [#allocation3]   ;;  %s3466_s22 = scalar_lea.hbm %s4051_s4, 32768 }
  0x14   : > { %s4063_s16 = scalar_select %p3726_p10, 1, 0 }
  0x15   : > { %s262_s18 = sshll.u32 %s3622_s17, 4  ;;  %p3344_p11 = pneg %p3726_p10  ;;  %s263_s18 = int_to_ptr.vmem [resolvable:$true] %s262_s18 }
  0x16   : > { %p3467_p13 = scmp.ne.s32.totalorder %s4051_s4, %s3466_s22  ;;  %p3473_p3 = scmp.lt.u32.totalorder %s3466_s22, %s4051_s4 }
  0x17   : > { %p3734_p12 = pnand %p4056_p9, %p3344_p11 }
  0x19   : > { %p3468_p0 = pneg %p3734_p12 }
  0x1b   : > { %p3469_p1 = pnand %p3468_p0, %p3467_p13 }
  0x1d   : > { %p3470_p2 = pneg %p3469_p1 }
  0x1f   : > { %p3475_p4 = pnand %p3473_p3, %p3470_p2 }
  0x21   : > { %3478 = shalt.err (!%p3475_p4)
}
  0x22   : > { %s3479_s11 = scalar_lea.vmem %s263_s18, 32768  ;;  %p3487_p9 = scmp.lt.s32.totalorder %s263_s18, %s263_s18 }
  0x23   : > { %p3480_p7 = scmp.ne.s32.totalorder %s263_s18, %s3479_s11  ;;  %p3488_p6 = scmp.lt.s32.totalorder %s3479_s11, %s3479_s11 }
  0x25   : > { %p3482_p8 = pnand %p3480_p7, %p3468_p0  ;;  %p3489_p5 = por %p3488_p6, %p3487_p9 }
  0x27   : > { %p3483_p11 = pneg %p3482_p8 }
  0x29   : > { %p3490_p10 = pnand %p3489_p5, %p3483_p11 }
  0x2b   : > { %3493 = shalt.err (!%p3490_p10)
}
  0x2c   : > { %s3623_s12 = smov 512   ;;  %s3624_s17 = smov 32  }
  0x2d   : > { %3347 = dma.hbm_to_vmem [thread:$0]  (!%p3734_p12), %s4051_s4, 32768, %s263_s18, [#allocation4], %s3623_s12, %s3623_s12, %s3624_s17  }
  0x2e   : > { %p4065_p13 = scmp.ne.s32.totalorder %s4063_s16, 0 }
  0x2f   : > { %p4066_p1 = scmp.eq.s32.totalorder (!%p4065_p13), %s3696_s30, 0 }
  0x30   : > { %289 = sbr.rel (%p4065_p13) target bundleno = 850 (0x352), region = 44 }
  0x37   : > { %3595 = dma.done.wait (%p4066_p1), [#allocation4], 32768   ;;  %p4067_p0 = pmov %p4066_p1 }
  0x38   : > { %p333_p5 = scmp.lt.s32.totalorder %s3696_s30, 1  ;;  %v3625_v0 = vmov 0   ;;  %s4068_s1 = sld [smem:[#allocation13_spill]]  ;;  %v533_v1 = vld [vmem:[%s4049_s2] sm:$0xff]  ;;  %vm601_vm0 = vcmask 1043456   ;;  %vm403_vm1 = vcmask 64512  }
  0x39   : > { %3597 = vsyncadd (%p4067_p0), [#allocation4], 4294934528  ;;  %646 = vmatprep.mubr.bf16.mxu0 %v3625_v0  ;;  %687 = vmatprep.mubr.bf16.mxu1 %v3625_v0  ;;  %v3024_v4 = vcombine.high %v533_v1, %v533_v1  ;;  %v3023_v5 = vcombine.low %v533_v1, %v533_v1  ;;  %vm573_vm2 = vcmask 1041409   ;;  %vm575_vm3 = vcmask 1042434   ;;  %s2832_s0 = sand.u32 1, %s3696_s30   ;;  %p4069_p9 = scmp.ne.s32.totalorder %s4061_s14, 0 }
  0x3a   : > { %s334_s19 = scalar_select %p333_p5, %s3696_s30, 1  ;;  %vm577_vm4 = vcmask 1043459   ;;  %vm579_vm5 = vcmask 1044484   ;;  %vm581_vm6 = vcmask 1045509   ;;  %vm583_vm7 = vcmask 1046534  }
  0x3b   : > { %3027 = vmatprep.subr.msk.bf16.mxu0 %vm601_vm0, %v3024_v4  ;;  %v603_v14 = vsel %vm601_vm0, %v3023_v5, 0  ;;  %vm585_vm8 = vcmask 1047559   ;;  %s3626_s11 = smov [#allocation7]  }
  0x3c   : > { %s3302_s22 = sshll.u32 %s334_s19, 7  ;;  %615 = vmatpush1.bf16.msra.mxu0 %v603_v14  ;;  %s3877_s19 = sand.u32 1, %s3612_s27  }
  0x3d   : > { %s3498_s12 = sshll.u32 %s3626_s11, 4  ;;  %s3499_s12 = int_to_ptr.vmem [resolvable:$false] %s3498_s12 }
  0x3e   : > { %s337_s18 = scalar_lea.vmem %s4068_s1, %s3302_s22  ;;  %s3019_s22 = sshll.u32 %s3877_s19, 4 }
  0x3f   : > { %v339_v2 = vld [vmem:[%s337_s18] sm:$0xff]  ;;  %v340_v3 = vld [vmem:[%s337_s18 + $0x8] sm:$0xff]  ;;  %v341_v6 = vld [vmem:[%s337_s18 + $0x10] sm:$0xff]  ;;  %s3882_s23 = scalar_lea.vmem [#allocation9], %s3019_s22  ;;  %s325_s16 = scalar_lea.vmem [#allocation7], %s3019_s22 }
  0x40   : > { %v342_v7 = vld [vmem:[%s337_s18 + $0x18] sm:$0xff]  ;;  %v343_v8 = vld [vmem:[%s337_s18 + $0x20] sm:$0xff]  ;;  %v355_v9 = vmax.f32 %v339_v2, 1e-06  ;;  %v344_v10 = vld [vmem:[%s337_s18 + $0x28] sm:$0xff]  ;;  %s2866_s24 = sshll.u32 %s325_s16, 4  ;;  %s3925_s24 = int_to_ptr.vmem [resolvable:$true] %s2866_s24 }
  0x41   : > { %v345_v11 = vld [vmem:[%s337_s18 + $0x30] sm:$0xff]  ;;  %v346_v12 = vld [vmem:[%s337_s18 + $0x38] sm:$0xff]  ;;  %v356_v13 = vmax.f32 %v340_v3, 1e-06  ;;  %v347_v15 = vld [vmem:[%s337_s18 + $0x40] sm:$0xff]  ;;  %s2880_s25 = sshll.u32 %s3882_s23, 4  ;;  %p3501_p2 = scmp.lt.s32.totalorder %s3925_s24, %s3499_s12  ;;  %s3932_s25 = int_to_ptr.vmem [resolvable:$true] %s2880_s25 }
  0x42   : > { %v348_v16 = vld [vmem:[%s337_s18 + $0x48] sm:$0xff]  ;;  %v349_v17 = vld [vmem:[%s337_s18 + $0x50] sm:$0xff]  ;;  %v357_v18 = vmax.f32 %v341_v6, 1e-06  ;;  %v371_v19 = vmul.f32 %v355_v9, %v355_v9  ;;  %v350_v20 = vld [vmem:[%s337_s18 + $0x58] sm:$0xff]  ;;  %s3494_s9 = scalar_lea.vmem %s3925_s24, 256 }
  0x43   : > { %v351_v21 = vld [vmem:[%s337_s18 + $0x60] sm:$0xff]  ;;  %v352_v22 = vld [vmem:[%s337_s18 + $0x68] sm:$0xff]  ;;  %v358_v23 = vmax.f32 %v342_v7, 1e-06  ;;  %v372_v24 = vmul.f32 %v356_v13, %v356_v13  ;;  %v353_v25 = vld [vmem:[%s337_s18 + $0x70] sm:$0xff]  ;;  %p3495_p6 = scmp.ne.s32.totalorder %s3925_s24, %s3494_s9  ;;  %s3500_s1 = scalar_lea.vmem %s3499_s12, 512 }
  0x44   : > { %v354_v26 = vld [vmem:[%s337_s18 + $0x78] sm:$0xff]  ;;  %v359_v27 = vmax.f32 %v343_v8, 1e-06  ;;  %v360_v28 = vmax.f32 %v344_v10, 1e-06  ;;  %v373_v29 = vmul.f32 %v357_v18, %v357_v18  ;;  %v387_v30 = vmul.f32 %v371_v19, %v355_v9  ;;  %s3308_s18 = sshll.u32 %s3696_s30, 8  ;;  %p3502_p3 = scmp.lt.s32.totalorder %s3500_s1, %s3494_s9 }
  0x45   : > { %v361_v31 = vmax.f32 %v345_v11, 1e-06  ;;  %v362_v32 = vmax.f32 %v346_v12, 1e-06  ;;  %v363_v33 = vmax.f32 %v347_v15, 1e-06  ;;  %v374_v34 = vmul.f32 %v358_v23, %v358_v23  ;;  %s3923_s17 = scalar_lea.hbm %s4054_s7, %s3308_s18  ;;  %s3930_s22 = scalar_lea.hbm %s4055_s8, %s3308_s18 }
  0x46   : > { %v364_v35 = vmax.f32 %v348_v16, 1e-06  ;;  %v365_v36 = vmax.f32 %v349_v17, 1e-06  ;;  %v366_v37 = vmax.f32 %v350_v20, 1e-06  ;;  %v375_v38 = vmul.f32 %v359_v27, %v359_v27  ;;  %p3496_p10 = pnand %p3495_p6, %p4069_p9  ;;  %p3503_p4 = por %p3502_p3, %p3501_p2 }
  0x47   : > { %v367_v39 = vmax.f32 %v351_v21, 1e-06  ;;  %v368_v40 = vmax.f32 %v352_v22, 1e-06  ;;  %v369_v41 = vmax.f32 %v353_v25, 1e-06  ;;  %v376_v42 = vmul.f32 %v360_v28, %v360_v28 }
  0x48   : > { %v370_v43 = vmax.f32 %v354_v26, 1e-06  ;;  %v377_v44 = vmul.f32 %v361_v31, %v361_v31  ;;  %v378_v45 = vmul.f32 %v362_v32, %v362_v32  ;;  %v379_v46 = vmul.f32 %v363_v33, %v363_v33  ;;  %p3497_p12 = pneg %p3496_p10 }
  0x49   : > { %v380_v47 = vmul.f32 %v364_v35, %v364_v35  ;;  %v381_v48 = vmul.f32 %v365_v36, %v365_v36  ;;  %v382_v49 = vmul.f32 %v366_v37, %v366_v37  ;;  %v383_v50 = vmul.f32 %v367_v39, %v367_v39 }
  0x4a   : > { %v384_v51 = vmul.f32 %v368_v40, %v368_v40  ;;  %v385_v52 = vmul.f32 %v369_v41, %v369_v41  ;;  %v386_v53 = vmul.f32 %v370_v43, %v370_v43  ;;  %v388_v54 = vmul.f32 %v372_v24, %v356_v13  ;;  %p3504_p7 = pnand %p3503_p4, %p3497_p12 }
  0x4b   : > { %v389_v55 = vmul.f32 %v373_v29, %v357_v18  ;;  %v390_v56 = vmul.f32 %v374_v34, %v358_v23  ;;  %v391_v57 = vmul.f32 %v375_v38, %v359_v27  ;;  %v392_v58 = vmul.f32 %v376_v42, %v360_v28 }
  0x4c   : > { %v393_v59 = vmul.f32 %v377_v44, %v361_v31  ;;  %v394_v60 = vmul.f32 %v378_v45, %v362_v32  ;;  %v395_v61 = vmul.f32 %v379_v46, %v363_v33  ;;  %v396_v62 = vmul.f32 %v380_v47, %v364_v35 }
  0x4d   : > { %v397_v63 = vmul.f32 %v381_v48, %v365_v36  ;;  %v398_v0 = vmul.f32 %v382_v49, %v366_v37  ;;  %v399_v1 = vmul.f32 %v383_v50, %v367_v39  ;;  %v400_v2 = vmul.f32 %v384_v51, %v368_v40 }
  0x4e   : > { %v401_v3 = vmul.f32 %v385_v52, %v369_v41  ;;  %v402_v4 = vmul.f32 %v386_v53, %v370_v43  ;;  %v404_v5 = vsel %vm403_vm1, %v387_v30, 0.0  ;;  %v405_v6 = vsel %vm403_vm1, %v388_v54, 0.0 }
  0x4f   : > { %v406_v7 = vadd.f32 %v405_v6, %v404_v5  ;;  %v413_v8 = vsel %vm403_vm1, %v389_v55, 0.0  ;;  %v414_v9 = vsel %vm403_vm1, %v390_v56, 0.0  ;;  %v422_v10 = vsel %vm403_vm1, %v391_v57, 0.0 }
  0x50   : > { %v415_v11 = vadd.f32 %v414_v9, %v413_v8  ;;  %v423_v12 = vsel %vm403_vm1, %v392_v58, 0.0  ;;  %v431_v13 = vsel %vm403_vm1, %v393_v59, 0.0  ;;  %v432_v14 = vsel %vm403_vm1, %v394_v60, 0.0 }
  0x51   : > { %v407_v15 = vrot.slane %v406_v7, 4  ;;  %v424_v16 = vadd.f32 %v423_v12, %v422_v10  ;;  %v433_v17 = vadd.f32 %v432_v14, %v431_v13  ;;  %v440_v18 = vsel %vm403_vm1, %v395_v61, 0.0  ;;  %v3789_v14 = vld [vmem:[#allocation3] sm:$0xff] }
  0x52   : > { %v416_v19 = vrot.slane %v415_v11, 4  ;;  %v441_v20 = vsel %vm403_vm1, %v396_v62, 0.0  ;;  %v449_v21 = vsel %vm403_vm1, %v397_v63, 0.0  ;;  %v450_v22 = vsel %vm403_vm1, %v398_v0, 0.0 }
  0x53   : > { %v408_v23 = vadd.f32 %v407_v15, %v406_v7  ;;  %v425_v24 = vrot.slane %v424_v16, 4  ;;  %v434_v25 = vrot.slane %v433_v17, 4  ;;  %v442_v26 = vadd.f32 %v441_v20, %v440_v18  ;;  %v534_v7 = vld [vmem:[%s4049_s2 + $0x8] sm:$0xff]  ;;  %v3791_v15 = vld [vmem:[#allocation3 + $0x20] sm:$0xff] }
  0x54   : > { %v417_v27 = vadd.f32 %v416_v19, %v415_v11  ;;  %v451_v28 = vadd.f32 %v450_v22, %v449_v21  ;;  %v458_v29 = vsel %vm403_vm1, %v399_v1, 0.0  ;;  %v459_v30 = vsel %vm403_vm1, %v400_v2, 0.0  ;;  %v3793_v22 = vld [vmem:[#allocation3 + $0x8] sm:$0xff] }
  0x55   : > { %v409_v31 = vrot.slane %v408_v23, 2  ;;  %v426_v32 = vadd.f32 %v425_v24, %v424_v16  ;;  %v435_v33 = vadd.f32 %v434_v25, %v433_v17  ;;  %v443_v34 = vrot.slane %v442_v26, 4 }
  0x56   : > { %v418_v35 = vrot.slane %v417_v27, 2  ;;  %v452_v36 = vrot.slane %v451_v28, 4  ;;  %v460_v37 = vadd.f32 %v459_v30, %v458_v29  ;;  %v467_v38 = vsel %vm403_vm1, %v401_v3, 0.0 }
  0x57   : > { %v410_v39 = vadd.f32 %v409_v31, %v408_v23  ;;  %v427_v40 = vrot.slane %v426_v32, 2  ;;  %v436_v41 = vrot.slane %v435_v33, 2  ;;  %v444_v42 = vadd.f32 %v443_v34, %v442_v26  ;;  %v3795_v23 = vld [vmem:[#allocation3 + $0x28] sm:$0xff] }
  0x58   : > { %v419_v43 = vadd.f32 %v418_v35, %v417_v27  ;;  %v453_v44 = vadd.f32 %v452_v36, %v451_v28  ;;  %v461_v45 = vrot.slane %v460_v37, 4  ;;  %v468_v46 = vsel %vm403_vm1, %v402_v4, 0.0 }
  0x59   : > { %v411_v47 = vrot.slane %v410_v39, 1  ;;  %v428_v48 = vadd.f32 %v427_v40, %v426_v32  ;;  %v437_v49 = vadd.f32 %v436_v41, %v435_v33  ;;  %v445_v50 = vrot.slane %v444_v42, 2 }
  0x5a   : > { %v420_v51 = vrot.slane %v419_v43, 1  ;;  %v454_v52 = vrot.slane %v453_v44, 2  ;;  %v462_v53 = vadd.f32 %v461_v45, %v460_v37  ;;  %v469_v54 = vadd.f32 %v468_v46, %v467_v38 }
  0x5b   : > { %v412_v55 = vadd.f32 %v411_v47, %v410_v39  ;;  %v429_v56 = vrot.slane %v428_v48, 1  ;;  %v438_v57 = vrot.slane %v437_v49, 1  ;;  %v446_v58 = vadd.f32 %v445_v50, %v444_v42 }
  0x5c   : > { %v421_v59 = vadd.f32 %v420_v51, %v419_v43  ;;  %v455_v60 = vadd.f32 %v454_v52, %v453_v44  ;;  %v463_v61 = vrot.slane %v462_v53, 2  ;;  %v470_v62 = vrot.slane %v469_v54, 4 }
  0x5d   : > { %v430_v63 = vadd.f32 %v429_v56, %v428_v48  ;;  %v439_v0 = vadd.f32 %v438_v57, %v437_v49  ;;  %v447_v1 = vrot.slane %v446_v58, 1  ;;  %v477_v2 = vmul.f32 0.0625, %v412_v55 }
  0x5e   : > { %v456_v3 = vrot.slane %v455_v60, 1  ;;  %v464_v4 = vadd.f32 %v463_v61, %v462_v53  ;;  %v471_v5 = vadd.f32 %v470_v62, %v469_v54  ;;  %v478_v6 = vmul.f32 0.0625, %v421_v59 }
  0x5f   : > { %v448_v8 = vadd.f32 %v447_v1, %v446_v58  ;;  %v479_v9 = vmul.f32 0.0625, %v430_v63  ;;  %v480_v10 = vmul.f32 0.0625, %v439_v0  ;;  %3402 = vlog2.f32 %v477_v2 }
  0x60   : > { %v457_v11 = vadd.f32 %v456_v3, %v455_v60  ;;  %v465_v12 = vrot.slane %v464_v4, 1  ;;  %v472_v13 = vrot.slane %v471_v5, 2  ;;  %3404 = vlog2.f32 %v478_v6 }
  0x61   : > { %v481_v16 = vmul.f32 0.0625, %v448_v8  ;;  %3406 = vlog2.f32 %v479_v9  ;;  %v3026_v17 = vcombine.high %v534_v7, %v534_v7  ;;  %v3025_v18 = vcombine.low %v534_v7, %v534_v7 }
  0x62   : > { %v466_v19 = vadd.f32 %v465_v12, %v464_v4  ;;  %v473_v20 = vadd.f32 %v472_v13, %v471_v5  ;;  %v482_v21 = vmul.f32 0.0625, %v457_v11  ;;  %3408 = vlog2.f32 %v480_v10 }
  0x63   : > { %3410 = vlog2.f32 %v481_v16  ;;  %3029 = vmatprep.subr.msk.bf16.mxu1 %vm601_vm0, %v3026_v17  ;;  %v609_v24 = vsel %vm601_vm0, %v3025_v18, 0  ;;  %v3032_v25 = vcombine.high %v3789_v14, %v3791_v15  ;;  %v3034_v28 = vcombine.high %v3793_v22, %v3795_v23 }
  0x64   : > { %v474_v26 = vrot.slane %v473_v20, 1  ;;  %v483_v27 = vmul.f32 0.0625, %v466_v19  ;;  %3412 = vlog2.f32 %v482_v21  ;;  %656 = vmatpush1.bf16.msra.mxu1 %v609_v24 }
  0x65   : > { %2282 = vmatprep.subr.bf16.mxu0 %v3032_v25  ;;  %2364 = vmatprep.subr.bf16.mxu1 %v3034_v28 }
  0x66   : > { %v475_v29 = vadd.f32 %v474_v26, %v473_v20  ;;  %3414 = vlog2.f32 %v483_v27 }
  0x68   : > { %v484_v30 = vmul.f32 0.0625, %v475_v29 }
  0x69   : > { %v3403_v31 = vpop.eup %3402 }
  0x6a   : > { %v3405_v32 = vpop.eup %3404  ;;  %v486_v33 = vmul.f32 0.6931472, %v3403_v31  ;;  %3416 = vlog2.f32 %v484_v30 }
  0x6b   : > { %v3407_v34 = vpop.eup %3406  ;;  %v488_v35 = vmul.f32 0.6931472, %v3405_v32  ;;  %v712_v32 = vld [vmem:[#allocation3 + $0x40] sm:$0xff] }
  0x6c   : > { %v3409_v36 = vpop.eup %3408  ;;  %v490_v37 = vmul.f32 0.6931472, %v3407_v34  ;;  %v501_v38 = vmul.f32 0.33333334, %v486_v33  ;;  %v716_v34 = vld [vmem:[#allocation3 + $0x60] sm:$0xff] }
  0x6d   : > { %v3411_v39 = vpop.eup %3410  ;;  %v492_v40 = vmul.f32 0.6931472, %v3409_v36  ;;  %v502_v41 = vmul.f32 0.33333334, %v488_v35  ;;  %v713_v35 = vld [vmem:[#allocation3 + $0x48] sm:$0xff] }
  0x6e   : > { %v3413_v42 = vpop.eup %3412  ;;  %v494_v43 = vmul.f32 0.6931472, %v3411_v39  ;;  %v503_v44 = vmul.f32 0.33333334, %v490_v37  ;;  %v509_v45 = vmul.f32 1.442695, %v501_v38  ;;  %v3031_v38 = vcombine.low %v3789_v14, %v3791_v15 }
  0x6f   : > { %v496_v46 = vmul.f32 0.6931472, %v3413_v42  ;;  %v504_v47 = vmul.f32 0.33333334, %v492_v40  ;;  %v511_v48 = vmul.f32 1.442695, %v502_v41  ;;  %v3033_v39 = vcombine.low %v3793_v22, %v3795_v23 }
  0x70   : > { %v3415_v49 = vpop.eup %3414  ;;  %v505_v50 = vmul.f32 0.33333334, %v494_v43  ;;  %3418 = vpow2.f32 %v509_v45  ;;  %v513_v51 = vmul.f32 1.442695, %v503_v44  ;;  %v717_v36 = vld [vmem:[#allocation3 + $0x68] sm:$0xff]  ;;  %v3040_v41 = vcombine.high %v712_v32, %v716_v34  ;;  %v720_v43 = vld [vmem:[#allocation3 + $0x80] sm:$0xff] }
  0x71   : > { %v498_v52 = vmul.f32 0.6931472, %v3415_v49  ;;  %v506_v53 = vmul.f32 0.33333334, %v496_v46  ;;  %3420 = vpow2.f32 %v511_v48  ;;  %v515_v54 = vmul.f32 1.442695, %v504_v47 }
  0x72   : > { %3422 = vpow2.f32 %v513_v51  ;;  %v517_v55 = vmul.f32 1.442695, %v505_v50  ;;  %v3042_v42 = vcombine.high %v713_v35, %v717_v36  ;;  %v724_v44 = vld [vmem:[#allocation3 + $0xa0] sm:$0xff]  ;;  %v721_v45 = vld [vmem:[#allocation3 + $0x88] sm:$0xff]  ;;  %v3039_v47 = vcombine.low %v712_v32, %v716_v34 }
  0x73   : > { %v507_v56 = vmul.f32 0.33333334, %v498_v52  ;;  %3424 = vpow2.f32 %v515_v54  ;;  %v519_v57 = vmul.f32 1.442695, %v506_v53  ;;  %v725_v46 = vld [vmem:[#allocation3 + $0xa8] sm:$0xff]  ;;  %v3041_v48 = vcombine.low %v713_v35, %v717_v36  ;;  %v728_v22 = vld [vmem:[#allocation3 + $0xc0] sm:$0xff] }
  0x74   : > { %v3417_v58 = vpop.eup %3416  ;;  %3426 = vpow2.f32 %v517_v55  ;;  %v3048_v14 = vcombine.high %v720_v43, %v724_v44  ;;  %v3050_v15 = vcombine.high %v721_v45, %v725_v46  ;;  %v732_v23 = vld [vmem:[#allocation3 + $0xe0] sm:$0xff]  ;;  %v729_v49 = vld [vmem:[#allocation3 + $0xc8] sm:$0xff]  ;;  %v3047_v51 = vcombine.low %v720_v43, %v724_v44 }
  0x75   : > { %v500_v59 = vmul.f32 0.6931472, %v3417_v58  ;;  %3428 = vpow2.f32 %v519_v57  ;;  %v521_v60 = vmul.f32 1.442695, %v507_v56  ;;  %v733_v50 = vld [vmem:[#allocation3 + $0xe8] sm:$0xff]  ;;  %v3049_v52 = vcombine.low %v721_v45, %v725_v46  ;;  %v736_v55 = vld [vmem:[#allocation3 + $0x100] sm:$0xff] }
  0x76   : > { %v3056_v53 = vcombine.high %v728_v22, %v732_v23  ;;  %v3058_v54 = vcombine.high %v729_v49, %v733_v50  ;;  %v740_v56 = vld [vmem:[#allocation3 + $0x120] sm:$0xff]  ;;  %v737_v57 = vld [vmem:[#allocation3 + $0x108] sm:$0xff] }
  0x77   : > { %v508_v61 = vmul.f32 0.33333334, %v500_v59  ;;  %3430 = vpow2.f32 %v521_v60  ;;  %v741_v58 = vld [vmem:[#allocation3 + $0x128] sm:$0xff]  ;;  %v3055_v59 = vcombine.low %v728_v22, %v732_v23  ;;  %v3057_v60 = vcombine.low %v729_v49, %v733_v50  ;;  %v776_v35 = vld [vmem:[#allocation3 + $0x240] sm:$0xff] }
  0x78   : > { %v780_v36 = vld [vmem:[#allocation3 + $0x260] sm:$0xff]  ;;  %v785_v45 = vld [vmem:[#allocation3 + $0x288] sm:$0xff] }
  0x79   : > { %v523_v62 = vmul.f32 1.442695, %v508_v61  ;;  %v3064_v61 = vcombine.high %v736_v55, %v740_v56  ;;  %v784_v43 = vld [vmem:[#allocation3 + $0x280] sm:$0xff]  ;;  %v789_v46 = vld [vmem:[#allocation3 + $0x2a8] sm:$0xff] }
  0x7a   : > { %v3419_v63 = vpop.eup %3418  ;;  %v788_v44 = vld [vmem:[#allocation3 + $0x2a0] sm:$0xff]  ;;  %v793_v49 = vld [vmem:[#allocation3 + $0x2c8] sm:$0xff] }
  0x7b   : > { %v3421_v0 = vpop.eup %3420  ;;  %3432 = vpow2.f32 %v523_v62  ;;  %v525_v1 = vpack.c.bf16 %v3419_v63, %v3419_v63  ;;  %v3066_v62 = vcombine.high %v737_v57, %v741_v58  ;;  %v744_v63 = vld [vmem:[#allocation3 + $0x140] sm:$0xff]  ;;  %v797_v50 = vld [vmem:[#allocation3 + $0x2e8] sm:$0xff] }
  0x7c   : > { %v3423_v2 = vpop.eup %3422  ;;  %v526_v3 = vpack.c.bf16 %v3421_v0, %v3421_v0  ;;  %v748_v0 = vld [vmem:[#allocation3 + $0x160] sm:$0xff] }
  0x7d   : > { %v3425_v4 = vpop.eup %3424  ;;  %v527_v5 = vpack.c.bf16 %v3423_v2, %v3423_v2  ;;  %v565_v6 = vunpack.c.l.b16 %v525_v1  ;;  %v745_v1 = vld [vmem:[#allocation3 + $0x148] sm:$0xff]  ;;  %v792_v22 = vld [vmem:[#allocation3 + $0x2c0] sm:$0xff] }
  0x7e   : > { %v3427_v7 = vpop.eup %3426  ;;  %v528_v8 = vpack.c.bf16 %v3425_v4, %v3425_v4  ;;  %v566_v9 = vunpack.c.l.b16 %v526_v3  ;;  %v749_v2 = vld [vmem:[#allocation3 + $0x168] sm:$0xff]  ;;  %v3063_v3 = vcombine.low %v736_v55, %v740_v56  ;;  %v3065_v4 = vcombine.low %v737_v57, %v741_v58  ;;  %v796_v23 = vld [vmem:[#allocation3 + $0x2e0] sm:$0xff] }
  0x7f   : > { %v3429_v10 = vpop.eup %3428  ;;  %v529_v11 = vpack.c.bf16 %v3427_v7, %v3427_v7  ;;  %v567_v12 = vunpack.c.l.b16 %v527_v5  ;;  %v3072_v5 = vcombine.high %v744_v63, %v748_v0  ;;  %v752_v7 = vld [vmem:[#allocation3 + $0x180] sm:$0xff]  ;;  %v801_v57 = vld [vmem:[#allocation3 + $0x308] sm:$0xff] }
  0x80   : > { %v530_v13 = vpack.c.bf16 %v3429_v10, %v3429_v10  ;;  %v568_v16 = vunpack.c.l.b16 %v528_v8  ;;  %v574_v17 = vsel %vm573_vm2, %v566_v9, %v565_v6  ;;  %v3074_v6 = vcombine.high %v745_v1, %v749_v2  ;;  %v756_v8 = vld [vmem:[#allocation3 + $0x1a0] sm:$0xff]  ;;  %v753_v9 = vld [vmem:[#allocation3 + $0x188] sm:$0xff] }
  0x81   : > { %v3431_v18 = vpop.eup %3430  ;;  %v569_v19 = vunpack.c.l.b16 %v529_v11  ;;  %v576_v20 = vsel %vm575_vm3, %v567_v12, %v574_v17  ;;  %v757_v10 = vld [vmem:[#allocation3 + $0x1a8] sm:$0xff]  ;;  %v3071_v11 = vcombine.low %v744_v63, %v748_v0  ;;  %v3073_v12 = vcombine.low %v745_v1, %v749_v2  ;;  %v760_v17 = vld [vmem:[#allocation3 + $0x1c0] sm:$0xff] }
  0x82   : > { %v531_v21 = vpack.c.bf16 %v3431_v18, %v3431_v18  ;;  %v570_v24 = vunpack.c.l.b16 %v530_v13  ;;  %v578_v25 = vsel %vm577_vm4, %v568_v16, %v576_v20  ;;  %v3080_v13 = vcombine.high %v752_v7, %v756_v8  ;;  %v764_v18 = vld [vmem:[#allocation3 + $0x1e0] sm:$0xff]  ;;  %v765_v20 = vld [vmem:[#allocation3 + $0x1e8] sm:$0xff] }
  0x83   : > { %v580_v26 = vsel %vm579_vm5, %v569_v19, %v578_v25  ;;  %v3082_v16 = vcombine.high %v753_v9, %v757_v10  ;;  %v761_v19 = vld [vmem:[#allocation3 + $0x1c8] sm:$0xff]  ;;  %v3088_v25 = vcombine.high %v760_v17, %v764_v18  ;;  %v800_v55 = vld [vmem:[#allocation3 + $0x300] sm:$0xff] }
  0x84   : > { %v571_v27 = vunpack.c.l.b16 %v531_v21  ;;  %v582_v28 = vsel %vm581_vm6, %v570_v24, %v580_v26  ;;  %v3079_v21 = vcombine.low %v752_v7, %v756_v8  ;;  %v3081_v24 = vcombine.low %v753_v9, %v757_v10  ;;  %v804_v56 = vld [vmem:[#allocation3 + $0x320] sm:$0xff]  ;;  %v805_v58 = vld [vmem:[#allocation3 + $0x328] sm:$0xff] }
  0x85   : > { %v3433_v29 = vpop.eup %3432  ;;  %v3090_v26 = vcombine.high %v761_v19, %v765_v20  ;;  %v3089_v32 = vcombine.low %v761_v19, %v765_v20  ;;  %v808_v63 = vld [vmem:[#allocation3 + $0x340] sm:$0xff]  ;;  %v809_v1 = vld [vmem:[#allocation3 + $0x348] sm:$0xff] }
  0x86   : > { %v532_v30 = vpack.c.bf16 %v3433_v29, %v3433_v29  ;;  %v584_v31 = vsel %vm583_vm7, %v571_v27, %v582_v28  ;;  %v768_v27 = vld [vmem:[#allocation3 + $0x200] sm:$0xff]  ;;  %v769_v29 = vld [vmem:[#allocation3 + $0x208] sm:$0xff] }
  0x87   : > { %v772_v28 = vld [vmem:[#allocation3 + $0x220] sm:$0xff]  ;;  %v813_v2 = vld [vmem:[#allocation3 + $0x368] sm:$0xff] }
  0x88   : > { %v572_v33 = vunpack.c.l.b16 %v532_v30  ;;  %v773_v30 = vld [vmem:[#allocation3 + $0x228] sm:$0xff]  ;;  %v812_v0 = vld [vmem:[#allocation3 + $0x360] sm:$0xff]  ;;  %v3137_v8 = vcombine.low %v809_v1, %v813_v2 }
  0x89   : > { %v3098_v34 = vcombine.high %v769_v29, %v773_v30  ;;  %v3135_v7 = vcombine.low %v808_v63, %v812_v0  ;;  %v816_v9 = vld [vmem:[#allocation3 + $0x380] sm:$0xff] }
  0x8a   : > { %v586_v37 = vsel %vm585_vm8, %v572_v33, %v584_v31  ;;  %v3087_v31 = vcombine.low %v760_v17, %v764_v18  ;;  %v3096_v33 = vcombine.high %v768_v27, %v772_v28  ;;  %v820_v10 = vld [vmem:[#allocation3 + $0x3a0] sm:$0xff] }
  0x8b   : > { %v587_v40 = vpack.c.b16 %v586_v37, %v586_v37  ;;  %v777_v37 = vld [vmem:[#allocation3 + $0x248] sm:$0xff]  ;;  %v824_v19 = vld [vmem:[#allocation3 + $0x3c0] sm:$0xff] }
  0x8c   : > { %v828_v20 = vld [vmem:[#allocation3 + $0x3e0] sm:$0xff] }
  0x8d   : > { %3028 = vmatmul.mubr.msk.bf16.vlgmr.msra.gmra.mrb[0].mxu0 %vm403_vm1, %v587_v40  ;;  %3030 = vmatmul.mubr.msk.bf16.vlgmr.msra.gmra.mrb[0].mxu1 %vm403_vm1, %v587_v40  ;;  %v3097_v40 = vcombine.low %v769_v29, %v773_v30  ;;  %v832_v29 = vld [vmem:[#allocation3 + $0x400] sm:$0xff] }
  0x8e   : > { %2283 = vmatpush1.bf16.msra.mxu0 %v3031_v38  ;;  %2365 = vmatpush1.bf16.msra.mxu1 %v3033_v39  ;;  %v781_v38 = vld [vmem:[#allocation3 + $0x268] sm:$0xff]  ;;  %v3095_v39 = vcombine.low %v768_v27, %v772_v28  ;;  %v836_v30 = vld [vmem:[#allocation3 + $0x420] sm:$0xff] }
  0x8f   : > { %2284 = vmatprep.subr.bf16.mxu0 %v3040_v41  ;;  %2366 = vmatprep.subr.bf16.mxu1 %v3042_v42  ;;  %v3104_v41 = vcombine.high %v776_v35, %v780_v36  ;;  %v3106_v42 = vcombine.high %v777_v37, %v781_v38 }
  0x92   : > { %2285 = vmatpush1.bf16.msra.mxu0 %v3039_v47  ;;  %2367 = vmatpush1.bf16.msra.mxu1 %v3041_v48  ;;  %v3103_v47 = vcombine.low %v776_v35, %v780_v36  ;;  %v3105_v48 = vcombine.low %v777_v37, %v781_v38  ;;  %v537_v37 = vlaneseq }
  0x93   : > { %2286 = vmatprep.subr.bf16.mxu0 %v3048_v14  ;;  %2368 = vmatprep.subr.bf16.mxu1 %v3050_v15  ;;  %v3112_v14 = vcombine.high %v784_v43, %v788_v44  ;;  %v3114_v15 = vcombine.high %v785_v45, %v789_v46 }
  0x94   : > { %v3809_v38 = vshrl.u32 %v537_v37, 7  ;;  %v880_v37 = vld [vmem:[#allocation3 + $0x580] sm:$0xff] }
  0x96   : > { %2287 = vmatpush1.bf16.msra.mxu0 %v3047_v51  ;;  %2369 = vmatpush1.bf16.msra.mxu1 %v3049_v52  ;;  %v3111_v51 = vcombine.low %v784_v43, %v788_v44  ;;  %v3113_v52 = vcombine.low %v785_v45, %v789_v46  ;;  %vm2616_vm9 = vcmp.lt.s32.totalorder %v3809_v38, 4 }
  0x97   : > { %2288 = vmatprep.subr.bf16.mxu0 %v3056_v53  ;;  %2370 = vmatprep.subr.bf16.mxu1 %v3058_v54  ;;  %v3120_v53 = vcombine.high %v792_v22, %v796_v23  ;;  %v3122_v54 = vcombine.high %v793_v49, %v797_v50 }
  0x9a   : > { %2289 = vmatpush1.bf16.msra.mxu0 %v3055_v59  ;;  %2371 = vmatpush1.bf16.msra.mxu1 %v3057_v60  ;;  %v3119_v59 = vcombine.low %v792_v22, %v796_v23  ;;  %v3121_v60 = vcombine.low %v793_v49, %v797_v50 }
  0x9b   : > { %2290 = vmatprep.subr.bf16.mxu0 %v3064_v61  ;;  %2372 = vmatprep.subr.bf16.mxu1 %v3066_v62  ;;  %v3128_v61 = vcombine.high %v800_v55, %v804_v56  ;;  %v3130_v62 = vcombine.high %v801_v57, %v805_v58 }
  0x9e   : > { %2291 = vmatpush1.bf16.msra.mxu0 %v3063_v3  ;;  %2373 = vmatpush1.bf16.msra.mxu1 %v3065_v4  ;;  %v3127_v3 = vcombine.low %v800_v55, %v804_v56  ;;  %v3129_v4 = vcombine.low %v801_v57, %v805_v58  ;;  %v844_v56 = vld [vmem:[#allocation3 + $0x460] sm:$0xff]  ;;  %v841_v57 = vld [vmem:[#allocation3 + $0x448] sm:$0xff] }
  0x9f   : > { %2292 = vmatprep.subr.bf16.mxu0 %v3072_v5  ;;  %2374 = vmatprep.subr.bf16.mxu1 %v3074_v6  ;;  %v3136_v5 = vcombine.high %v808_v63, %v812_v0  ;;  %v3138_v6 = vcombine.high %v809_v1, %v813_v2  ;;  %v845_v58 = vld [vmem:[#allocation3 + $0x468] sm:$0xff]  ;;  %v848_v0 = vld [vmem:[#allocation3 + $0x480] sm:$0xff] }
  0xa0   : > { %v3170_v63 = vcombine.high %v841_v57, %v845_v58  ;;  %v852_v1 = vld [vmem:[#allocation3 + $0x4a0] sm:$0xff]  ;;  %v849_v2 = vld [vmem:[#allocation3 + $0x488] sm:$0xff] }
  0xa2   : > { %2293 = vmatpush1.bf16.msra.mxu0 %v3071_v11  ;;  %2375 = vmatpush1.bf16.msra.mxu1 %v3073_v12  ;;  %v817_v11 = vld [vmem:[#allocation3 + $0x388] sm:$0xff]  ;;  %v3144_v12 = vcombine.high %v816_v9, %v820_v10 }
  0xa3   : > { %2294 = vmatprep.subr.bf16.mxu0 %v3080_v13  ;;  %2376 = vmatprep.subr.bf16.mxu1 %v3082_v16  ;;  %v821_v13 = vld [vmem:[#allocation3 + $0x3a8] sm:$0xff]  ;;  %v3143_v16 = vcombine.low %v816_v9, %v820_v10  ;;  %v856_v9 = vld [vmem:[#allocation3 + $0x4c0] sm:$0xff] }
  0xa4   : > { %v3145_v17 = vcombine.low %v817_v11, %v821_v13  ;;  %v3146_v18 = vcombine.high %v817_v11, %v821_v13  ;;  %v860_v10 = vld [vmem:[#allocation3 + $0x4e0] sm:$0xff]  ;;  %v857_v11 = vld [vmem:[#allocation3 + $0x4c8] sm:$0xff]  ;;  %v3175_v13 = vcombine.low %v848_v0, %v852_v1 }
  0xa6   : > { %2295 = vmatpush1.bf16.msra.mxu0 %v3079_v21  ;;  %2377 = vmatpush1.bf16.msra.mxu1 %v3081_v24  ;;  %v825_v21 = vld [vmem:[#allocation3 + $0x3c8] sm:$0xff]  ;;  %v3152_v24 = vcombine.high %v824_v19, %v828_v20 }
  0xa7   : > { %2296 = vmatprep.subr.bf16.mxu0 %v3088_v25  ;;  %2378 = vmatprep.subr.bf16.mxu1 %v3090_v26  ;;  %v829_v25 = vld [vmem:[#allocation3 + $0x3e8] sm:$0xff]  ;;  %v3151_v26 = vcombine.low %v824_v19, %v828_v20  ;;  %v864_v19 = vld [vmem:[#allocation3 + $0x500] sm:$0xff] }
  0xa8   : > { %v3153_v27 = vcombine.low %v825_v21, %v829_v25  ;;  %v3154_v28 = vcombine.high %v825_v21, %v829_v25  ;;  %v868_v20 = vld [vmem:[#allocation3 + $0x520] sm:$0xff]  ;;  %v865_v21 = vld [vmem:[#allocation3 + $0x508] sm:$0xff]  ;;  %v3183_v25 = vcombine.low %v856_v9, %v860_v10 }
  0xaa   : > { %2297 = vmatpush1.bf16.msra.mxu0 %v3087_v31  ;;  %2379 = vmatpush1.bf16.msra.mxu1 %v3089_v32  ;;  %v833_v31 = vld [vmem:[#allocation3 + $0x408] sm:$0xff]  ;;  %v3160_v32 = vcombine.high %v832_v29, %v836_v30 }
  0xab   : > { %2298 = vmatprep.subr.bf16.mxu0 %v3096_v33  ;;  %2380 = vmatprep.subr.bf16.mxu1 %v3098_v34  ;;  %v837_v33 = vld [vmem:[#allocation3 + $0x428] sm:$0xff]  ;;  %v3159_v34 = vcombine.low %v832_v29, %v836_v30  ;;  %v872_v29 = vld [vmem:[#allocation3 + $0x540] sm:$0xff] }
  0xac   : > { %v3161_v35 = vcombine.low %v833_v31, %v837_v33  ;;  %v3162_v36 = vcombine.high %v833_v31, %v837_v33  ;;  %v876_v30 = vld [vmem:[#allocation3 + $0x560] sm:$0xff]  ;;  %v873_v31 = vld [vmem:[#allocation3 + $0x548] sm:$0xff]  ;;  %v3191_v33 = vcombine.low %v864_v19, %v868_v20 }
  0xae   : > { %2299 = vmatpush1.bf16.msra.mxu0 %v3095_v39  ;;  %2381 = vmatpush1.bf16.msra.mxu1 %v3097_v40  ;;  %v539_v39 = vsub.s32 0, %v3809_v38  ;;  %v3815_v40 = vld [vmem:[%s4050_s3] sm:$0xf] }
  0xaf   : > { %2300 = vmatprep.subr.bf16.mxu0 %v3104_v41  ;;  %2382 = vmatprep.subr.bf16.mxu1 %v3106_v42  ;;  %v543_v41 = vsub.s32 1, %v3809_v38  ;;  %v551_v42 = vsub.s32 3, %v3809_v38 }
  0xb0   : > { %v540_v43 = vrot.slane %v3815_v40, %v539_v39 }
  0xb1   : > { %v544_v44 = vrot.slane %v3815_v40, %v543_v41  ;;  %v552_v45 = vrot.slane %v3815_v40, %v551_v42 }
  0xb2   : > { %2301 = vmatpush1.bf16.msra.mxu0 %v3103_v47  ;;  %2383 = vmatpush1.bf16.msra.mxu1 %v3105_v48 }
  0xb3   : > { %2302 = vmatprep.subr.bf16.mxu0 %v3112_v14  ;;  %2384 = vmatprep.subr.bf16.mxu1 %v3114_v15 }
  0xb6   : > { %2303 = vmatpush1.bf16.msra.mxu0 %v3111_v51  ;;  %2385 = vmatpush1.bf16.msra.mxu1 %v3113_v52 }
  0xb7   : > { %2304 = vmatprep.subr.bf16.mxu0 %v3120_v53  ;;  %2386 = vmatprep.subr.bf16.mxu1 %v3122_v54  ;;  %v840_v53 = vld [vmem:[#allocation3 + $0x440] sm:$0xff] }
  0xba   : > { %2305 = vmatpush1.bf16.msra.mxu0 %v3119_v59  ;;  %2387 = vmatpush1.bf16.msra.mxu1 %v3121_v60 }
  0xbb   : > { %2306 = vmatprep.subr.bf16.mxu0 %v3128_v61  ;;  %2388 = vmatprep.subr.bf16.mxu1 %v3130_v62  ;;  %v3168_v62 = vcombine.high %v840_v53, %v844_v56 }
  0xbe   : > { %2307 = vmatpush1.bf16.msra.mxu0 %v3127_v3  ;;  %2389 = vmatpush1.bf16.msra.mxu1 %v3129_v4  ;;  %v853_v3 = vld [vmem:[#allocation3 + $0x4a8] sm:$0xff] }
  0xbf   : > { %2308 = vmatprep.subr.bf16.mxu0 %v3136_v5  ;;  %2390 = vmatprep.subr.bf16.mxu1 %v3138_v6  ;;  %v3167_v5 = vcombine.low %v840_v53, %v844_v56  ;;  %v3169_v6 = vcombine.low %v841_v57, %v845_v58  ;;  %v900_v56 = vld [vmem:[#allocation3 + $0x620] sm:$0xff]  ;;  %v897_v57 = vld [vmem:[#allocation3 + $0x608] sm:$0xff] }
  0xc0   : > { %v901_v58 = vld [vmem:[#allocation3 + $0x628] sm:$0xff] }
  0xc2   : > { %2309 = vmatpush1.bf16.msra.mxu0 %v3135_v7  ;;  %2391 = vmatpush1.bf16.msra.mxu1 %v3137_v8  ;;  %v3176_v7 = vcombine.high %v848_v0, %v852_v1  ;;  %v3178_v8 = vcombine.high %v849_v2, %v853_v3  ;;  %v3226_v0 = vcombine.high %v897_v57, %v901_v58  ;;  %v904_v1 = vld [vmem:[#allocation3 + $0x640] sm:$0xff] }
  0xc3   : > { %2310 = vmatprep.subr.bf16.mxu0 %v3144_v12  ;;  %2392 = vmatprep.subr.bf16.mxu1 %v3146_v18  ;;  %v861_v12 = vld [vmem:[#allocation3 + $0x4e8] sm:$0xff] }
  0xc4   : > { %v3186_v18 = vcombine.high %v857_v11, %v861_v12 }
  0xc6   : > { %2311 = vmatpush1.bf16.msra.mxu0 %v3143_v16  ;;  %2393 = vmatpush1.bf16.msra.mxu1 %v3145_v17  ;;  %v3177_v16 = vcombine.low %v849_v2, %v853_v3  ;;  %v3184_v17 = vcombine.high %v856_v9, %v860_v10  ;;  %v908_v2 = vld [vmem:[#allocation3 + $0x660] sm:$0xff]  ;;  %v905_v3 = vld [vmem:[#allocation3 + $0x648] sm:$0xff] }
  0xc7   : > { %2312 = vmatprep.subr.bf16.mxu0 %v3152_v24  ;;  %2394 = vmatprep.subr.bf16.mxu1 %v3154_v28  ;;  %v869_v24 = vld [vmem:[#allocation3 + $0x528] sm:$0xff]  ;;  %v912_v10 = vld [vmem:[#allocation3 + $0x680] sm:$0xff] }
  0xc8   : > { %v3194_v28 = vcombine.high %v865_v21, %v869_v24 }
  0xca   : > { %2313 = vmatpush1.bf16.msra.mxu0 %v3151_v26  ;;  %2395 = vmatpush1.bf16.msra.mxu1 %v3153_v27  ;;  %v3185_v26 = vcombine.low %v857_v11, %v861_v12  ;;  %v3192_v27 = vcombine.high %v864_v19, %v868_v20  ;;  %v916_v11 = vld [vmem:[#allocation3 + $0x6a0] sm:$0xff]  ;;  %v913_v12 = vld [vmem:[#allocation3 + $0x688] sm:$0xff] }
  0xcb   : > { %2323 = vmatprep.subr.bf16.mxu0 %v3160_v32  ;;  %2405 = vmatprep.subr.bf16.mxu1 %v3162_v36  ;;  %v877_v32 = vld [vmem:[#allocation3 + $0x568] sm:$0xff]  ;;  %v920_v20 = vld [vmem:[#allocation3 + $0x6c0] sm:$0xff] }
  0xcc   : > { %v3202_v36 = vcombine.high %v873_v31, %v877_v32 }
 0x160   : > { %v648_v46 = vpop.f32.mrb[0].mxu0  ;;  %v3828_v47 = vpop.f32.mrb[0].mxu1 }
 0x161   : > { %v649_v48 = vadd.f32 %v648_v46, %v540_v43  ;;  %v650_v14 = vpop.f32.mrb[1].mxu0  ;;  %v691_v15 = vpop.f32.mrb[1].mxu1  ;;  %v884_v43 = vld [vmem:[#allocation3 + $0x5a0] sm:$0xff]  ;;  %v3199_v46 = vcombine.low %v872_v29, %v876_v30 }
 0x162   : > { %v651_v22 = vadd.f32 %v650_v14, %v544_v44  ;;  %v652_v23 = vpop.f32.mrb[2].mxu0  ;;  %v692_v49 = vadd.f32 %v691_v15, %v552_v45  ;;  %v693_v50 = vpop.f32.mrb[2].mxu1  ;;  %v881_v44 = vld [vmem:[#allocation3 + $0x588] sm:$0xff]  ;;  %v3208_v14 = vcombine.high %v880_v37, %v884_v43 }
 0x163   : > { %v696_v51 = vmax.f32 %v649_v48, 0.0  ;;  %v653_v52 = vpop.f32.mrb[3].mxu0  ;;  %v694_v54 = vpop.f32.mrb[3].mxu1  ;;  %v885_v45 = vld [vmem:[#allocation3 + $0x5a8] sm:$0xff]  ;;  %v3201_v48 = vcombine.low %v873_v31, %v877_v32  ;;  %v892_v23 = vld [vmem:[#allocation3 + $0x5e0] sm:$0xff] }
 0x164   : > { %v697_v55 = vmax.f32 %v651_v22, 0.0  ;;  %v699_v59 = vmax.f32 %v692_v49, 0.0  ;;  %v3210_v15 = vcombine.high %v881_v44, %v885_v45  ;;  %v888_v22 = vld [vmem:[#allocation3 + $0x5c0] sm:$0xff]  ;;  %v889_v49 = vld [vmem:[#allocation3 + $0x5c8] sm:$0xff]  ;;  %v3209_v52 = vcombine.low %v881_v44, %v885_v45 }
 0x165   : > { %v3832_v61 = vpack.c.bf16 %v696_v51, %v696_v51  ;;  %v893_v50 = vld [vmem:[#allocation3 + $0x5e8] sm:$0xff]  ;;  %v3207_v51 = vcombine.low %v880_v37, %v884_v43  ;;  %v3216_v53 = vcombine.high %v888_v22, %v892_v23  ;;  %v932_v31 = vld [vmem:[#allocation3 + $0x720] sm:$0xff] }
 0x166   : > { %v3830_v60 = vpack.c.bf16 %v697_v55, %v697_v55  ;;  %v3836_v4 = vpack.c.bf16 %v699_v59, %v699_v59  ;;  %v3218_v54 = vcombine.high %v889_v49, %v893_v50  ;;  %v896_v55 = vld [vmem:[#allocation3 + $0x600] sm:$0xff]  ;;  %v3215_v59 = vcombine.low %v888_v22, %v892_v23  ;;  %v929_v32 = vld [vmem:[#allocation3 + $0x708] sm:$0xff] }
 0x167   : > { %v936_v43 = vld [vmem:[#allocation3 + $0x740] sm:$0xff]  ;;  %v937_v45 = vld [vmem:[#allocation3 + $0x748] sm:$0xff] }
 0x168   : > { %2314 = vmatprep.mubr.bf16.mxu0 %v3830_v60  ;;  %2396 = vmatprep.mubr.bf16.mxu1 %v3830_v60  ;;  %v940_v44 = vld [vmem:[#allocation3 + $0x760] sm:$0xff] }
 0x169   : > { %2315 = vmatmul.mubr.bf16.vlgmr.msra.gmra.mrb[4].mxu0 %v3832_v61  ;;  %2397 = vmatmul.mubr.bf16.vlgmr.msra.gmra.mrb[4].mxu1 %v3832_v61  ;;  %v3264_v22 = vcombine.high %v936_v43, %v940_v44 }
 0x16a   : > { %2324 = vmatpush1.bf16.msra.mxu0 %v3159_v34  ;;  %2406 = vmatpush1.bf16.msra.mxu1 %v3161_v35  ;;  %v3193_v34 = vcombine.low %v865_v21, %v869_v24  ;;  %v3200_v35 = vcombine.high %v872_v29, %v876_v30  ;;  %v924_v21 = vld [vmem:[#allocation3 + $0x6e0] sm:$0xff]  ;;  %v921_v24 = vld [vmem:[#allocation3 + $0x6c8] sm:$0xff] }
 0x16b   : > { %2325 = vmatprep.subr.bf16.mxu0 %v3168_v62  ;;  %2407 = vmatprep.subr.bf16.mxu1 %v3170_v63  ;;  %v3217_v62 = vcombine.low %v889_v49, %v893_v50  ;;  %v3224_v63 = vcombine.high %v896_v55, %v900_v56  ;;  %v928_v30 = vld [vmem:[#allocation3 + $0x700] sm:$0xff] }
 0x16c   : > { %2355 = vmatprep.mubr.bf16.mxu0 %v3836_v4  ;;  %2437 = vmatprep.mubr.bf16.mxu1 %v3836_v4  ;;  %v944_v49 = vld [vmem:[#allocation3 + $0x780] sm:$0xff] }
 0x16d   : > { %v948_v50 = vld [vmem:[#allocation3 + $0x7a0] sm:$0xff] }
 0x16e   : > { %2326 = vmatpush1.bf16.msra.mxu0 %v3167_v5  ;;  %2408 = vmatpush1.bf16.msra.mxu1 %v3169_v6  ;;  %v909_v5 = vld [vmem:[#allocation3 + $0x668] sm:$0xff]  ;;  %v3223_v6 = vcombine.low %v896_v55, %v900_v56  ;;  %v3272_v56 = vcombine.high %v944_v49, %v948_v50 }
 0x16f   : > { %2327 = vmatprep.subr.bf16.mxu0 %v3176_v7  ;;  %2409 = vmatprep.subr.bf16.mxu1 %v3178_v8  ;;  %v3225_v7 = vcombine.low %v897_v57, %v901_v58  ;;  %v3232_v8 = vcombine.high %v904_v1, %v908_v2  ;;  %v3234_v9 = vcombine.high %v905_v3, %v909_v5  ;;  %v952_v58 = vld [vmem:[#allocation3 + $0x7c0] sm:$0xff] }
 0x172   : > { %2328 = vmatpush1.bf16.msra.mxu0 %v3175_v13  ;;  %2410 = vmatpush1.bf16.msra.mxu1 %v3177_v16  ;;  %v917_v13 = vld [vmem:[#allocation3 + $0x6a8] sm:$0xff]  ;;  %v3231_v16 = vcombine.low %v904_v1, %v908_v2  ;;  %v3271_v1 = vcombine.low %v944_v49, %v948_v50 }
 0x173   : > { %2329 = vmatprep.subr.bf16.mxu0 %v3184_v17  ;;  %2411 = vmatprep.subr.bf16.mxu1 %v3186_v18  ;;  %v3233_v17 = vcombine.low %v905_v3, %v909_v5  ;;  %v3240_v18 = vcombine.high %v912_v10, %v916_v11  ;;  %v3242_v19 = vcombine.high %v913_v12, %v917_v13  ;;  %v706_v5 = vld [vmem:[#allocation3 + $0x10] sm:$0xff] }
 0x176   : > { %2330 = vmatpush1.bf16.msra.mxu0 %v3183_v25  ;;  %2412 = vmatpush1.bf16.msra.mxu1 %v3185_v26  ;;  %v925_v25 = vld [vmem:[#allocation3 + $0x6e8] sm:$0xff]  ;;  %v3239_v26 = vcombine.low %v912_v10, %v916_v11 }
 0x177   : > { %2331 = vmatprep.subr.bf16.mxu0 %v3192_v27  ;;  %2413 = vmatprep.subr.bf16.mxu1 %v3194_v28  ;;  %v3241_v27 = vcombine.low %v913_v12, %v917_v13  ;;  %v3248_v28 = vcombine.high %v920_v20, %v924_v21  ;;  %v3250_v29 = vcombine.high %v921_v24, %v925_v25  ;;  %v714_v13 = vld [vmem:[#allocation3 + $0x50] sm:$0xff] }
 0x17a   : > { %2332 = vmatpush1.bf16.msra.mxu0 %v3191_v33  ;;  %2414 = vmatpush1.bf16.msra.mxu1 %v3193_v34  ;;  %v933_v33 = vld [vmem:[#allocation3 + $0x728] sm:$0xff]  ;;  %v3247_v34 = vcombine.low %v920_v20, %v924_v21 }
 0x17b   : > { %2333 = vmatprep.subr.bf16.mxu0 %v3200_v35  ;;  %2415 = vmatprep.subr.bf16.mxu1 %v3202_v36  ;;  %v3249_v35 = vcombine.low %v921_v24, %v925_v25  ;;  %v3256_v36 = vcombine.high %v928_v30, %v932_v31  ;;  %v3258_v37 = vcombine.high %v929_v32, %v933_v33 }
 0x17e   : > { %2334 = vmatpush1.bf16.msra.mxu0 %v3199_v46  ;;  %2416 = vmatpush1.bf16.msra.mxu1 %v3201_v48  ;;  %v941_v46 = vld [vmem:[#allocation3 + $0x768] sm:$0xff]  ;;  %v547_v48 = vsub.s32 2, %v3809_v38 }
 0x17f   : > { %2335 = vmatprep.subr.bf16.mxu0 %v3208_v14  ;;  %2417 = vmatprep.subr.bf16.mxu1 %v3210_v15  ;;  %v3255_v14 = vcombine.low %v928_v30, %v932_v31  ;;  %v3257_v15 = vcombine.low %v929_v32, %v933_v33  ;;  %v3266_v23 = vcombine.high %v937_v45, %v941_v46 }
 0x180   : > { %v3265_v55 = vcombine.low %v937_v45, %v941_v46 }
 0x182   : > { %2336 = vmatpush1.bf16.msra.mxu0 %v3207_v51  ;;  %2418 = vmatpush1.bf16.msra.mxu1 %v3209_v52  ;;  %v945_v51 = vld [vmem:[#allocation3 + $0x788] sm:$0xff] }
 0x183   : > { %2337 = vmatprep.subr.bf16.mxu0 %v3216_v53  ;;  %2419 = vmatprep.subr.bf16.mxu1 %v3218_v54  ;;  %v949_v52 = vld [vmem:[#allocation3 + $0x7a8] sm:$0xff]  ;;  %v548_v53 = vrot.slane %v3815_v40, %v547_v48  ;;  %v3263_v54 = vcombine.low %v936_v43, %v940_v44 }
 0x184   : > { %v3274_v57 = vcombine.high %v945_v51, %v949_v52  ;;  %v3273_v2 = vcombine.low %v945_v51, %v949_v52  ;;  %v746_v52 = vld [vmem:[#allocation3 + $0x150] sm:$0xff] }
 0x186   : > { %2338 = vmatpush1.bf16.msra.mxu0 %v3215_v59  ;;  %2420 = vmatpush1.bf16.msra.mxu1 %v3217_v62  ;;  %v956_v59 = vld [vmem:[#allocation3 + $0x7e0] sm:$0xff]  ;;  %v953_v62 = vld [vmem:[#allocation3 + $0x7c8] sm:$0xff] }
 0x187   : > { %2339 = vmatprep.subr.bf16.mxu0 %v3224_v63  ;;  %2421 = vmatprep.subr.bf16.mxu1 %v3226_v0  ;;  %v957_v63 = vld [vmem:[#allocation3 + $0x7e8] sm:$0xff]  ;;  %v690_v0 = vadd.f32 %v3828_v47, %v548_v53  ;;  %v3280_v40 = vcombine.high %v952_v58, %v956_v59  ;;  %v3279_v10 = vcombine.low %v952_v58, %v956_v59  ;;  %v750_v53 = vld [vmem:[#allocation3 + $0x170] sm:$0xff] }
 0x188   : > { %v3282_v3 = vcombine.high %v953_v62, %v957_v63  ;;  %v3281_v11 = vcombine.low %v953_v62, %v957_v63  ;;  %v3076_v58 = vcombine.high %v746_v52, %v750_v53  ;;  %v754_v62 = vld [vmem:[#allocation3 + $0x190] sm:$0xff] }
 0x189   : > { %v758_v63 = vld [vmem:[#allocation3 + $0x1b0] sm:$0xff] }
 0x18a   : > { %2340 = vmatpush1.bf16.msra.mxu0 %v3223_v6  ;;  %2422 = vmatpush1.bf16.msra.mxu1 %v3225_v7  ;;  %v710_v6 = vld [vmem:[#allocation3 + $0x30] sm:$0xff]  ;;  %v707_v7 = vld [vmem:[#allocation3 + $0x18] sm:$0xff] }
 0x18b   : > { %2341 = vmatprep.subr.bf16.mxu0 %v3232_v8  ;;  %2423 = vmatprep.subr.bf16.mxu1 %v3234_v9  ;;  %v711_v8 = vld [vmem:[#allocation3 + $0x38] sm:$0xff]  ;;  %v698_v9 = vmax.f32 %v690_v0, 0.0  ;;  %v3036_v47 = vcombine.high %v706_v5, %v710_v6  ;;  %v3035_v20 = vcombine.low %v706_v5, %v710_v6  ;;  %v762_v6 = vld [vmem:[#allocation3 + $0x1d0] sm:$0xff] }
 0x18c   : > { %v3038_v12 = vcombine.high %v707_v7, %v711_v8  ;;  %v3037_v21 = vcombine.low %v707_v7, %v711_v8  ;;  %v755_v0 = vld [vmem:[#allocation3 + $0x198] sm:$0xff]  ;;  %v766_v7 = vld [vmem:[#allocation3 + $0x1f0] sm:$0xff] }
 0x18d   : > { %v763_v8 = vld [vmem:[#allocation3 + $0x1d8] sm:$0xff] }
 0x18e   : > { %2342 = vmatpush1.bf16.msra.mxu0 %v3231_v16  ;;  %2424 = vmatpush1.bf16.msra.mxu1 %v3233_v17  ;;  %v3847_v16 = vpack.c.bf16 %v698_v9, %v698_v9  ;;  %v718_v17 = vld [vmem:[#allocation3 + $0x70] sm:$0xff]  ;;  %v767_v9 = vld [vmem:[#allocation3 + $0x1f8] sm:$0xff] }
 0x18f   : > { %2343 = vmatprep.subr.bf16.mxu0 %v3240_v18  ;;  %2425 = vmatprep.subr.bf16.mxu1 %v3242_v19  ;;  %v715_v18 = vld [vmem:[#allocation3 + $0x58] sm:$0xff]  ;;  %v3044_v24 = vcombine.high %v714_v13, %v718_v17  ;;  %v3043_v30 = vcombine.low %v714_v13, %v718_v17  ;;  %v770_v13 = vld [vmem:[#allocation3 + $0x210] sm:$0xff] }
 0x190   : > { %v719_v19 = vld [vmem:[#allocation3 + $0x78] sm:$0xff]  ;;  %v774_v17 = vld [vmem:[#allocation3 + $0x230] sm:$0xff] }
 0x191   : > { %v3046_v25 = vcombine.high %v715_v18, %v719_v19  ;;  %v3045_v31 = vcombine.low %v715_v18, %v719_v19  ;;  %v771_v18 = vld [vmem:[#allocation3 + $0x218] sm:$0xff] }
 0x192   : > { %2344 = vmatpush1.bf16.msra.mxu0 %v3239_v26  ;;  %2426 = vmatpush1.bf16.msra.mxu1 %v3241_v27  ;;  %v722_v26 = vld [vmem:[#allocation3 + $0x90] sm:$0xff]  ;;  %v775_v19 = vld [vmem:[#allocation3 + $0x238] sm:$0xff] }
 0x193   : > { %2345 = vmatprep.subr.bf16.mxu0 %v3248_v28  ;;  %2427 = vmatprep.subr.bf16.mxu1 %v3250_v29  ;;  %v726_v27 = vld [vmem:[#allocation3 + $0xb0] sm:$0xff]  ;;  %v723_v28 = vld [vmem:[#allocation3 + $0x98] sm:$0xff] }
 0x194   : > { %v727_v29 = vld [vmem:[#allocation3 + $0xb8] sm:$0xff]  ;;  %v3052_v32 = vcombine.high %v722_v26, %v726_v27  ;;  %v3051_v43 = vcombine.low %v722_v26, %v726_v27  ;;  %v778_v26 = vld [vmem:[#allocation3 + $0x250] sm:$0xff] }
 0x195   : > { %v3054_v33 = vcombine.high %v723_v28, %v727_v29  ;;  %v3053_v44 = vcombine.low %v723_v28, %v727_v29  ;;  %v782_v27 = vld [vmem:[#allocation3 + $0x270] sm:$0xff]  ;;  %v779_v28 = vld [vmem:[#allocation3 + $0x258] sm:$0xff] }
 0x196   : > { %2346 = vmatpush1.bf16.msra.mxu0 %v3247_v34  ;;  %2428 = vmatpush1.bf16.msra.mxu1 %v3249_v35  ;;  %v730_v34 = vld [vmem:[#allocation3 + $0xd0] sm:$0xff]  ;;  %v783_v29 = vld [vmem:[#allocation3 + $0x278] sm:$0xff] }
 0x197   : > { %2347 = vmatprep.subr.bf16.mxu0 %v3256_v36  ;;  %2429 = vmatprep.subr.bf16.mxu1 %v3258_v37  ;;  %v734_v35 = vld [vmem:[#allocation3 + $0xf0] sm:$0xff]  ;;  %v731_v36 = vld [vmem:[#allocation3 + $0xd8] sm:$0xff] }
 0x198   : > { %v735_v37 = vld [vmem:[#allocation3 + $0xf8] sm:$0xff]  ;;  %v3060_v45 = vcombine.high %v730_v34, %v734_v35 }
 0x199   : > { %v3062_v46 = vcombine.high %v731_v36, %v735_v37  ;;  %v3061_v49 = vcombine.low %v731_v36, %v735_v37  ;;  %v787_v36 = vld [vmem:[#allocation3 + $0x298] sm:$0xff] }
 0x19a   : > { %2348 = vmatpush1.bf16.msra.mxu0 %v3255_v14  ;;  %2430 = vmatpush1.bf16.msra.mxu1 %v3257_v15  ;;  %v738_v14 = vld [vmem:[#allocation3 + $0x110] sm:$0xff]  ;;  %v791_v37 = vld [vmem:[#allocation3 + $0x2b8] sm:$0xff] }
 0x19b   : > { %2349 = vmatprep.subr.bf16.mxu0 %v3264_v22  ;;  %2431 = vmatprep.subr.bf16.mxu1 %v3266_v23  ;;  %v742_v15 = vld [vmem:[#allocation3 + $0x130] sm:$0xff]  ;;  %v743_v22 = vld [vmem:[#allocation3 + $0x138] sm:$0xff]  ;;  %v3059_v23 = vcombine.low %v730_v34, %v734_v35 }
 0x19c   : > { %v3068_v50 = vcombine.high %v738_v14, %v742_v15  ;;  %v786_v34 = vld [vmem:[#allocation3 + $0x290] sm:$0xff] }
 0x19d   : > { %v790_v35 = vld [vmem:[#allocation3 + $0x2b0] sm:$0xff] }
 0x19e   : > { %2350 = vmatpush1.bf16.msra.mxu0 %v3263_v54  ;;  %2432 = vmatpush1.bf16.msra.mxu1 %v3265_v55  ;;  %v747_v54 = vld [vmem:[#allocation3 + $0x158] sm:$0xff] }
 0x19f   : > { %2351 = vmatprep.subr.bf16.mxu0 %v3272_v56  ;;  %2433 = vmatprep.subr.bf16.mxu1 %v3274_v57  ;;  %v751_v55 = vld [vmem:[#allocation3 + $0x178] sm:$0xff]  ;;  %v3067_v56 = vcombine.low %v738_v14, %v742_v15  ;;  %v794_v14 = vld [vmem:[#allocation3 + $0x2d0] sm:$0xff] }
 0x1a0   : > { %v3078_v59 = vcombine.high %v747_v54, %v751_v55  ;;  %v798_v15 = vld [vmem:[#allocation3 + $0x2f0] sm:$0xff] }
 0x1a2   : > { %2352 = vmatpush1.bf16.msra.mxu0 %v3271_v1  ;;  %2434 = vmatpush1.bf16.msra.mxu1 %v3273_v2  ;;  %v759_v1 = vld [vmem:[#allocation3 + $0x1b8] sm:$0xff]  ;;  %v3075_v2 = vcombine.low %v746_v52, %v750_v53  ;;  %v802_v52 = vld [vmem:[#allocation3 + $0x310] sm:$0xff] }
 0x1a3   : > { %2353 = vmatprep.subr.bf16.mxu0 %v3280_v40  ;;  %2435 = vmatprep.subr.bf16.mxu1 %v3282_v3  ;;  %v3077_v40 = vcombine.low %v747_v54, %v751_v55  ;;  %v3084_v3 = vcombine.high %v754_v62, %v758_v63  ;;  %v3086_v5 = vcombine.high %v755_v0, %v759_v1  ;;  %v806_v53 = vld [vmem:[#allocation3 + $0x330] sm:$0xff]  ;;  %v803_v54 = vld [vmem:[#allocation3 + $0x318] sm:$0xff] }
 0x1a4   : > { %v807_v55 = vld [vmem:[#allocation3 + $0x338] sm:$0xff] }
 0x1a6   : > { %2354 = vmatpush1.bf16.msra.mxu0 %v3279_v10  ;;  %2436 = vmatpush1.bf16.msra.mxu1 %v3281_v11  ;;  %v3083_v10 = vcombine.low %v754_v62, %v758_v63  ;;  %v3085_v11 = vcombine.low %v755_v0, %v759_v1  ;;  %v810_v62 = vld [vmem:[#allocation3 + $0x350] sm:$0xff]  ;;  %v811_v0 = vld [vmem:[#allocation3 + $0x358] sm:$0xff] }
 0x1a7   : > { %2446 = vmatprep.subr.bf16.mxu0 %v3036_v47  ;;  %2528 = vmatprep.subr.bf16.mxu1 %v3038_v12  ;;  %v3092_v47 = vcombine.high %v762_v6, %v766_v7  ;;  %v3094_v12 = vcombine.high %v763_v8, %v767_v9  ;;  %v814_v63 = vld [vmem:[#allocation3 + $0x370] sm:$0xff]  ;;  %v815_v1 = vld [vmem:[#allocation3 + $0x378] sm:$0xff] }
 0x1a9   : > { %2356 = vmatmul.mubr.bf16.vlgmr.msra.gmra.mrb[4].mxu0 %v3847_v16  ;;  %2438 = vmatmul.mubr.bf16.vlgmr.msra.gmra.mrb[4].mxu1 %v3847_v16 }
 0x1aa   : > { %2447 = vmatpush1.bf16.msra.mxu0 %v3035_v20  ;;  %2478 = vmatprep.mubr.bf16.mxu0 %v3830_v60  ;;  %v3091_v20 = vcombine.low %v762_v6, %v766_v7  ;;  %v818_v6 = vld [vmem:[#allocation3 + $0x390] sm:$0xff] }
 0x1ab   : > { %2529 = vmatpush1.bf16.msra.mxu1 %v3037_v21  ;;  %2560 = vmatprep.mubr.bf16.mxu1 %v3830_v60  ;;  %v739_v60 = vld [vmem:[#allocation3 + $0x118] sm:$0xff]  ;;  %v3093_v21 = vcombine.low %v763_v8, %v767_v9  ;;  %v822_v7 = vld [vmem:[#allocation3 + $0x3b0] sm:$0xff] }
 0x1ac   : > { %2448 = vmatprep.subr.bf16.mxu0 %v3044_v24  ;;  %2530 = vmatprep.subr.bf16.mxu1 %v3046_v25  ;;  %v3070_v51 = vcombine.high %v739_v60, %v743_v22  ;;  %v3069_v57 = vcombine.low %v739_v60, %v743_v22  ;;  %v3100_v24 = vcombine.high %v770_v13, %v774_v17  ;;  %v795_v60 = vld [vmem:[#allocation3 + $0x2d8] sm:$0xff] }
 0x1ad   : > { %v3102_v25 = vcombine.high %v771_v18, %v775_v19  ;;  %v799_v22 = vld [vmem:[#allocation3 + $0x2f8] sm:$0xff] }
 0x1ae   : > { %2449 = vmatpush1.bf16.msra.mxu0 %v3043_v30  ;;  %v3099_v30 = vcombine.low %v770_v13, %v774_v17  ;;  %v819_v8 = vld [vmem:[#allocation3 + $0x398] sm:$0xff]  ;;  %v826_v13 = vld [vmem:[#allocation3 + $0x3d0] sm:$0xff] }
 0x1af   : > { %2531 = vmatpush1.bf16.msra.mxu1 %v3045_v31  ;;  %2450 = vmatprep.subr.bf16.mxu0 %v3052_v32  ;;  %v3101_v31 = vcombine.low %v771_v18, %v775_v19  ;;  %v3108_v32 = vcombine.high %v778_v26, %v782_v27  ;;  %v823_v9 = vld [vmem:[#allocation3 + $0x3b8] sm:$0xff]  ;;  %v830_v17 = vld [vmem:[#allocation3 + $0x3f0] sm:$0xff] }
 0x1b0   : > { %2532 = vmatprep.subr.bf16.mxu1 %v3054_v33  ;;  %v3110_v33 = vcombine.high %v779_v28, %v783_v29  ;;  %v827_v18 = vld [vmem:[#allocation3 + $0x3d8] sm:$0xff] }
 0x1b1   : > { %v831_v19 = vld [vmem:[#allocation3 + $0x3f8] sm:$0xff] }
 0x1b2   : > { %2451 = vmatpush1.bf16.msra.mxu0 %v3051_v43  ;;  %v3107_v43 = vcombine.low %v778_v26, %v782_v27  ;;  %v834_v26 = vld [vmem:[#allocation3 + $0x410] sm:$0xff] }
 0x1b3   : > { %2533 = vmatpush1.bf16.msra.mxu1 %v3053_v44  ;;  %2452 = vmatprep.subr.bf16.mxu0 %v3060_v45  ;;  %v3109_v44 = vcombine.low %v779_v28, %v783_v29  ;;  %v3116_v45 = vcombine.high %v786_v34, %v790_v35  ;;  %v838_v27 = vld [vmem:[#allocation3 + $0x430] sm:$0xff]  ;;  %v835_v28 = vld [vmem:[#allocation3 + $0x418] sm:$0xff] }
 0x1b4   : > { %2534 = vmatprep.subr.bf16.mxu1 %v3062_v46  ;;  %v3118_v46 = vcombine.high %v787_v36, %v791_v37  ;;  %v839_v29 = vld [vmem:[#allocation3 + $0x438] sm:$0xff] }
 0x1b6   : > { %2453 = vmatpush1.bf16.msra.mxu0 %v3059_v23  ;;  %v3115_v23 = vcombine.low %v786_v34, %v790_v35  ;;  %v842_v34 = vld [vmem:[#allocation3 + $0x450] sm:$0xff] }
 0x1b7   : > { %2535 = vmatpush1.bf16.msra.mxu1 %v3061_v49  ;;  %2454 = vmatprep.subr.bf16.mxu0 %v3068_v50  ;;  %v3117_v49 = vcombine.low %v787_v36, %v791_v37  ;;  %v3124_v50 = vcombine.high %v794_v14, %v798_v15  ;;  %v846_v35 = vld [vmem:[#allocation3 + $0x470] sm:$0xff]  ;;  %v3163_v36 = vcombine.low %v834_v26, %v838_v27  ;;  %v843_v37 = vld [vmem:[#allocation3 + $0x458] sm:$0xff] }
 0x1b8   : > { %2536 = vmatprep.subr.bf16.mxu1 %v3070_v51  ;;  %v3126_v51 = vcombine.high %v795_v60, %v799_v22 }
 0x1ba   : > { %2455 = vmatpush1.bf16.msra.mxu0 %v3067_v56  ;;  %v3123_v56 = vcombine.low %v794_v14, %v798_v15  ;;  %v854_v14 = vld [vmem:[#allocation3 + $0x4b0] sm:$0xff] }
 0x1bb   : > { %2537 = vmatpush1.bf16.msra.mxu1 %v3069_v57  ;;  %2456 = vmatprep.subr.bf16.mxu0 %v3076_v58  ;;  %v3125_v57 = vcombine.low %v795_v60, %v799_v22  ;;  %v3132_v58 = vcombine.high %v802_v52, %v806_v53  ;;  %v851_v60 = vld [vmem:[#allocation3 + $0x498] sm:$0xff] }
 0x1bc   : > { %2538 = vmatprep.subr.bf16.mxu1 %v3078_v59  ;;  %v3134_v59 = vcombine.high %v803_v54, %v807_v55  ;;  %v855_v22 = vld [vmem:[#allocation3 + $0x4b8] sm:$0xff] }
 0x1be   : > { %2457 = vmatpush1.bf16.msra.mxu0 %v3075_v2  ;;  %v3131_v2 = vcombine.low %v802_v52, %v806_v53  ;;  %v858_v52 = vld [vmem:[#allocation3 + $0x4d0] sm:$0xff] }
 0x1bf   : > { %2539 = vmatpush1.bf16.msra.mxu1 %v3077_v40  ;;  %2458 = vmatprep.subr.bf16.mxu0 %v3084_v3  ;;  %v3133_v40 = vcombine.low %v803_v54, %v807_v55  ;;  %v3140_v3 = vcombine.high %v810_v62, %v814_v63  ;;  %v862_v53 = vld [vmem:[#allocation3 + $0x4f0] sm:$0xff]  ;;  %v859_v54 = vld [vmem:[#allocation3 + $0x4d8] sm:$0xff] }
 0x1c0   : > { %2540 = vmatprep.subr.bf16.mxu1 %v3086_v5  ;;  %v3142_v5 = vcombine.high %v811_v0, %v815_v1  ;;  %v863_v55 = vld [vmem:[#allocation3 + $0x4f8] sm:$0xff] }
 0x1c2   : > { %2459 = vmatpush1.bf16.msra.mxu0 %v3083_v10  ;;  %v3139_v10 = vcombine.low %v810_v62, %v814_v63  ;;  %v870_v62 = vld [vmem:[#allocation3 + $0x530] sm:$0xff]  ;;  %v867_v63 = vld [vmem:[#allocation3 + $0x518] sm:$0xff] }
 0x1c3   : > { %2541 = vmatpush1.bf16.msra.mxu1 %v3085_v11  ;;  %2460 = vmatprep.subr.bf16.mxu0 %v3092_v47  ;;  %v3141_v11 = vcombine.low %v811_v0, %v815_v1  ;;  %v3148_v47 = vcombine.high %v818_v6, %v822_v7  ;;  %v871_v0 = vld [vmem:[#allocation3 + $0x538] sm:$0xff]  ;;  %v3189_v1 = vcombine.low %v859_v54, %v863_v55 }
 0x1c4   : > { %2542 = vmatprep.subr.bf16.mxu1 %v3094_v12  ;;  %v3150_v12 = vcombine.high %v819_v8, %v823_v9 }
 0x1c6   : > { %2461 = vmatpush1.bf16.msra.mxu0 %v3091_v20  ;;  %v3147_v20 = vcombine.low %v818_v6, %v822_v7  ;;  %v875_v6 = vld [vmem:[#allocation3 + $0x558] sm:$0xff] }
 0x1c7   : > { %2543 = vmatpush1.bf16.msra.mxu1 %v3093_v21  ;;  %2462 = vmatprep.subr.bf16.mxu0 %v3100_v24  ;;  %v3149_v21 = vcombine.low %v819_v8, %v823_v9  ;;  %v3156_v24 = vcombine.high %v826_v13, %v830_v17  ;;  %v879_v7 = vld [vmem:[#allocation3 + $0x578] sm:$0xff]  ;;  %v3197_v9 = vcombine.low %v867_v63, %v871_v0 }
 0x1c8   : > { %2544 = vmatprep.subr.bf16.mxu1 %v3102_v25  ;;  %v3158_v25 = vcombine.high %v827_v18, %v831_v19 }
 0x1ca   : > { %2463 = vmatpush1.bf16.msra.mxu0 %v3099_v30  ;;  %v3155_v30 = vcombine.low %v826_v13, %v830_v17  ;;  %v883_v13 = vld [vmem:[#allocation3 + $0x598] sm:$0xff] }
 0x1cb   : > { %2545 = vmatpush1.bf16.msra.mxu1 %v3101_v31  ;;  %2464 = vmatprep.subr.bf16.mxu0 %v3108_v32  ;;  %v3157_v31 = vcombine.low %v827_v18, %v831_v19  ;;  %v3164_v32 = vcombine.high %v834_v26, %v838_v27  ;;  %v887_v17 = vld [vmem:[#allocation3 + $0x5b8] sm:$0xff]  ;;  %v3205_v19 = vcombine.low %v875_v6, %v879_v7 }
 0x1cc   : > { %2546 = vmatprep.subr.bf16.mxu1 %v3110_v33  ;;  %v3166_v33 = vcombine.high %v835_v28, %v839_v29  ;;  %v891_v26 = vld [vmem:[#allocation3 + $0x5d8] sm:$0xff] }
 0x1cd   : > { %v895_v27 = vld [vmem:[#allocation3 + $0x5f8] sm:$0xff] }
 0x1ce   : > { %2465 = vmatpush1.bf16.msra.mxu0 %v3107_v43  ;;  %v847_v43 = vld [vmem:[#allocation3 + $0x478] sm:$0xff] }
 0x1cf   : > { %2547 = vmatpush1.bf16.msra.mxu1 %v3109_v44  ;;  %2466 = vmatprep.subr.bf16.mxu0 %v3116_v45  ;;  %v3165_v44 = vcombine.low %v835_v28, %v839_v29  ;;  %v3172_v45 = vcombine.high %v842_v34, %v846_v35  ;;  %v3174_v15 = vcombine.high %v843_v37, %v847_v43 }
 0x1d0   : > { %2548 = vmatprep.subr.bf16.mxu1 %v3118_v46  ;;  %v850_v46 = vld [vmem:[#allocation3 + $0x490] sm:$0xff]  ;;  %v3213_v29 = vcombine.low %v883_v13, %v887_v17 }
 0x1d2   : > { %2467 = vmatpush1.bf16.msra.mxu0 %v3115_v23  ;;  %v3171_v23 = vcombine.low %v842_v34, %v846_v35  ;;  %v899_v34 = vld [vmem:[#allocation3 + $0x618] sm:$0xff] }
 0x1d3   : > { %2549 = vmatpush1.bf16.msra.mxu1 %v3117_v49  ;;  %2468 = vmatprep.subr.bf16.mxu0 %v3124_v50  ;;  %v3173_v49 = vcombine.low %v843_v37, %v847_v43  ;;  %v3180_v50 = vcombine.high %v850_v46, %v854_v14  ;;  %v903_v35 = vld [vmem:[#allocation3 + $0x638] sm:$0xff]  ;;  %v3221_v37 = vcombine.low %v891_v26, %v895_v27 }
 0x1d4   : > { %2550 = vmatprep.subr.bf16.mxu1 %v3126_v51  ;;  %v3182_v51 = vcombine.high %v851_v60, %v855_v22 }
 0x1d6   : > { %2469 = vmatpush1.bf16.msra.mxu0 %v3123_v56  ;;  %v3179_v56 = vcombine.low %v850_v46, %v854_v14  ;;  %v910_v46 = vld [vmem:[#allocation3 + $0x670] sm:$0xff]  ;;  %v907_v14 = vld [vmem:[#allocation3 + $0x658] sm:$0xff] }
 0x1d7   : > { %2551 = vmatpush1.bf16.msra.mxu1 %v3125_v57  ;;  %2470 = vmatprep.subr.bf16.mxu0 %v3132_v58  ;;  %v3188_v57 = vcombine.high %v858_v52, %v862_v53  ;;  %v3190_v58 = vcombine.high %v859_v54, %v863_v55 }
 0x1d8   : > { %2552 = vmatprep.subr.bf16.mxu1 %v3134_v59  ;;  %v866_v59 = vld [vmem:[#allocation3 + $0x510] sm:$0xff] }
 0x1d9   : > { %v3195_v8 = vcombine.low %v866_v59, %v870_v62 }
 0x1da   : > { %2471 = vmatpush1.bf16.msra.mxu0 %v3131_v2  ;;  %v3196_v2 = vcombine.high %v866_v59, %v870_v62  ;;  %v923_v59 = vld [vmem:[#allocation3 + $0x6d8] sm:$0xff] }
 0x1db   : > { %2553 = vmatpush1.bf16.msra.mxu1 %v3133_v40  ;;  %2472 = vmatprep.subr.bf16.mxu0 %v3140_v3  ;;  %v3198_v40 = vcombine.high %v867_v63, %v871_v0  ;;  %v874_v3 = vld [vmem:[#allocation3 + $0x550] sm:$0xff]  ;;  %v927_v62 = vld [vmem:[#allocation3 + $0x6f8] sm:$0xff] }
 0x1dc   : > { %2554 = vmatprep.subr.bf16.mxu1 %v3142_v5  ;;  %v878_v5 = vld [vmem:[#allocation3 + $0x570] sm:$0xff] }
 0x1dd   : > { %v3203_v18 = vcombine.low %v874_v3, %v878_v5 }
 0x1de   : > { %2473 = vmatpush1.bf16.msra.mxu0 %v3139_v10  ;;  %v3204_v10 = vcombine.high %v874_v3, %v878_v5  ;;  %v931_v3 = vld [vmem:[#allocation3 + $0x718] sm:$0xff] }
 0x1df   : > { %2555 = vmatpush1.bf16.msra.mxu1 %v3141_v11  ;;  %2474 = vmatprep.subr.bf16.mxu0 %v3148_v47  ;;  %v3206_v11 = vcombine.high %v875_v6, %v879_v7  ;;  %v882_v47 = vld [vmem:[#allocation3 + $0x590] sm:$0xff]  ;;  %v935_v5 = vld [vmem:[#allocation3 + $0x738] sm:$0xff]  ;;  %v3253_v7 = vcombine.low %v923_v59, %v927_v62 }
 0x1e0   : > { %2556 = vmatprep.subr.bf16.mxu1 %v3150_v12  ;;  %v886_v12 = vld [vmem:[#allocation3 + $0x5b0] sm:$0xff] }
 0x1e1   : > { %v3211_v28 = vcombine.low %v882_v47, %v886_v12 }
 0x1e2   : > { %2475 = vmatpush1.bf16.msra.mxu0 %v3147_v20  ;;  %v3212_v20 = vcombine.high %v882_v47, %v886_v12  ;;  %v939_v47 = vld [vmem:[#allocation3 + $0x758] sm:$0xff] }
 0x1e3   : > { %2557 = vmatpush1.bf16.msra.mxu1 %v3149_v21  ;;  %2476 = vmatprep.subr.bf16.mxu0 %v3156_v24  ;;  %v3214_v21 = vcombine.high %v883_v13, %v887_v17  ;;  %v890_v24 = vld [vmem:[#allocation3 + $0x5d0] sm:$0xff]  ;;  %v943_v12 = vld [vmem:[#allocation3 + $0x778] sm:$0xff]  ;;  %v3261_v17 = vcombine.low %v931_v3, %v935_v5 }
 0x1e4   : > { %2558 = vmatprep.subr.bf16.mxu1 %v3158_v25  ;;  %v894_v25 = vld [vmem:[#allocation3 + $0x5f0] sm:$0xff] }
 0x1e6   : > { %2477 = vmatpush1.bf16.msra.mxu0 %v3155_v30  ;;  %v3220_v30 = vcombine.high %v890_v24, %v894_v25 }
 0x1e7   : > { %2559 = vmatpush1.bf16.msra.mxu1 %v3157_v31  ;;  %2487 = vmatprep.subr.bf16.mxu0 %v3164_v32  ;;  %v3222_v31 = vcombine.high %v891_v26, %v895_v27  ;;  %v898_v32 = vld [vmem:[#allocation3 + $0x610] sm:$0xff]  ;;  %v3269_v27 = vcombine.low %v939_v47, %v943_v12 }
 0x1e8   : > { %2569 = vmatprep.subr.bf16.mxu1 %v3166_v33  ;;  %v902_v33 = vld [vmem:[#allocation3 + $0x630] sm:$0xff] }
 0x1e9   : > { %2479 = vmatmul.mubr.bf16.vlgmr.msra.gmra.mrb[8].mxu0 %v3832_v61  ;;  %v3228_v43 = vcombine.high %v898_v32, %v902_v33 }
 0x1ea   : > { %2561 = vmatmul.mubr.bf16.vlgmr.msra.gmra.mrb[8].mxu1 %v3832_v61  ;;  %2488 = vmatpush1.bf16.msra.mxu0 %v3163_v36  ;;  %v3181_v61 = vcombine.low %v851_v60, %v855_v22  ;;  %v3219_v36 = vcombine.low %v890_v24, %v894_v25  ;;  %v3227_v60 = vcombine.low %v898_v32, %v902_v33  ;;  %v947_v24 = vld [vmem:[#allocation3 + $0x798] sm:$0xff] }
 0x1eb   : > { %2519 = vmatprep.mubr.bf16.mxu0 %v3836_v4  ;;  %2570 = vmatpush1.bf16.msra.mxu1 %v3165_v44  ;;  %v3230_v44 = vcombine.high %v899_v34, %v903_v35  ;;  %v3229_v22 = vcombine.low %v899_v34, %v903_v35  ;;  %v951_v25 = vld [vmem:[#allocation3 + $0x7b8] sm:$0xff] }
 0x1ec   : > { %2601 = vmatprep.mubr.bf16.mxu1 %v3836_v4  ;;  %2489 = vmatprep.subr.bf16.mxu0 %v3172_v45  ;;  %v3187_v4 = vcombine.low %v858_v52, %v862_v53  ;;  %v906_v45 = vld [vmem:[#allocation3 + $0x650] sm:$0xff]  ;;  %v915_v52 = vld [vmem:[#allocation3 + $0x698] sm:$0xff]  ;;  %v3277_v35 = vcombine.low %v947_v24, %v951_v25 }
 0x1ed   : > { %2571 = vmatprep.subr.bf16.mxu1 %v3174_v15  ;;  %v911_v15 = vld [vmem:[#allocation3 + $0x678] sm:$0xff]  ;;  %v3235_v54 = vcombine.low %v906_v45, %v910_v46 }
 0x1ee   : > { %2490 = vmatpush1.bf16.msra.mxu0 %v3171_v23  ;;  %v3236_v23 = vcombine.high %v906_v45, %v910_v46  ;;  %v919_v53 = vld [vmem:[#allocation3 + $0x6b8] sm:$0xff]  ;;  %v3237_v55 = vcombine.low %v907_v14, %v911_v15  ;;  %v3862_v45 = vld [vmem:[%s4052_s5] sm:$0xff] }
 0x1ef   : > { %2572 = vmatpush1.bf16.msra.mxu1 %v3173_v49  ;;  %2491 = vmatprep.subr.bf16.mxu0 %v3180_v50  ;;  %v3238_v49 = vcombine.high %v907_v14, %v911_v15  ;;  %v914_v50 = vld [vmem:[#allocation3 + $0x690] sm:$0xff]  ;;  %v3245_v0 = vcombine.low %v915_v52, %v919_v53  ;;  %v955_v32 = vld [vmem:[#allocation3 + $0x7d8] sm:$0xff]  ;;  %v965_v46 = vrot.slane %v3862_v45, %v539_v39 }
 0x1f0   : > { %2573 = vmatprep.subr.bf16.mxu1 %v3182_v51  ;;  %v918_v51 = vld [vmem:[#allocation3 + $0x6b0] sm:$0xff]  ;;  %v959_v33 = vld [vmem:[#allocation3 + $0x7f8] sm:$0xff]  ;;  %v973_v14 = vrot.slane %v3862_v45, %v547_v48  ;;  %v969_v15 = vrot.slane %v3862_v45, %v543_v41 }
 0x1f1   : > { %v3243_v63 = vcombine.low %v914_v50, %v918_v51 }
 0x1f2   : > { %2492 = vmatpush1.bf16.msra.mxu0 %v3179_v56  ;;  %v3244_v56 = vcombine.high %v914_v50, %v918_v51 }
 0x1f3   : > { %2574 = vmatpush1.bf16.msra.mxu1 %v3181_v61  ;;  %2493 = vmatprep.subr.bf16.mxu0 %v3188_v57  ;;  %v3246_v61 = vcombine.high %v915_v52, %v919_v53  ;;  %v922_v57 = vld [vmem:[#allocation3 + $0x6d0] sm:$0xff] }
 0x1f4   : > { %2575 = vmatprep.subr.bf16.mxu1 %v3190_v58  ;;  %v926_v58 = vld [vmem:[#allocation3 + $0x6f0] sm:$0xff] }
 0x1f5   : > { %v3251_v6 = vcombine.low %v922_v57, %v926_v58 }
 0x1f6   : > { %2494 = vmatpush1.bf16.msra.mxu0 %v3187_v4  ;;  %v3252_v4 = vcombine.high %v922_v57, %v926_v58 }
 0x1f7   : > { %2576 = vmatpush1.bf16.msra.mxu1 %v3189_v1  ;;  %2495 = vmatprep.subr.bf16.mxu0 %v3196_v2  ;;  %v3254_v1 = vcombine.high %v923_v59, %v927_v62  ;;  %v930_v2 = vld [vmem:[#allocation3 + $0x710] sm:$0xff] }
 0x1f8   : > { %2577 = vmatprep.subr.bf16.mxu1 %v3198_v40  ;;  %v934_v40 = vld [vmem:[#allocation3 + $0x730] sm:$0xff] }
 0x1f9   : > { %v3259_v13 = vcombine.low %v930_v2, %v934_v40 }
 0x1fa   : > { %2496 = vmatpush1.bf16.msra.mxu0 %v3195_v8  ;;  %v3260_v8 = vcombine.high %v930_v2, %v934_v40 }
 0x1fb   : > { %2578 = vmatpush1.bf16.msra.mxu1 %v3197_v9  ;;  %2497 = vmatprep.subr.bf16.mxu0 %v3204_v10  ;;  %v3262_v9 = vcombine.high %v931_v3, %v935_v5  ;;  %v938_v10 = vld [vmem:[#allocation3 + $0x750] sm:$0xff] }
 0x1fc   : > { %2579 = vmatprep.subr.bf16.mxu1 %v3206_v11  ;;  %v942_v11 = vld [vmem:[#allocation3 + $0x770] sm:$0xff] }
 0x1fd   : > { %v3267_v26 = vcombine.low %v938_v10, %v942_v11 }
 0x1fe   : > { %2498 = vmatpush1.bf16.msra.mxu0 %v3203_v18  ;;  %v3268_v18 = vcombine.high %v938_v10, %v942_v11 }
 0x1ff   : > { %2580 = vmatpush1.bf16.msra.mxu1 %v3205_v19  ;;  %2499 = vmatprep.subr.bf16.mxu0 %v3212_v20  ;;  %v3270_v19 = vcombine.high %v939_v47, %v943_v12  ;;  %v946_v20 = vld [vmem:[#allocation3 + $0x790] sm:$0xff] }
 0x200   : > { %2581 = vmatprep.subr.bf16.mxu1 %v3214_v21  ;;  %v950_v21 = vld [vmem:[#allocation3 + $0x7b0] sm:$0xff] }
 0x201   : > { %v3275_v34 = vcombine.low %v946_v20, %v950_v21 }
 0x202   : > { %2500 = vmatpush1.bf16.msra.mxu0 %v3211_v28  ;;  %v3276_v28 = vcombine.high %v946_v20, %v950_v21 }
 0x203   : > { %2582 = vmatpush1.bf16.msra.mxu1 %v3213_v29  ;;  %2501 = vmatprep.subr.bf16.mxu0 %v3220_v30  ;;  %v3278_v29 = vcombine.high %v947_v24, %v951_v25  ;;  %v954_v30 = vld [vmem:[#allocation3 + $0x7d0] sm:$0xff] }
 0x204   : > { %2583 = vmatprep.subr.bf16.mxu1 %v3222_v31  ;;  %v958_v31 = vld [vmem:[#allocation3 + $0x7f0] sm:$0xff] }
 0x206   : > { %2502 = vmatpush1.bf16.msra.mxu0 %v3219_v36  ;;  %v3284_v36 = vcombine.high %v954_v30, %v958_v31 }
 0x207   : > { %2584 = vmatpush1.bf16.msra.mxu1 %v3221_v37  ;;  %2503 = vmatprep.subr.bf16.mxu0 %v3228_v43  ;;  %v3286_v37 = vcombine.high %v955_v32, %v959_v33  ;;  %v3283_v43 = vcombine.low %v954_v30, %v958_v31 }
 0x208   : > { %2585 = vmatprep.subr.bf16.mxu1 %v3230_v44  ;;  %v3285_v44 = vcombine.low %v955_v32, %v959_v33 }
 0x20a   : > { %2504 = vmatpush1.bf16.msra.mxu0 %v3227_v60 }
 0x20b   : > { %2586 = vmatpush1.bf16.msra.mxu1 %v3229_v22  ;;  %2505 = vmatprep.subr.bf16.mxu0 %v3236_v23 }
 0x20c   : > { %2587 = vmatprep.subr.bf16.mxu1 %v3238_v49 }
 0x20e   : > { %2506 = vmatpush1.bf16.msra.mxu0 %v3235_v54 }
 0x20f   : > { %2588 = vmatpush1.bf16.msra.mxu1 %v3237_v55  ;;  %2507 = vmatprep.subr.bf16.mxu0 %v3244_v56 }
 0x210   : > { %2589 = vmatprep.subr.bf16.mxu1 %v3246_v61 }
 0x212   : > { %2508 = vmatpush1.bf16.msra.mxu0 %v3243_v63 }
 0x213   : > { %2590 = vmatpush1.bf16.msra.mxu1 %v3245_v0  ;;  %2509 = vmatprep.subr.bf16.mxu0 %v3252_v4 }
 0x214   : > { %2591 = vmatprep.subr.bf16.mxu1 %v3254_v1 }
 0x216   : > { %2510 = vmatpush1.bf16.msra.mxu0 %v3251_v6 }
 0x217   : > { %2592 = vmatpush1.bf16.msra.mxu1 %v3253_v7  ;;  %2511 = vmatprep.subr.bf16.mxu0 %v3260_v8 }
 0x218   : > { %2593 = vmatprep.subr.bf16.mxu1 %v3262_v9 }
 0x21a   : > { %2512 = vmatpush1.bf16.msra.mxu0 %v3259_v13 }
 0x21b   : > { %2594 = vmatpush1.bf16.msra.mxu1 %v3261_v17  ;;  %2513 = vmatprep.subr.bf16.mxu0 %v3268_v18 }
 0x21c   : > { %2595 = vmatprep.subr.bf16.mxu1 %v3270_v19 }
 0x21e   : > { %2514 = vmatpush1.bf16.msra.mxu0 %v3267_v26 }
 0x21f   : > { %2596 = vmatpush1.bf16.msra.mxu1 %v3269_v27  ;;  %2515 = vmatprep.subr.bf16.mxu0 %v3276_v28 }
 0x220   : > { %2597 = vmatprep.subr.bf16.mxu1 %v3278_v29 }
 0x222   : > { %2516 = vmatpush1.bf16.msra.mxu0 %v3275_v34 }
 0x223   : > { %2598 = vmatpush1.bf16.msra.mxu1 %v3277_v35  ;;  %2517 = vmatprep.subr.bf16.mxu0 %v3284_v36 }
 0x224   : > { %2599 = vmatprep.subr.bf16.mxu1 %v3286_v37 }
 0x226   : > { %2518 = vmatpush1.bf16.msra.mxu0 %v3283_v43 }
 0x227   : > { %2600 = vmatpush1.bf16.msra.mxu1 %v3285_v44 }
 0x229   : > { %2520 = vmatmul.mubr.bf16.vlgmr.msra.gmra.mrb[8].mxu0 %v3847_v16 }
 0x22a   : > { %2602 = vmatmul.mubr.bf16.vlgmr.msra.gmra.mrb[8].mxu1 %v3847_v16  ;;  %v977_v16 = vrot.slane %v3862_v45, %v551_v42 }
 0x27c   : > { %v2357_v60 = vpop.f32.mrb[4].mxu0  ;;  %v2439_v22 = vpop.f32.mrb[4].mxu1 }
 0x27d   : > { %v3310_v23 = vadd.f32 %v2357_v60, %v965_v46  ;;  %v3312_v49 = vadd.f32 %v2439_v22, %v973_v14  ;;  %v2359_v50 = vpop.f32.mrb[5].mxu0  ;;  %v2441_v51 = vpop.f32.mrb[5].mxu1 }
 0x27e   : > { %v3311_v39 = vadd.f32 %v2359_v50, %v969_v15  ;;  %v3313_v52 = vadd.f32 %v2441_v51, %v977_v16  ;;  %v2361_v53 = vpop.f32.mrb[6].mxu0  ;;  %v2443_v54 = vpop.f32.mrb[6].mxu1 }
 0x27f   : > { %3434 = vtanh.f32 %v3310_v23  ;;  %v2362_v48 = vpop.f32.mrb[7].mxu0  ;;  %v2444_v55 = vpop.f32.mrb[7].mxu1 }
 0x280   : > { %3436 = vtanh.f32 %v3312_v49 }
 0x281   : > { %3438 = vtanh.f32 %v3311_v39 }
 0x282   : > { %3440 = vtanh.f32 %v3313_v52 }
 0x289   : > { %v3435_v41 = vpop.eup %3434 }
 0x28a   : > { %v3437_v42 = vpop.eup %3436  ;;  %v2617_v59 = vrot.slane %v3435_v41, 4 }
 0x28b   : > { %v3439_v56 = vpop.eup %3438  ;;  %v2629_v62 = vrot.slane %v3437_v42, 4 }
 0x28c   : > { %v3441_v61 = vpop.eup %3440  ;;  %v3305_v57 = vpack.c.bf16 %v3439_v56, %v3435_v41  ;;  %v2623_v63 = vrot.slane %v3439_v56, 4  ;;  %v2618_v4 = vmax.f32 %v3435_v41, %v2617_v59 }
 0x28d   : > { %v3306_v58 = vpack.c.bf16 %v3441_v61, %v3437_v42  ;;  %v2635_v0 = vrot.slane %v3441_v61, 4  ;;  %v2630_v1 = vmax.f32 %v3437_v42, %v2629_v62 }
 0x28e   : > { %2825 = vst [vmem:[%s3882_s23] sm:$0xff] %v3305_v57  ;;  %v2624_v2 = vmax.f32 %v3439_v56, %v2623_v63  ;;  %v2619_v3 = vrot.slane %v2618_v4, 2  ;;  %v980_v63 = vsub.s32 4, %v3809_v38 }
 0x28f   : > { %2826 = vst [vmem:[%s3882_s23 + $0x8] sm:$0xff] %v3306_v58  ;;  %v2636_v40 = vmax.f32 %v3441_v61, %v2635_v0  ;;  %v2631_v5 = vrot.slane %v2630_v1, 2  ;;  %v988_v0 = vsub.s32 6, %v3809_v38  ;;  %s3934_s23 = scalar_lea.sflag [#allocation8], %s2832_s0 }
 0x290   : > { %v2625_v6 = vrot.slane %v2624_v2, 2  ;;  %v2620_v8 = vmax.f32 %v2618_v4, %v2619_v3  ;;  %v984_v4 = vsub.s32 5, %v3809_v38 }
 0x291   : > { %v2637_v7 = vrot.slane %v2636_v40, 2  ;;  %v2632_v9 = vmax.f32 %v2630_v1, %v2631_v5  ;;  %v992_v1 = vsub.s32 7, %v3809_v38  ;;  %v989_v5 = vrot.slane %v3862_v45, %v988_v0 }
 0x292   : > { %v2626_v10 = vmax.f32 %v2624_v2, %v2625_v6  ;;  %v2621_v47 = vrot.slane %v2620_v8, 1  ;;  %v985_v6 = vrot.slane %v3862_v45, %v984_v4 }
 0x293   : > { %v2638_v11 = vmax.f32 %v2636_v40, %v2637_v7  ;;  %v2633_v12 = vrot.slane %v2632_v9, 1  ;;  %v981_v40 = vrot.slane %v3862_v45, %v980_v63 }
 0x294   : > { %v2627_v13 = vrot.slane %v2626_v10, 1  ;;  %v2622_v18 = vmax.f32 %v2620_v8, %v2621_v47  ;;  %v993_v8 = vrot.slane %v3862_v45, %v992_v1 }
 0x295   : > { %v2639_v17 = vrot.slane %v2638_v11, 1  ;;  %v2634_v19 = vmax.f32 %v2632_v9, %v2633_v12 }
 0x296   : > { %v2628_v20 = vmax.f32 %v2626_v10, %v2627_v13  ;;  %v2641_v24 = vsub.f32 %v3435_v41, %v2622_v18 }
 0x297   : > { %v2640_v21 = vmax.f32 %v2638_v11, %v2639_v17  ;;  %v2643_v25 = vsub.f32 %v3437_v42, %v2634_v19 }
 0x298   : > { %v2642_v26 = vsub.f32 %v3439_v56, %v2628_v20  ;;  %v2645_v28 = vmul.f32 1.442695, %v2641_v24 }
 0x299   : > { %v2644_v27 = vsub.f32 %v3441_v61, %v2640_v21  ;;  %v2649_v29 = vmul.f32 1.442695, %v2643_v25 }
 0x29a   : > { %v2647_v30 = vmul.f32 1.442695, %v2642_v26  ;;  %3442 = vpow2.f32 %v2645_v28 }
 0x29b   : > { %v2651_v31 = vmul.f32 1.442695, %v2644_v27  ;;  %3444 = vpow2.f32 %v2649_v29 }
 0x29c   : > { %3446 = vpow2.f32 %v2647_v30 }
 0x29d   : > { %3448 = vpow2.f32 %v2651_v31 }
 0x2a4   : > { %v3443_v32 = vpop.eup %3442 }
 0x2a5   : > { %v3445_v33 = vpop.eup %3444  ;;  %v2655_v36 = vsel %vm2616_vm9, %v3443_v32, 0.0 }
 0x2a6   : > { %v3447_v34 = vpop.eup %3446  ;;  %v2657_v37 = vsel %vm2616_vm9, %v3445_v33, 0.0  ;;  %v2659_v44 = vrot.slane %v2655_v36, 4 }
 0x2a7   : > { %v3449_v35 = vpop.eup %3448  ;;  %v2656_v43 = vsel %vm2616_vm9, %v3447_v34, 0.0  ;;  %v2671_v14 = vrot.slane %v2657_v37, 4 }
 0x2a8   : > { %v2658_v46 = vsel %vm2616_vm9, %v3449_v35, 0.0  ;;  %v2665_v15 = vrot.slane %v2656_v43, 4  ;;  %v2660_v60 = vadd.f32 %v2659_v44, %v2655_v36 }
 0x2a9   : > { %v2677_v16 = vrot.slane %v2658_v46, 4  ;;  %v2672_v22 = vadd.f32 %v2671_v14, %v2657_v37 }
 0x2aa   : > { %v2666_v23 = vadd.f32 %v2665_v15, %v2656_v43  ;;  %v2661_v50 = vrot.slane %v2660_v60, 2 }
 0x2ab   : > { %v2678_v49 = vadd.f32 %v2677_v16, %v2658_v46  ;;  %v2673_v51 = vrot.slane %v2672_v22, 2 }
 0x2ac   : > { %v2667_v39 = vrot.slane %v2666_v23, 2  ;;  %v2662_v53 = vadd.f32 %v2661_v50, %v2660_v60 }
 0x2ad   : > { %v2679_v52 = vrot.slane %v2678_v49, 2  ;;  %v2674_v54 = vadd.f32 %v2673_v51, %v2672_v22 }
 0x2ae   : > { %v2668_v48 = vadd.f32 %v2667_v39, %v2666_v23  ;;  %v2663_v41 = vrot.slane %v2662_v53, 1 }
 0x2af   : > { %v2680_v55 = vadd.f32 %v2679_v52, %v2678_v49  ;;  %v2675_v42 = vrot.slane %v2674_v54, 1 }
 0x2b0   : > { %v2669_v56 = vrot.slane %v2668_v48, 1  ;;  %v2664_v57 = vadd.f32 %v2663_v41, %v2662_v53 }
 0x2b1   : > { %v2681_v61 = vrot.slane %v2680_v55, 1  ;;  %v2676_v58 = vadd.f32 %v2675_v42, %v2674_v54 }
 0x2b2   : > { %v2670_v59 = vadd.f32 %v2669_v56, %v2668_v48  ;;  %3450 = vrcp.f32 %v2664_v57 }
 0x2b3   : > { %v2682_v62 = vadd.f32 %v2681_v61, %v2680_v55  ;;  %3452 = vrcp.f32 %v2676_v58 }
 0x2b4   : > { %3454 = vrcp.f32 %v2670_v59 }
 0x2b5   : > { %3456 = vrcp.f32 %v2682_v62 }
 0x2bc   : > { %v3451_v2 = vpop.eup %3450 }
 0x2bd   : > { %v3453_v3 = vpop.eup %3452  ;;  %v3895_v47 = vmul.f32 %v3451_v2, %v2655_v36 }
 0x2be   : > { %v3455_v7 = vpop.eup %3454  ;;  %v3897_v18 = vmul.f32 %v3453_v3, %v2657_v37 }
 0x2bf   : > { %v3457_v9 = vpop.eup %3456  ;;  %v3899_v20 = vmul.f32 %v3455_v7, %v2656_v43 }
 0x2c0   : > { %v3904_v27 = vmul.f32 %v3457_v9, %v2658_v46 }
 0x2fc   : > { %v2521_v10 = vpop.f32.mrb[8].mxu0 }
 0x2fd   : > { %v3314_v11 = vadd.f32 %v2521_v10, %v981_v40  ;;  %v2603_v12 = vpop.f32.mrb[8].mxu1  ;;  %v2523_v13 = vpop.f32.mrb[9].mxu0 }
 0x2fe   : > { %v3316_v17 = vadd.f32 %v2603_v12, %v989_v5  ;;  %v3315_v19 = vadd.f32 %v2523_v13, %v985_v6  ;;  %v2605_v21 = vpop.f32.mrb[9].mxu1  ;;  %v2525_v24 = vpop.f32.mrb[10].mxu0 }
 0x2ff   : > { %v2691_v25 = vmul.f32 0.5, %v3314_v11  ;;  %v3902_v45 = vmul.f32 %v3314_v11, %v3895_v47  ;;  %v3317_v26 = vadd.f32 %v2605_v21, %v993_v8  ;;  %v2607_v28 = vpop.f32.mrb[10].mxu1  ;;  %v2526_v29 = vpop.f32.mrb[11].mxu0 }
 0x300   : > { %v2693_v30 = vmul.f32 0.5, %v3316_v17  ;;  %v3908_v31 = vmul.f32 %v3316_v17, %v3897_v18  ;;  %v2692_v32 = vmul.f32 0.5, %v3315_v19  ;;  %v3911_v33 = vmul.f32 %v3315_v19, %v3899_v20  ;;  %v2608_v34 = vpop.f32.mrb[11].mxu1 }
 0x301   : > { %3458 = vtanh.f32 %v2691_v25  ;;  %v3303_v35 = vpack.c.bf16 %v3315_v19, %v3314_v11  ;;  %v2694_v36 = vmul.f32 0.5, %v3317_v26  ;;  %v3918_v37 = vmul.f32 %v3317_v26, %v3904_v27 }
 0x302   : > { %3460 = vtanh.f32 %v2693_v30  ;;  %v3304_v43 = vpack.c.bf16 %v3317_v26, %v3316_v17 }
 0x303   : > { %3462 = vtanh.f32 %v2692_v32  ;;  %2807 = vst [vmem:[%s325_s16] sm:$0xff] %v3303_v35 }
 0x304   : > { %3464 = vtanh.f32 %v2694_v36  ;;  %2808 = vst [vmem:[%s325_s16 + $0x8] sm:$0xff] %v3304_v43 }
 0x305   : > { %3507 = shalt.err (!%p3504_p7)
}
 0x306   : > { %s3508_s0 = scalar_lea.hbm %s3923_s17, 256  ;;  %s3512_s20 = scalar_lea.hbm %s4054_s7, 512 }
 0x307   : > { %p3509_p8 = scmp.ne.s32.totalorder %s3923_s17, %s3508_s0  ;;  %p3513_p1 = scmp.lt.u32.totalorder %s3923_s17, %s4054_s7 }
 0x308   : > { %p3514_p0 = scmp.lt.u32.totalorder %s3512_s20, %s3508_s0  ;;  %p3516_p6 = scmp.lt.u32.totalorder %s3508_s0, %s3923_s17 }
 0x309   : > { %p3510_p11 = pnand %p3509_p8, %p4069_p9 }
 0x30a   : > { %p3515_p5 = por %p3514_p0, %p3513_p1 }
 0x30b   : > { %p3511_p13 = pneg %p3510_p11 }
 0x30c   : > { %p3517_p10 = por %p3516_p6, %p3515_p5 }
 0x30e   : > { %p3518_p12 = pnand %p3517_p10, %p3511_p13 }
 0x310   : > { %3521 = shalt.err (!%p3518_p12)
}
 0x311   : > { %3339 = dma.vmem_to_hbm [thread:$0]  (%p4069_p9), %s3925_s24, 256, %s3923_s17, %s3934_s23  }
 0x312   : > { %s3522_s1 = scalar_lea.vmem %s3932_s25, 256  ;;  %s3627_s9 = smov [#allocation9]  }
 0x313   : > { %p3523_p2 = scmp.ne.s32.totalorder %s3932_s25, %s3522_s1  ;;  %s3526_s12 = sshll.u32 %s3627_s9, 4  ;;  %s3527_s12 = int_to_ptr.vmem [resolvable:$false] %s3526_s12 }
 0x314   : > { %s3528_s0 = scalar_lea.vmem %s3527_s12, 512  ;;  %p3529_p7 = scmp.lt.s32.totalorder %s3932_s25, %s3527_s12 }
 0x315   : > { %p3524_p3 = pnand %p3523_p2, %p4069_p9  ;;  %p3530_p8 = scmp.lt.s32.totalorder %s3528_s0, %s3522_s1 }
 0x317   : > { %p3525_p4 = pneg %p3524_p3  ;;  %p3531_p11 = por %p3530_p8, %p3529_p7 }
 0x319   : > { %p3532_p13 = pnand %p3531_p11, %p3525_p4 }
 0x31b   : > { %3535 = shalt.err (!%p3532_p13)
}
 0x31c   : > { %s3536_s24 = scalar_lea.hbm %s3930_s22, 256  ;;  %s3540_s16 = scalar_lea.hbm %s4055_s8, 512 }
 0x31d   : > { %p3537_p1 = scmp.ne.s32.totalorder %s3930_s22, %s3536_s24  ;;  %p3541_p6 = scmp.lt.u32.totalorder %s3930_s22, %s4055_s8 }
 0x31e   : > { %p3542_p10 = scmp.lt.u32.totalorder %s3540_s16, %s3536_s24  ;;  %p3544_p2 = scmp.lt.u32.totalorder %s3536_s24, %s3930_s22 }
 0x31f   : > { %p3538_p0 = pnand %p3537_p1, %p4069_p9 }
 0x320   : > { %p3543_p12 = por %p3542_p10, %p3541_p6 }
 0x321   : > { %p3539_p5 = pneg %p3538_p0 }
 0x322   : > { %p3545_p3 = por %p3544_p2, %p3543_p12 }
 0x324   : > { %p3546_p4 = pnand %p3545_p3, %p3539_p5 }
 0x326   : > { %3549 = shalt.err (!%p3546_p4)
}
 0x327   : > { %3340 = dma.vmem_to_hbm [thread:$0]  (%p4069_p9), %s3932_s25, 256, %s3930_s22, %s3934_s23   ;;  %v2711_v44 = vrot.slane %v3902_v45, 4  ;;  %v2723_v46 = vrot.slane %v3908_v31, 4  ;;  %v2717_v14 = vrot.slane %v3911_v33, 4  ;;  %v3459_v15 = vpop.eup %3458  ;;  %v2729_v16 = vrot.slane %v3918_v37, 4 }
 0x328   : > { %v3461_v60 = vpop.eup %3460  ;;  %v2699_v22 = vadd.f32 1.0, %v3459_v15  ;;  %v3628_v17 = vmov 1983009808   ;;  %vm2763_vm10 = vcmask 1040384   ;;  %s3018_s25 = sshll.u32 %s3877_s19, 3  ;;  %s3307_s22 = sshll.u32 %s3696_s30, 7 }
 0x329   : > { %v2712_v23 = vadd.f32 %v2711_v44, %v3902_v45  ;;  %v3463_v49 = vpop.eup %3462  ;;  %v2701_v50 = vadd.f32 1.0, %v3461_v60  ;;  %v2724_v51 = vadd.f32 %v2723_v46, %v3908_v31  ;;  %v2718_v54 = vadd.f32 %v2717_v14, %v3911_v33  ;;  %s318_s23 = scalar_lea.vmem [#allocation6], %s3018_s25  ;;  %s4002_s12 = scalar_lea.hbm %s4053_s6, %s3307_s22 }
 0x32a   : > { %v3465_v39 = vpop.eup %3464  ;;  %v2703_v52 = vmul.f32 0.5, %v2699_v22  ;;  %v2700_v53 = vadd.f32 1.0, %v3463_v49  ;;  %v2730_v41 = vadd.f32 %v2729_v16, %v3918_v37  ;;  %s2852_s11 = sshll.u32 %s318_s23, 4  ;;  %s2828_s0 = scalar_lea.sflag [#allocation5], %s3877_s19  ;;  %s4004_s11 = int_to_ptr.vmem [resolvable:$true] %s2852_s11 }
 0x32b   : > { %v2705_v48 = vmul.f32 0.5, %v2701_v50  ;;  %v2702_v55 = vadd.f32 1.0, %v3465_v39  ;;  %v2713_v42 = vrot.slane %v2712_v23, 2  ;;  %v2725_v57 = vrot.slane %v2724_v51, 2  ;;  %s3550_s24 = scalar_lea.vmem %s4004_s11, 128  ;;  %s3629_s30 = smov [#allocation6]  }
 0x32c   : > { %v2735_v56 = vmul.f32 %v2703_v52, %v3895_v47  ;;  %v2704_v61 = vmul.f32 0.5, %v2700_v53  ;;  %v2719_v63 = vrot.slane %v2718_v54, 2  ;;  %v2731_v1 = vrot.slane %v2730_v41, 2  ;;  %p3551_p7 = scmp.ne.s32.totalorder %s4004_s11, %s3550_s24  ;;  %s3554_s17 = sshll.u32 %s3629_s30, 4  ;;  %s3555_s17 = int_to_ptr.vmem [resolvable:$false] %s3554_s17 }
 0x32d   : > { %v2737_v58 = vmul.f32 %v2705_v48, %v3897_v18  ;;  %v2706_v59 = vmul.f32 0.5, %v2702_v55  ;;  %v2714_v40 = vadd.f32 %v2713_v42, %v2712_v23  ;;  %v2726_v6 = vadd.f32 %v2725_v57, %v2724_v51  ;;  %s3556_s18 = scalar_lea.vmem %s3555_s17, 256  ;;  %p3557_p13 = scmp.lt.s32.totalorder %s4004_s11, %s3555_s17 }
 0x32e   : > { %v2739_v62 = vrot.slane %v2735_v56, 4  ;;  %v2736_v0 = vmul.f32 %v2704_v61, %v3899_v20  ;;  %v2720_v10 = vadd.f32 %v2719_v63, %v2718_v54  ;;  %v2732_v12 = vadd.f32 %v2731_v1, %v2730_v41  ;;  %p3552_p8 = pnand %p3551_p7, %p4069_p9  ;;  %p3558_p1 = scmp.lt.s32.totalorder %s3556_s18, %s3550_s24 }
 0x32f   : > { %v2751_v4 = vrot.slane %v2737_v58, 4  ;;  %v2738_v2 = vmul.f32 %v2706_v59, %v3904_v27  ;;  %v2775_v18 = vunpack.c.l.s4 %v3628_v17  ;;  %v2715_v19 = vrot.slane %v2714_v40, 1 }
 0x330   : > { %v2740_v3 = vadd.f32 %v2739_v62, %v2735_v56  ;;  %v2745_v5 = vrot.slane %v2736_v0, 4  ;;  %v2727_v24 = vrot.slane %v2726_v6, 1  ;;  %v2721_v27 = vrot.slane %v2720_v10, 1  ;;  %p3553_p11 = pneg %p3552_p8  ;;  %p3559_p0 = por %p3558_p1, %p3557_p13 }
 0x331   : > { %v2752_v7 = vadd.f32 %v2751_v4, %v2737_v58  ;;  %v2757_v8 = vrot.slane %v2738_v2, 4  ;;  %v2733_v30 = vrot.slane %v2732_v12, 1  ;;  %v2776_v32 = vunpack.c.0.s8 %v2775_v18 }
 0x332   : > { %v2741_v9 = vrot.slane %v2740_v3, 2  ;;  %v2746_v11 = vadd.f32 %v2745_v5, %v2736_v0  ;;  %v2716_v33 = vadd.f32 %v2715_v19, %v2714_v40  ;;  %v2728_v36 = vadd.f32 %v2727_v24, %v2726_v6  ;;  %p3560_p5 = pnand %p3559_p0, %p3553_p11 }
 0x333   : > { %v2753_v47 = vrot.slane %v2752_v7, 2  ;;  %v2758_v13 = vadd.f32 %v2757_v8, %v2738_v2  ;;  %v2722_v44 = vadd.f32 %v2721_v27, %v2720_v10  ;;  %v2734_v15 = vadd.f32 %v2733_v30, %v2732_v12 }
 0x334   : > { %v2742_v20 = vadd.f32 %v2741_v9, %v2740_v3  ;;  %v2747_v21 = vrot.slane %v2746_v11, 2  ;;  %v2779_v22 = vsub.s32 %v2776_v32, %v3809_v38 }
 0x335   : > { %v2754_v25 = vadd.f32 %v2753_v47, %v2752_v7  ;;  %v2759_v45 = vrot.slane %v2758_v13, 2 }
 0x336   : > { %v2743_v26 = vrot.slane %v2742_v20, 1  ;;  %v2748_v28 = vadd.f32 %v2747_v21, %v2746_v11 }
 0x337   : > { %v2755_v29 = vrot.slane %v2754_v25, 1  ;;  %v2760_v31 = vadd.f32 %v2759_v45, %v2758_v13 }
 0x338   : > { %v2744_v34 = vadd.f32 %v2743_v26, %v2742_v20  ;;  %v2749_v35 = vrot.slane %v2748_v28, 1 }
 0x339   : > { %v2756_v37 = vadd.f32 %v2755_v29, %v2754_v25  ;;  %v2761_v43 = vrot.slane %v2760_v31, 1 }
 0x33a   : > { %v2750_v46 = vadd.f32 %v2749_v35, %v2748_v28  ;;  %v2764_v14 = vsel %vm2763_vm10, %v2716_v33, %v2744_v34 }
 0x33b   : > { %v2762_v16 = vadd.f32 %v2761_v43, %v2760_v31  ;;  %v2766_v60 = vsel %vm2763_vm10, %v2728_v36, %v2756_v37 }
 0x33c   : > { %v2765_v23 = vsel %vm2763_vm10, %v2722_v44, %v2750_v46 }
 0x33d   : > { %v2767_v49 = vsel %vm2763_vm10, %v2734_v15, %v2762_v16  ;;  %v2772_v50 = vcombine.low %v2764_v14, %v2765_v23 }
 0x33e   : > { %v2773_v51 = vcombine.low %v2766_v60, %v2767_v49 }
 0x33f   : > { %v2780_v39 = vrot.slane %v2772_v50, %v2779_v22 }
 0x340   : > { %v2787_v52 = vrot.slane %v2773_v51, %v2779_v22 }
 0x342   : > { %v2788_v53 = vcombine.low %v2780_v39, %v2787_v52 }
 0x344   : > { %2790 = vst [vmem:[%s318_s23] sm:$0xff] %v2788_v53 }
 0x345   : > { %3563 = shalt.err (!%p3560_p5)
}
 0x346   : > { %s3564_s19 = scalar_lea.hbm %s4002_s12, 128  ;;  %s3568_s21 = scalar_lea.hbm %s4053_s6, 256 }
 0x347   : > { %p3565_p6 = scmp.ne.s32.totalorder %s4002_s12, %s3564_s19  ;;  %p3569_p2 = scmp.lt.u32.totalorder %s4002_s12, %s4053_s6 }
 0x348   : > { %p3570_p3 = scmp.lt.u32.totalorder %s3568_s21, %s3564_s19  ;;  %p3572_p7 = scmp.lt.u32.totalorder %s3564_s19, %s4002_s12 }
 0x349   : > { %p3566_p10 = pnand %p3565_p6, %p4069_p9 }
 0x34a   : > { %p3571_p4 = por %p3570_p3, %p3569_p2 }
 0x34b   : > { %p3567_p12 = pneg %p3566_p10 }
 0x34c   : > { %p3573_p8 = por %p3572_p7, %p3571_p4 }
 0x34e   : > { %p3574_p11 = pnand %p3573_p8, %p3567_p12 }
 0x350   : > { %3577 = shalt.err (!%p3574_p11)
}
 0x351   : > { %3338 = dma.vmem_to_hbm [thread:$0]  (%p4069_p9), %s4004_s11, 128, %s4002_s12, %s2828_s0  }
 0x352 PF: > { %p3360_p13 = scmp.ge.s32.totalorder %s3620_s29, 2  ;;  %s2892_s23 = sand.u32 1, %s3608_s26  }
 0x353   : > { %p4070_p1 = scmp.ne.s32.totalorder %s4062_s15, 0  ;;  %s2893_s1 = scalar_lea.sflag [#allocation5], %s2892_s23 }
 0x355   : > { %p3349_p0 = pnand %p3360_p13, %p4070_p1 }
 0x357   : > { %3599 = dma.done.wait (!%p3349_p0), %s2893_s1, 128  }
 0x358   : > { %3601 = vsyncadd (!%p3349_p0), %s2893_s1, 4294967168  ;;  %s4071_s9 = sadd.s32 4294967294, %s3620_s29  }
 0x359   : > { %s2901_s24 = sand.u32 1, %s4071_s9  }
 0x35a   : > { %s2902_s30 = scalar_lea.sflag [#allocation8], %s2901_s24 }
 0x35b   : > { %3603 = dma.done.wait (!%p3349_p0), %s2902_s30, 512  }
 0x35c   : > { %3605 = vsyncadd (!%p3349_p0), %s2902_s30, 4294966784  ;;  %p24_p9 = scmp.ge.s32.totalorder %s3700_s10, 4   ;;  %s4072_s26 = smov %s3612_s27 }
 0x35d   : > { %s4073_s27 = smov %s3616_s28  ;;  %s4074_s28 = smov %s3713_s13 }
 0x35e   : > { %s4075_s29 = smov %s3700_s10  ;;  %26 = sbr.rel (!%p24_p9) target bundleno = 8 (0x8), region = 116 }
 0x365   :  { %2916 = vsyncpa [#allocation4], 1 }
 0x366   :  { %2918 = vsyncpa [#allocation4 + $0x1], 1 }
 0x367   :  { %2919 = vsyncpa [#allocation5], 1 }
 0x368   :  { %2921 = vsyncpa [#allocation5 + $0x1], 1 }
 0x369   :  { %2922 = vsyncpa [#allocation8], 1 }
 0x36a   :  { %2924 = vsyncpa [#allocation8 + $0x1], 1 }

</bundles_post_ra>
